<compile_context>
chip_gen: v7x
topology: tpu7x:2x2x1
jax: 0.10.0
libtpu: 0.0.40
codegen_flags: <defaults>
</compile_context>

<pallas_src>
import functools

import jax
import jax.numpy as jnp
from jax.experimental import pallas as pl
from jax.experimental.pallas import tpu as pltpu

LANES = 128     # vreg lane width
SUBLANES = 8    # f32 sublanes per vreg


# ---------------------------------------------------------------------------
# In-kernel helpers
# ---------------------------------------------------------------------------
def _maxpool2x2(x):
    """2x2 / stride-2 max-pool over the two *leading* (H, W) dims of an
    (H, W, N, C) value.  Only leading-dim reshapes + elementwise max, so the
    (N, C) sublane/lane layout is never touched."""
    h, w, n, c = x.shape
    assert h % 2 == 0 and w % 2 == 0, f"pool needs even spatial dims, got {(h, w)}"
    m = x.reshape(h // 2, 2 * w, n, c)               # pair rows along H
    x = jnp.maximum(m[:, :w], m[:, w:])              # (h//2, w, n, c)
    m = x.reshape((h // 2) * (w // 2), 2, n, c)      # pair cols along W
    x = jnp.maximum(m[:, 0], m[:, 1])                # (h//2 * w//2, n, c)
    return x.reshape(h // 2, w // 2, n, c)


def _audio_cnn_kernel(cols_ref, w1_ref, b1_ref, w2_ref, b2_ref,
                      fw1_ref, fb1_ref, fw2_ref, fb2_ref,
                      o_ref, xcol2_ref, flat_ref,
                      *, n, oh1, ow1, oh2, ow2, k):
    """Entire AudioCNN forward, all operands/activations resident in VMEM.

    cols_ref : (oh1*ow1*n, k*k)    conv1 im2col patches, rows ordered (h, w, n)
    w1_ref   : (k*k, C1)           conv1 weight, row t = kh*k + kw
    b1_ref   : (1, C1)
    w2_ref   : (k*k*C1, C2)        conv2 weight, row = t*C1 + cin
    b2_ref   : (1, C2)
    fw1_ref  : (ph2*pw2*C2, D1)    fc1 weight, row = (h*pw2 + w)*C2 + c
                                   (PyTorch NCHW flatten order folded in host-side)
    fb1_ref  : (1, D1)
    fw2_ref  : (D1, out_lanes)     fc2 weight, lane-padded with zeros
    fb2_ref  : (1, out_lanes)
    o_ref    : (n, out_lanes)      lane-padded logits
    xcol2_ref: (oh2*ow2*n, k*k*C1) VMEM scratch: conv2 im2col
    flat_ref : (n, ph2*pw2*C2)     VMEM scratch: flattened fc1 input
    """
    f32 = jnp.float32
    c1 = w1_ref.shape[1]
    c2 = b2_ref.shape[1]
    ph2, pw2 = oh2 // 2, ow2 // 2
    m2 = oh2 * ow2 * n

    # ---- conv1 + ReLU: single MXU matmul over host-prepared im2col ---------
    a1 = jnp.dot(cols_ref[...], w1_ref[...], preferred_element_type=f32)
    a1 = jnp.maximum(a1 + b1_ref[...], 0.0)           # (oh1*ow1*n, c1)
    a1 = a1.reshape(oh1, ow1, n, c1)                   # tile-aligned (n % 8 == 0)

    p1 = _maxpool2x2(a1)                               # (ph1, pw1, n, c1)

    # ---- conv2 + ReLU: im2col into VMEM scratch, ONE matmul with K = 9*C1 --
    for t in range(k * k):
        i, j = t // k, t % k
        xcol2_ref[:, t * c1:(t + 1) * c1] = p1[i:i + oh2, j:j + ow2].reshape(m2, c1)
    a2 = jnp.dot(xcol2_ref[...], w2_ref[...], preferred_element_type=f32)
    a2 = jnp.maximum(a2 + b2_ref[...], 0.0).reshape(oh2, ow2, n, c2)

    p2 = _maxpool2x2(a2)                               # (ph2, pw2, n, c2)

    # TODO(synk): training-mode Dropout(0.25) masking not implemented; eval /
    # inference forward treats it as identity (matches module.eval()).

    # ---- flatten + fc1 + ReLU: ONE matmul with K = ph2*pw2*C2 ---------------
    # The NCHW flatten permutation lives in fw1's row order; here we only lay
    # the pooled (n, C2) blocks side by side in a lane-dense scratch.
    for r in range(ph2):
        for c in range(pw2):
            pos = r * pw2 + c
            flat_ref[:, pos * c2:(pos + 1) * c2] = p2[r, c]
    hid = jnp.dot(flat_ref[...], fw1_ref[...], preferred_element_type=f32)
    hid = jnp.maximum(hid + fb1_ref[...], 0.0)         # (n, D1)

    # ---- fc2 (lane-padded, unmasked output store) ---------------------------
    out = jnp.dot(hid, fw2_ref[...], preferred_element_type=f32) + fb2_ref[...]
    o_ref[...] = out.astype(o_ref.dtype)


# ---------------------------------------------------------------------------
# Wrapper: single fused pallas_call, full-array VMEM specs, no grid
# ---------------------------------------------------------------------------
def audio_cnn_forward(x_nchw, kp):
    """x_nchw: (N, 1, H, W) float32 (PyTorch layout).  kp: prepare_params() output."""
    n, cin, h, w = x_nchw.shape
    assert cin == 1, "AudioCNN expects a single input channel"
    k = 3
    oh1, ow1 = h - k + 1, w - k + 1                      # conv1 output spatial
    assert oh1 % 2 == 0 and ow1 % 2 == 0, "conv1 output must pool evenly"
    ph1, pw1 = oh1 // 2, ow1 // 2                        # pool1 output spatial
    oh2, ow2 = ph1 - k + 1, pw1 - k + 1                  # conv2 output spatial
    assert oh2 > 0 and ow2 > 0 and oh2 % 2 == 0 and ow2 % 2 == 0, \
        "conv2 output must pool evenly"
    ph2, pw2 = oh2 // 2, ow2 // 2                        # pool2 output spatial

    c1 = kp["conv1_w"].shape[1]
    c2 = kp["conv2_b"].shape[1]
    d1 = kp["fc1_w"].shape[1]
    assert kp["conv2_w"].shape == (k * k * c1, c2)
    assert kp["fc1_w"].shape[0] == ph2 * pw2 * c2, "fc1 weight mismatch vs pooled features"
    num_classes = kp["fc2_w"].shape[1]

    n_pad = max(SUBLANES, -(-n // SUBLANES) * SUBLANES)        # batch -> multiple of 8
    out_lanes = max(LANES, -(-num_classes // LANES) * LANES)   # lane-dense logits

    # Dense (N, H, W) input, zero-padded batch, host-side im2col for conv1.
    # Rows ordered (oh, ow, n) so the kernel's reshape back to (oh, ow, n, C)
    # is tile-aligned (n_pad is a multiple of 8).
    x = x_nchw.astype(jnp.float32)[:, 0]
    x = jnp.pad(x, ((0, n_pad - n), (0, 0), (0, 0)))
    taps = jnp.stack([x[:, i:i + oh1, j:j + ow1]
                      for i in range(k) for j in range(k)], axis=-1)  # (n_pad, oh1, ow1, 9)
    cols = jnp.transpose(taps, (1, 2, 0, 3)).reshape(oh1 * ow1 * n_pad, k * k)

    # Lane-pad fc2 so the final store is a full, unmasked vreg write.
    fw2 = jnp.zeros((d1, out_lanes), jnp.float32).at[:, :num_classes].set(kp["fc2_w"])
    fb2 = jnp.zeros((1, out_lanes), jnp.float32).at[:, :num_classes].set(kp["fc2_b"])

    vmem = pl.BlockSpec(memory_space=pltpu.MemorySpace.VMEM)
    kern = functools.partial(_audio_cnn_kernel, n=n_pad, oh1=oh1, ow1=ow1,
                             oh2=oh2, ow2=ow2, k=k)
    out = pl.pallas_call(
        kern,
        out_shape=jax.ShapeDtypeStruct((n_pad, out_lanes), jnp.float32),
        in_specs=[vmem] * 9,
        out_specs=vmem,
        scratch_shapes=[
            pltpu.VMEM((oh2 * ow2 * n_pad, k * k * c1), jnp.float32),  # conv2 im2col
            pltpu.VMEM((n_pad, ph2 * pw2 * c2), jnp.float32),          # fc1 input
        ],
    )(cols, kp["conv1_w"], kp["conv1_b"], kp["conv2_w"], kp["conv2_b"],
      kp["fc1_w"], kp["fc1_b"], fw2, fb2)
    return out[:n, :num_classes]


# ---------------------------------------------------------------------------
# Parameters: PyTorch layouts + one-time host-side repack for the kernel
# ---------------------------------------------------------------------------
def init_params(key, num_classes=2):
    """Parameters in the PyTorch nn.Module layouts (Conv2d: OIHW, Linear: (out, in))."""
    ks = jax.random.split(key, 8)
    s = 0.05
    return {
        "conv1_w": s * jax.random.normal(ks[0], (32, 1, 3, 3), jnp.float32),
        "conv1_b": s * jax.random.normal(ks[1], (32,), jnp.float32),
        "conv2_w": s * jax.random.normal(ks[2], (64, 32, 3, 3), jnp.float32),
        "conv2_b": s * jax.random.normal(ks[3], (64,), jnp.float32),
        # LazyLinear resolves in-features on first call: 64 * 3 * 3 = 576 (18x18 input).
        "fc1_w": s * jax.random.normal(ks[4], (128, 576), jnp.float32),
        "fc1_b": s * jax.random.normal(ks[5], (128,), jnp.float32),
        "fc2_w": s * jax.random.normal(ks[6], (num_classes, 128), jnp.float32),
        "fc2_b": s * jax.random.normal(ks[7], (num_classes,), jnp.float32),
    }


def prepare_params(p, pooled_hw=(3, 3)):
    """One-time host-side repack of PyTorch-layout params into the kernel's
    matmul layouts.  The 9 conv2 taps are folded into the contraction dim
    (K = 9*C1), and PyTorch's NCHW flatten order (c, h, w) for fc1 is folded
    into fw1's row order so the kernel never permutes activations."""
    ph, pw = pooled_hw                                   # pool2 spatial (3,3 for 18x18)
    c1 = p["conv2_w"].shape[1]
    c2 = p["conv2_w"].shape[0]
    d1 = p["fc1_w"].shape[0]
    # conv1: OIHW -> (kh*kw, Cout)
    w1 = jnp.transpose(p["conv1_w"], (2, 3, 1, 0)).reshape(9, -1)            # (9, 32)
    # conv2: OIHW -> rows ordered ((kh*3+kw)*C1 + cin)
    w2 = jnp.transpose(p["conv2_w"], (2, 3, 1, 0)).reshape(9 * c1, c2)       # (288, 64)
    # fc1: (D1, C2*ph*pw) with inputs ordered (c, h, w)
    #      -> rows ordered ((h*pw + w)*C2 + c)
    fw1 = (p["fc1_w"].T.reshape(c2, ph, pw, d1)
           .transpose(1, 2, 0, 3).reshape(ph * pw * c2, d1))                 # (576, 128)
    return {
        "conv1_w": w1, "conv1_b": p["conv1_b"][None, :],
        "conv2_w": w2, "conv2_b": p["conv2_b"][None, :],
        "fc1_w": fw1, "fc1_b": p["fc1_b"][None, :],
        "fc2_w": p["fc2_w"].T, "fc2_b": p["fc2_b"][None, :],
    }


# ---------------------------------------------------------------------------
# Pure-JAX reference mirroring the PyTorch module (eval mode)
# ---------------------------------------------------------------------------
def audio_cnn_reference(x_nchw, p):
    hi = jax.lax.Precision.HIGHEST
    x = x_nchw.astype(jnp.float32)

    def conv(x, w, b):
        y = jax.lax.conv_general_dilated(
            x, w, window_strides=(1, 1), padding="VALID",
            dimension_numbers=("NCHW", "OIHW", "NCHW"), precision=hi)
        return y + b[None, :, None, None]

    def pool(x):
        return jax.lax.reduce_window(x, -jnp.inf, jax.lax.max,
                                     (1, 1, 2, 2), (1, 1, 2, 2), "VALID")

    x = pool(jax.nn.relu(conv(x, p["conv1_w"], p["conv1_b"])))
    x = pool(jax.nn.relu(conv(x, p["conv2_w"], p["conv2_b"])))
    x = x.reshape(x.shape[0], -1)                       # NCHW flatten
    x = jax.nn.relu(jnp.dot(x, p["fc1_w"].T, precision=hi) + p["fc1_b"])
    return jnp.dot(x, p["fc2_w"].T, precision=hi) + p["fc2_b"]


if __name__ == "__main__":
    key = jax.random.PRNGKey(0)
    k_x, k_p = jax.random.split(key)

    # PyTorch NCHW input: batch=2, channels=1, 18x18 "spectrogram"
    # (18x18 -> 3x3x64 = 576 features, matching the LazyLinear(128) resolution).
    x = jax.random.normal(k_x, (2, 1, 18, 18), jnp.float32)
    params = init_params(k_p, num_classes=2)
    kparams = prepare_params(params, pooled_hw=(3, 3))   # one-time weight repack

    fwd = jax.jit(audio_cnn_forward)
    out = jax.block_until_ready(fwd(x, kparams))
    assert out.shape == (2, 2) and out.dtype == jnp.float32, (out.shape, out.dtype)

    # Correctness vs. the HIGHEST-precision pure-JAX reference.  Tolerance
    # documents the kernel's default-precision f32 MXU matmul path.
    ref = audio_cnn_reference(x, params)
    assert jnp.allclose(out, ref, atol=2e-3, rtol=2e-2), (out, ref)

    print("KERNEL_OK")
</pallas_src>

<mosaic_0001>
module attributes {stable_mosaic.version = 11 : i64} {
  func.func @_audio_cnn_kernel(%arg0: memref<2048x9xf32, #tpu.memory_space<vmem>>, %arg1: memref<9x32xf32, #tpu.memory_space<vmem>>, %arg2: memref<1x32xf32, #tpu.memory_space<vmem>>, %arg3: memref<288x64xf32, #tpu.memory_space<vmem>>, %arg4: memref<1x64xf32, #tpu.memory_space<vmem>>, %arg5: memref<576x128xf32, #tpu.memory_space<vmem>>, %arg6: memref<1x128xf32, #tpu.memory_space<vmem>>, %arg7: memref<128x128xf32, #tpu.memory_space<vmem>>, %arg8: memref<1x128xf32, #tpu.memory_space<vmem>>, %arg9: memref<8x128xf32, #tpu.memory_space<vmem>>, %arg10: memref<288x288xf32, #tpu.memory_space<vmem>>, %arg11: memref<8x576xf32, #tpu.memory_space<vmem>>) attributes {dimension_semantics = [], scalar_prefetch = 0 : i64, scratch_operands = 2 : i64, tpu.core_type = #tpu.core_type<tc>} {
    %c0 = arith.constant 0 : index
    %c0_0 = arith.constant 0 : index
    %0 = vector.load %arg0[%c0, %c0_0] : memref<2048x9xf32, #tpu.memory_space<vmem>>, vector<2048x9xf32>
    %c0_1 = arith.constant 0 : index
    %c0_2 = arith.constant 0 : index
    %1 = vector.load %arg1[%c0_1, %c0_2] : memref<9x32xf32, #tpu.memory_space<vmem>>, vector<9x32xf32>
    %cst = arith.constant dense<0.000000e+00> : vector<2048x32xf32>
    %2 = tpu.matmul %0, %1, %cst {dimension_numbers = #tpu.dot_dimension_numbers<[1], [0], [0], [1], [0, 0, 1, 1], [], []>} : vector<2048x9xf32>, vector<9x32xf32>, vector<2048x32xf32> -> vector<2048x32xf32>
    %c0_3 = arith.constant 0 : index
    %c0_4 = arith.constant 0 : index
    %3 = vector.load %arg2[%c0_3, %c0_4] : memref<1x32xf32, #tpu.memory_space<vmem>>, vector<1x32xf32>
    %4 = vector.broadcast %3 : vector<1x32xf32> to vector<2048x32xf32>
    %5 = arith.addf %2, %4 : vector<2048x32xf32>
    %cst_5 = arith.constant 0.000000e+00 : f32
    %6 = vector.broadcast %cst_5 : f32 to vector<2048x32xf32>
    %7 = arith.maximumf %5, %6 : vector<2048x32xf32>
    %8 = vector.shape_cast %7 : vector<2048x32xf32> to vector<16x16x8x32xf32>
    %9 = vector.shape_cast %8 : vector<16x16x8x32xf32> to vector<8x32x8x32xf32>
    %10 = vector.extract_strided_slice %9 {offsets = [0, 0, 0, 0], sizes = [8, 16, 8, 32], strides = [1, 1, 1, 1]} : vector<8x32x8x32xf32> to vector<8x16x8x32xf32>
    %11 = vector.extract_strided_slice %9 {offsets = [0, 16, 0, 0], sizes = [8, 16, 8, 32], strides = [1, 1, 1, 1]} : vector<8x32x8x32xf32> to vector<8x16x8x32xf32>
    %12 = arith.maximumf %10, %11 : vector<8x16x8x32xf32>
    %13 = vector.shape_cast %12 : vector<8x16x8x32xf32> to vector<64x2x8x32xf32>
    %14 = vector.extract_strided_slice %13 {offsets = [0, 0, 0, 0], sizes = [64, 1, 8, 32], strides = [1, 1, 1, 1]} : vector<64x2x8x32xf32> to vector<64x1x8x32xf32>
    %15 = vector.shape_cast %14 : vector<64x1x8x32xf32> to vector<64x8x32xf32>
    %16 = vector.extract_strided_slice %13 {offsets = [0, 1, 0, 0], sizes = [64, 1, 8, 32], strides = [1, 1, 1, 1]} : vector<64x2x8x32xf32> to vector<64x1x8x32xf32>
    %17 = vector.shape_cast %16 : vector<64x1x8x32xf32> to vector<64x8x32xf32>
    %18 = arith.maximumf %15, %17 : vector<64x8x32xf32>
    %19 = vector.shape_cast %18 : vector<64x8x32xf32> to vector<8x8x8x32xf32>
    %20 = vector.extract_strided_slice %19 {offsets = [0, 0, 0, 0], sizes = [6, 6, 8, 32], strides = [1, 1, 1, 1]} : vector<8x8x8x32xf32> to vector<6x6x8x32xf32>
    %21 = vector.shape_cast %20 : vector<6x6x8x32xf32> to vector<288x32xf32>
    %c0_6 = arith.constant 0 : index
    %c0_7 = arith.constant 0 : index
    %22 = vector.load %arg10[%c0_6, %c0_7] : memref<288x288xf32, #tpu.memory_space<vmem>>, vector<288x32xf32>
    tpu.vector_store %arg10[%c0_6, %c0_7], %21 {strides = array<i32>} : memref<288x288xf32, #tpu.memory_space<vmem>>, vector<288x32xf32>,
    %23 = vector.extract_strided_slice %19 {offsets = [0, 1, 0, 0], sizes = [6, 6, 8, 32], strides = [1, 1, 1, 1]} : vector<8x8x8x32xf32> to vector<6x6x8x32xf32>
    %24 = vector.shape_cast %23 : vector<6x6x8x32xf32> to vector<288x32xf32>
    %c0_8 = arith.constant 0 : index
    %c32 = arith.constant 32 : index
    %25 = vector.load %arg10[%c0_8, %c32] : memref<288x288xf32, #tpu.memory_space<vmem>>, vector<288x32xf32>
    tpu.vector_store %arg10[%c0_8, %c32], %24 {strides = array<i32>} : memref<288x288xf32, #tpu.memory_space<vmem>>, vector<288x32xf32>,
    %26 = vector.extract_strided_slice %19 {offsets = [0, 2, 0, 0], sizes = [6, 6, 8, 32], strides = [1, 1, 1, 1]} : vector<8x8x8x32xf32> to vector<6x6x8x32xf32>
    %27 = vector.shape_cast %26 : vector<6x6x8x32xf32> to vector<288x32xf32>
    %c0_9 = arith.constant 0 : index
    %c64 = arith.constant 64 : index
    %28 = vector.load %arg10[%c0_9, %c64] : memref<288x288xf32, #tpu.memory_space<vmem>>, vector<288x32xf32>
    tpu.vector_store %arg10[%c0_9, %c64], %27 {strides = array<i32>} : memref<288x288xf32, #tpu.memory_space<vmem>>, vector<288x32xf32>,
    %29 = vector.extract_strided_slice %19 {offsets = [1, 0, 0, 0], sizes = [6, 6, 8, 32], strides = [1, 1, 1, 1]} : vector<8x8x8x32xf32> to vector<6x6x8x32xf32>
    %30 = vector.shape_cast %29 : vector<6x6x8x32xf32> to vector<288x32xf32>
    %c0_10 = arith.constant 0 : index
    %c96 = arith.constant 96 : index
    %31 = vector.load %arg10[%c0_10, %c96] : memref<288x288xf32, #tpu.memory_space<vmem>>, vector<288x32xf32>
    tpu.vector_store %arg10[%c0_10, %c96], %30 {strides = array<i32>} : memref<288x288xf32, #tpu.memory_space<vmem>>, vector<288x32xf32>,
    %32 = vector.extract_strided_slice %19 {offsets = [1, 1, 0, 0], sizes = [6, 6, 8, 32], strides = [1, 1, 1, 1]} : vector<8x8x8x32xf32> to vector<6x6x8x32xf32>
    %33 = vector.shape_cast %32 : vector<6x6x8x32xf32> to vector<288x32xf32>
    %c0_11 = arith.constant 0 : index
    %c128 = arith.constant 128 : index
    %34 = vector.load %arg10[%c0_11, %c128] : memref<288x288xf32, #tpu.memory_space<vmem>>, vector<288x32xf32>
    tpu.vector_store %arg10[%c0_11, %c128], %33 {strides = array<i32>} : memref<288x288xf32, #tpu.memory_space<vmem>>, vector<288x32xf32>,
    %35 = vector.extract_strided_slice %19 {offsets = [1, 2, 0, 0], sizes = [6, 6, 8, 32], strides = [1, 1, 1, 1]} : vector<8x8x8x32xf32> to vector<6x6x8x32xf32>
    %36 = vector.shape_cast %35 : vector<6x6x8x32xf32> to vector<288x32xf32>
    %c0_12 = arith.constant 0 : index
    %c160 = arith.constant 160 : index
    %37 = vector.load %arg10[%c0_12, %c160] : memref<288x288xf32, #tpu.memory_space<vmem>>, vector<288x32xf32>
    tpu.vector_store %arg10[%c0_12, %c160], %36 {strides = array<i32>} : memref<288x288xf32, #tpu.memory_space<vmem>>, vector<288x32xf32>,
    %38 = vector.extract_strided_slice %19 {offsets = [2, 0, 0, 0], sizes = [6, 6, 8, 32], strides = [1, 1, 1, 1]} : vector<8x8x8x32xf32> to vector<6x6x8x32xf32>
    %39 = vector.shape_cast %38 : vector<6x6x8x32xf32> to vector<288x32xf32>
    %c0_13 = arith.constant 0 : index
    %c192 = arith.constant 192 : index
    %40 = vector.load %arg10[%c0_13, %c192] : memref<288x288xf32, #tpu.memory_space<vmem>>, vector<288x32xf32>
    tpu.vector_store %arg10[%c0_13, %c192], %39 {strides = array<i32>} : memref<288x288xf32, #tpu.memory_space<vmem>>, vector<288x32xf32>,
    %41 = vector.extract_strided_slice %19 {offsets = [2, 1, 0, 0], sizes = [6, 6, 8, 32], strides = [1, 1, 1, 1]} : vector<8x8x8x32xf32> to vector<6x6x8x32xf32>
    %42 = vector.shape_cast %41 : vector<6x6x8x32xf32> to vector<288x32xf32>
    %c0_14 = arith.constant 0 : index
    %c224 = arith.constant 224 : index
    %43 = vector.load %arg10[%c0_14, %c224] : memref<288x288xf32, #tpu.memory_space<vmem>>, vector<288x32xf32>
    tpu.vector_store %arg10[%c0_14, %c224], %42 {strides = array<i32>} : memref<288x288xf32, #tpu.memory_space<vmem>>, vector<288x32xf32>,
    %44 = vector.extract_strided_slice %19 {offsets = [2, 2, 0, 0], sizes = [6, 6, 8, 32], strides = [1, 1, 1, 1]} : vector<8x8x8x32xf32> to vector<6x6x8x32xf32>
    %45 = vector.shape_cast %44 : vector<6x6x8x32xf32> to vector<288x32xf32>
    %c0_15 = arith.constant 0 : index
    %c256 = arith.constant 256 : index
    %46 = vector.load %arg10[%c0_15, %c256] : memref<288x288xf32, #tpu.memory_space<vmem>>, vector<288x32xf32>
    tpu.vector_store %arg10[%c0_15, %c256], %45 {strides = array<i32>} : memref<288x288xf32, #tpu.memory_space<vmem>>, vector<288x32xf32>,
    %c0_16 = arith.constant 0 : index
    %c0_17 = arith.constant 0 : index
    %47 = vector.load %arg10[%c0_16, %c0_17] : memref<288x288xf32, #tpu.memory_space<vmem>>, vector<288x288xf32>
    %c0_18 = arith.constant 0 : index
    %c0_19 = arith.constant 0 : index
    %48 = vector.load %arg3[%c0_18, %c0_19] : memref<288x64xf32, #tpu.memory_space<vmem>>, vector<288x64xf32>
    %cst_20 = arith.constant dense<0.000000e+00> : vector<288x64xf32>
    %49 = tpu.matmul %47, %48, %cst_20 {dimension_numbers = #tpu.dot_dimension_numbers<[1], [0], [0], [1], [0, 0, 1, 1], [], []>} : vector<288x288xf32>, vector<288x64xf32>, vector<288x64xf32> -> vector<288x64xf32>
    %c0_21 = arith.constant 0 : index
    %c0_22 = arith.constant 0 : index
    %50 = vector.load %arg4[%c0_21, %c0_22] : memref<1x64xf32, #tpu.memory_space<vmem>>, vector<1x64xf32>
    %51 = vector.broadcast %50 : vector<1x64xf32> to vector<288x64xf32>
    %52 = arith.addf %49, %51 : vector<288x64xf32>
    %cst_23 = arith.constant 0.000000e+00 : f32
    %53 = vector.broadcast %cst_23 : f32 to vector<288x64xf32>
    %54 = arith.maximumf %52, %53 : vector<288x64xf32>
    %55 = vector.shape_cast %54 : vector<288x64xf32> to vector<6x6x8x64xf32>
    %56 = vector.shape_cast %55 : vector<6x6x8x64xf32> to vector<3x12x8x64xf32>
    %57 = vector.extract_strided_slice %56 {offsets = [0, 0, 0, 0], sizes = [3, 6, 8, 64], strides = [1, 1, 1, 1]} : vector<3x12x8x64xf32> to vector<3x6x8x64xf32>
    %58 = vector.extract_strided_slice %56 {offsets = [0, 6, 0, 0], sizes = [3, 6, 8, 64], strides = [1, 1, 1, 1]} : vector<3x12x8x64xf32> to vector<3x6x8x64xf32>
    %59 = arith.maximumf %57, %58 : vector<3x6x8x64xf32>
    %60 = vector.shape_cast %59 : vector<3x6x8x64xf32> to vector<9x2x8x64xf32>
    %61 = vector.extract_strided_slice %60 {offsets = [0, 0, 0, 0], sizes = [9, 1, 8, 64], strides = [1, 1, 1, 1]} : vector<9x2x8x64xf32> to vector<9x1x8x64xf32>
    %62 = vector.shape_cast %61 : vector<9x1x8x64xf32> to vector<9x8x64xf32>
    %63 = vector.extract_strided_slice %60 {offsets = [0, 1, 0, 0], sizes = [9, 1, 8, 64], strides = [1, 1, 1, 1]} : vector<9x2x8x64xf32> to vector<9x1x8x64xf32>
    %64 = vector.shape_cast %63 : vector<9x1x8x64xf32> to vector<9x8x64xf32>
    %65 = arith.maximumf %62, %64 : vector<9x8x64xf32>
    %66 = vector.shape_cast %65 : vector<9x8x64xf32> to vector<3x3x8x64xf32>
    %67 = vector.extract_strided_slice %66 {offsets = [0, 0, 0, 0], sizes = [1, 1, 8, 64], strides = [1, 1, 1, 1]} : vector<3x3x8x64xf32> to vector<1x1x8x64xf32>
    %68 = vector.shape_cast %67 : vector<1x1x8x64xf32> to vector<8x64xf32>
    %c0_24 = arith.constant 0 : index
    %c0_25 = arith.constant 0 : index
    %69 = vector.load %arg11[%c0_24, %c0_25] : memref<8x576xf32, #tpu.memory_space<vmem>>, vector<8x64xf32>
    tpu.vector_store %arg11[%c0_24, %c0_25], %68 {strides = array<i32>} : memref<8x576xf32, #tpu.memory_space<vmem>>, vector<8x64xf32>,
    %70 = vector.extract_strided_slice %66 {offsets = [0, 1, 0, 0], sizes = [1, 1, 8, 64], strides = [1, 1, 1, 1]} : vector<3x3x8x64xf32> to vector<1x1x8x64xf32>
    %71 = vector.shape_cast %70 : vector<1x1x8x64xf32> to vector<8x64xf32>
    %c0_26 = arith.constant 0 : index
    %c64_27 = arith.constant 64 : index
    %72 = vector.load %arg11[%c0_26, %c64_27] : memref<8x576xf32, #tpu.memory_space<vmem>>, vector<8x64xf32>
    tpu.vector_store %arg11[%c0_26, %c64_27], %71 {strides = array<i32>} : memref<8x576xf32, #tpu.memory_space<vmem>>, vector<8x64xf32>,
    %73 = vector.extract_strided_slice %66 {offsets = [0, 2, 0, 0], sizes = [1, 1, 8, 64], strides = [1, 1, 1, 1]} : vector<3x3x8x64xf32> to vector<1x1x8x64xf32>
    %74 = vector.shape_cast %73 : vector<1x1x8x64xf32> to vector<8x64xf32>
    %c0_28 = arith.constant 0 : index
    %c128_29 = arith.constant 128 : index
    %75 = vector.load %arg11[%c0_28, %c128_29] : memref<8x576xf32, #tpu.memory_space<vmem>>, vector<8x64xf32>
    tpu.vector_store %arg11[%c0_28, %c128_29], %74 {strides = array<i32>} : memref<8x576xf32, #tpu.memory_space<vmem>>, vector<8x64xf32>,
    %76 = vector.extract_strided_slice %66 {offsets = [1, 0, 0, 0], sizes = [1, 1, 8, 64], strides = [1, 1, 1, 1]} : vector<3x3x8x64xf32> to vector<1x1x8x64xf32>
    %77 = vector.shape_cast %76 : vector<1x1x8x64xf32> to vector<8x64xf32>
    %c0_30 = arith.constant 0 : index
    %c192_31 = arith.constant 192 : index
    %78 = vector.load %arg11[%c0_30, %c192_31] : memref<8x576xf32, #tpu.memory_space<vmem>>, vector<8x64xf32>
    tpu.vector_store %arg11[%c0_30, %c192_31], %77 {strides = array<i32>} : memref<8x576xf32, #tpu.memory_space<vmem>>, vector<8x64xf32>,
    %79 = vector.extract_strided_slice %66 {offsets = [1, 1, 0, 0], sizes = [1, 1, 8, 64], strides = [1, 1, 1, 1]} : vector<3x3x8x64xf32> to vector<1x1x8x64xf32>
    %80 = vector.shape_cast %79 : vector<1x1x8x64xf32> to vector<8x64xf32>
    %c0_32 = arith.constant 0 : index
    %c256_33 = arith.constant 256 : index
    %81 = vector.load %arg11[%c0_32, %c256_33] : memref<8x576xf32, #tpu.memory_space<vmem>>, vector<8x64xf32>
    tpu.vector_store %arg11[%c0_32, %c256_33], %80 {strides = array<i32>} : memref<8x576xf32, #tpu.memory_space<vmem>>, vector<8x64xf32>,
    %82 = vector.extract_strided_slice %66 {offsets = [1, 2, 0, 0], sizes = [1, 1, 8, 64], strides = [1, 1, 1, 1]} : vector<3x3x8x64xf32> to vector<1x1x8x64xf32>
    %83 = vector.shape_cast %82 : vector<1x1x8x64xf32> to vector<8x64xf32>
    %c0_34 = arith.constant 0 : index
    %c320 = arith.constant 320 : index
    %84 = vector.load %arg11[%c0_34, %c320] : memref<8x576xf32, #tpu.memory_space<vmem>>, vector<8x64xf32>
    tpu.vector_store %arg11[%c0_34, %c320], %83 {strides = array<i32>} : memref<8x576xf32, #tpu.memory_space<vmem>>, vector<8x64xf32>,
    %85 = vector.extract_strided_slice %66 {offsets = [2, 0, 0, 0], sizes = [1, 1, 8, 64], strides = [1, 1, 1, 1]} : vector<3x3x8x64xf32> to vector<1x1x8x64xf32>
    %86 = vector.shape_cast %85 : vector<1x1x8x64xf32> to vector<8x64xf32>
    %c0_35 = arith.constant 0 : index
    %c384 = arith.constant 384 : index
    %87 = vector.load %arg11[%c0_35, %c384] : memref<8x576xf32, #tpu.memory_space<vmem>>, vector<8x64xf32>
    tpu.vector_store %arg11[%c0_35, %c384], %86 {strides = array<i32>} : memref<8x576xf32, #tpu.memory_space<vmem>>, vector<8x64xf32>,
    %88 = vector.extract_strided_slice %66 {offsets = [2, 1, 0, 0], sizes = [1, 1, 8, 64], strides = [1, 1, 1, 1]} : vector<3x3x8x64xf32> to vector<1x1x8x64xf32>
    %89 = vector.shape_cast %88 : vector<1x1x8x64xf32> to vector<8x64xf32>
    %c0_36 = arith.constant 0 : index
    %c448 = arith.constant 448 : index
    %90 = vector.load %arg11[%c0_36, %c448] : memref<8x576xf32, #tpu.memory_space<vmem>>, vector<8x64xf32>
    tpu.vector_store %arg11[%c0_36, %c448], %89 {strides = array<i32>} : memref<8x576xf32, #tpu.memory_space<vmem>>, vector<8x64xf32>,
    %91 = vector.extract_strided_slice %66 {offsets = [2, 2, 0, 0], sizes = [1, 1, 8, 64], strides = [1, 1, 1, 1]} : vector<3x3x8x64xf32> to vector<1x1x8x64xf32>
    %92 = vector.shape_cast %91 : vector<1x1x8x64xf32> to vector<8x64xf32>
    %c0_37 = arith.constant 0 : index
    %c512 = arith.constant 512 : index
    %93 = vector.load %arg11[%c0_37, %c512] : memref<8x576xf32, #tpu.memory_space<vmem>>, vector<8x64xf32>
    tpu.vector_store %arg11[%c0_37, %c512], %92 {strides = array<i32>} : memref<8x576xf32, #tpu.memory_space<vmem>>, vector<8x64xf32>,
    %c0_38 = arith.constant 0 : index
    %c0_39 = arith.constant 0 : index
    %94 = vector.load %arg11[%c0_38, %c0_39] : memref<8x576xf32, #tpu.memory_space<vmem>>, vector<8x576xf32>
    %c0_40 = arith.constant 0 : index
    %c0_41 = arith.constant 0 : index
    %95 = vector.load %arg5[%c0_40, %c0_41] : memref<576x128xf32, #tpu.memory_space<vmem>>, vector<576x128xf32>
    %cst_42 = arith.constant dense<0.000000e+00> : vector<8x128xf32>
    %96 = tpu.matmul %94, %95, %cst_42 {dimension_numbers = #tpu.dot_dimension_numbers<[1], [0], [0], [1], [0, 0, 1, 1], [], []>} : vector<8x576xf32>, vector<576x128xf32>, vector<8x128xf32> -> vector<8x128xf32>
    %c0_43 = arith.constant 0 : index
    %c0_44 = arith.constant 0 : index
    %97 = vector.load %arg6[%c0_43, %c0_44] : memref<1x128xf32, #tpu.memory_space<vmem>>, vector<1x128xf32>
    %98 = vector.broadcast %97 : vector<1x128xf32> to vector<8x128xf32>
    %99 = arith.addf %96, %98 : vector<8x128xf32>
    %cst_45 = arith.constant 0.000000e+00 : f32
    %100 = vector.broadcast %cst_45 : f32 to vector<8x128xf32>
    %101 = arith.maximumf %99, %100 : vector<8x128xf32>
    %c0_46 = arith.constant 0 : index
    %c0_47 = arith.constant 0 : index
    %102 = vector.load %arg7[%c0_46, %c0_47] : memref<128x128xf32, #tpu.memory_space<vmem>>, vector<128x128xf32>
    %cst_48 = arith.constant dense<0.000000e+00> : vector<8x128xf32>
    %103 = tpu.matmul %101, %102, %cst_48 {dimension_numbers = #tpu.dot_dimension_numbers<[1], [0], [0], [1], [0, 0, 1, 1], [], []>} : vector<8x128xf32>, vector<128x128xf32>, vector<8x128xf32> -> vector<8x128xf32>
    %c0_49 = arith.constant 0 : index
    %c0_50 = arith.constant 0 : index
    %104 = vector.load %arg8[%c0_49, %c0_50] : memref<1x128xf32, #tpu.memory_space<vmem>>, vector<1x128xf32>
    %105 = vector.broadcast %104 : vector<1x128xf32> to vector<8x128xf32>
    %106 = arith.addf %103, %105 : vector<8x128xf32>
    %c0_51 = arith.constant 0 : index
    %c0_52 = arith.constant 0 : index
    %107 = vector.load %arg9[%c0_51, %c0_52] : memref<8x128xf32, #tpu.memory_space<vmem>>, vector<8x128xf32>
    tpu.vector_store %arg9[%c0_51, %c0_52], %106 {strides = array<i32>} : memref<8x128xf32, #tpu.memory_space<vmem>>, vector<8x128xf32>,
    return
  }
}

</mosaic_0001>

<bundles_post_ra>
// kernel: audio_cnn_forward.1
= control target key start
LH: loop header
LB: loop body
LE: loop exit
PB: predicated region body
PF: predicated region fallthrough
CT: control target
= control target key end

     0   :  { %vm1066_vm0 = vcmask 1040384   ;;  %vm297_vm1 = vcmask 72704   ;;  %vm6308_vm2 = vmmov 1   ;;  %vm2863_vm4 = vcmask 261120   ;;  %s6309_s26 = smov 96   ;;  %s6310_s29 = smov 32   ;;  %s9351_s1 = inlined_call_operand.vmem [shape: f32[9,32], index: 1, kind: input, shape index: {}]   ;;  %s9352_s0 = inlined_call_operand.vmem [shape: f32[2048,9], index: 0, kind: input, shape index: {}]   ;;  %s9353_s2 = inlined_call_operand.vmem [shape: f32[1,32], index: 2, kind: input, shape index: {}]   ;;  %s9354_s3 = inlined_call_operand.vmem [shape: f32[288,64], index: 3, kind: input, shape index: {}]   ;;  %s9355_s5 = inlined_call_operand.vmem [shape: f32[576,128], index: 5, kind: input, shape index: {}]   ;;  %s9356_s4 = inlined_call_operand.vmem [shape: f32[1,64], index: 4, kind: input, shape index: {}]   ;;  %s9357_s7 = inlined_call_operand.vmem [shape: f32[128,128], index: 7, kind: input, shape index: {}]   ;;  %s9358_s6 = inlined_call_operand.vmem [shape: f32[1,128], index: 6, kind: input, shape index: {}]   ;;  %s9359_s8 = inlined_call_operand.vmem [shape: f32[1,128], index: 8, kind: input, shape index: {}]   ;;  %s9360_s9 = inlined_call_operand.vmem [shape: f32[8,128], index: 9, kind: output, shape index: {}]  }
   0x1   :  { %v288_v0 = vld [vmem:[%s9351_s1] sm:$0xff]  ;;  %v289_v1 = vld [vmem:[%s9351_s1 + $0x8] sm:$0x1]  ;;  %vm6135_vm3 = vmpackc.low %vm1066_vm0, %vm6308_vm2  ;;  %s6311_s13 = smov 64   ;;  %vm3044_vm5 = vcmask 523520   ;;  %vm3195_vm6 = vcmask 785920  }
   0x2   :  { %v6134_v2 = vpack.c.bf16 %v289_v1, %v288_v0  ;;  %v32_v3 = vld [vmem:[%s9352_s0] sm:$0xff]  ;;  %v33_v5 = vld [vmem:[%s9352_s0 + $0x8] sm:$0xff]  ;;  %v34_v7 = vld [vmem:[%s9352_s0 + $0x10] sm:$0xff]  ;;  %vm3351_vm7 = vcmask 1048320   ;;  %vm4515_vm8 = vcmask 523264   ;;  %vm4521_vm9 = vcmask 1048064  }
   0x3   :  { %5634 = vmatprep.mubr.msk.f32.mxu0 %vm297_vm1, %v32_v3  ;;  %v236_v4 = vld [vmem:[%s9352_s0 + $0x660] sm:$0xff]  ;;  %v237_v6 = vld [vmem:[%s9352_s0 + $0x668] sm:$0xff]  ;;  %v238_v8 = vld [vmem:[%s9352_s0 + $0x670] sm:$0xff]  ;;  %vm6313_vm10 = vmmov 0  }
   0x4   :  { %6136 = vmatprep.subr.msk.bf16.mxu0 %vm6135_vm3, %v6134_v2  ;;  %6296 = vmatprep.subr.msk.bf16.mxu1 %vm6135_vm3, %v6134_v2  ;;  %v35_v9 = vld [vmem:[%s9352_s0 + $0x18] sm:$0xff]  ;;  %v36_v11 = vld [vmem:[%s9352_s0 + $0x20] sm:$0xff]  ;;  %v37_v13 = vld [vmem:[%s9352_s0 + $0x28] sm:$0xff] }
   0x5   :  { %6139 = vmatpush3.bf16.msk.msra.mxu0 %vm6135_vm3, %v6134_v2  ;;  %6297 = vmatpush3.bf16.msk.msra.mxu1 %vm6135_vm3, %v6134_v2  ;;  %v239_v10 = vld [vmem:[%s9352_s0 + $0x678] sm:$0xff]  ;;  %v240_v12 = vld [vmem:[%s9352_s0 + $0x680] sm:$0xff]  ;;  %v241_v14 = vld [vmem:[%s9352_s0 + $0x688] sm:$0xff] }
   0x6   :  { %5940 = vmatprep.mubr.msk.f32.mxu1 %vm297_vm1, %v236_v4  ;;  %v38_v15 = vld [vmem:[%s9352_s0 + $0x30] sm:$0xff]  ;;  %v39_v17 = vld [vmem:[%s9352_s0 + $0x38] sm:$0xff]  ;;  %v40_v19 = vld [vmem:[%s9352_s0 + $0x40] sm:$0xff] }
   0x7   :  { %v242_v16 = vld [vmem:[%s9352_s0 + $0x690] sm:$0xff]  ;;  %v243_v18 = vld [vmem:[%s9352_s0 + $0x698] sm:$0xff]  ;;  %v244_v20 = vld [vmem:[%s9352_s0 + $0x6a0] sm:$0xff] }
   0x8   :  { %5635 = vmatmul.mubr.msk.f32.vlgmr.msra.gmra.mrb[0].mxu0 %vm297_vm1, %v33_v5  ;;  %5941 = vmatmul.mubr.msk.f32.vlgmr.msra.gmra.mrb[0].mxu1 %vm297_vm1, %v237_v6  ;;  %v41_v21 = vld [vmem:[%s9352_s0 + $0x48] sm:$0xff]  ;;  %v42_v23 = vld [vmem:[%s9352_s0 + $0x50] sm:$0xff]  ;;  %v43_v25 = vld [vmem:[%s9352_s0 + $0x58] sm:$0xff] }
   0x9   :  { %5637 = vmatprep.mubr.msk.f32.mxu0 %vm297_vm1, %v34_v7  ;;  %5943 = vmatprep.mubr.msk.f32.mxu1 %vm297_vm1, %v238_v8  ;;  %v245_v22 = vld [vmem:[%s9352_s0 + $0x6a8] sm:$0xff]  ;;  %v246_v24 = vld [vmem:[%s9352_s0 + $0x6b0] sm:$0xff]  ;;  %v247_v26 = vld [vmem:[%s9352_s0 + $0x6b8] sm:$0xff] }
   0xa   :  { %v44_v27 = vld [vmem:[%s9352_s0 + $0x60] sm:$0xff]  ;;  %v45_v29 = vld [vmem:[%s9352_s0 + $0x68] sm:$0xff]  ;;  %v46_v31 = vld [vmem:[%s9352_s0 + $0x70] sm:$0xff] }
   0xb   :  { %v248_v28 = vld [vmem:[%s9352_s0 + $0x6c0] sm:$0xff]  ;;  %v249_v30 = vld [vmem:[%s9352_s0 + $0x6c8] sm:$0xff]  ;;  %v250_v32 = vld [vmem:[%s9352_s0 + $0x6d0] sm:$0xff] }
   0xc   :  { %5638 = vmatmul.mubr.msk.f32.gmra.mrb[2].mxu0 %vm297_vm1, %v35_v9  ;;  %5944 = vmatmul.mubr.msk.f32.gmra.mrb[2].mxu1 %vm297_vm1, %v239_v10  ;;  %v47_v33 = vld [vmem:[%s9352_s0 + $0x78] sm:$0xff]  ;;  %v48_v35 = vld [vmem:[%s9352_s0 + $0x80] sm:$0xff]  ;;  %v49_v37 = vld [vmem:[%s9352_s0 + $0x88] sm:$0xff] }
   0xd   :  { %5640 = vmatprep.mubr.msk.f32.mxu0 %vm297_vm1, %v36_v11  ;;  %5946 = vmatprep.mubr.msk.f32.mxu1 %vm297_vm1, %v240_v12  ;;  %v251_v34 = vld [vmem:[%s9352_s0 + $0x6d8] sm:$0xff]  ;;  %v252_v36 = vld [vmem:[%s9352_s0 + $0x6e0] sm:$0xff]  ;;  %v253_v38 = vld [vmem:[%s9352_s0 + $0x6e8] sm:$0xff] }
   0xe   :  { %v50_v39 = vld [vmem:[%s9352_s0 + $0x90] sm:$0xff]  ;;  %v51_v41 = vld [vmem:[%s9352_s0 + $0x98] sm:$0xff]  ;;  %v52_v43 = vld [vmem:[%s9352_s0 + $0xa0] sm:$0xff] }
   0xf   :  { %v254_v40 = vld [vmem:[%s9352_s0 + $0x6f0] sm:$0xff]  ;;  %v255_v42 = vld [vmem:[%s9352_s0 + $0x6f8] sm:$0xff]  ;;  %v256_v44 = vld [vmem:[%s9352_s0 + $0x700] sm:$0xff] }
  0x10   :  { %5641 = vmatmul.mubr.msk.f32.gmra.mrb[4].mxu0 %vm297_vm1, %v37_v13  ;;  %5947 = vmatmul.mubr.msk.f32.gmra.mrb[4].mxu1 %vm297_vm1, %v241_v14  ;;  %v53_v45 = vld [vmem:[%s9352_s0 + $0xa8] sm:$0xff]  ;;  %v54_v47 = vld [vmem:[%s9352_s0 + $0xb0] sm:$0xff]  ;;  %v55_v49 = vld [vmem:[%s9352_s0 + $0xb8] sm:$0xff] }
  0x11   :  { %5643 = vmatprep.mubr.msk.f32.mxu0 %vm297_vm1, %v38_v15  ;;  %5949 = vmatprep.mubr.msk.f32.mxu1 %vm297_vm1, %v242_v16  ;;  %v257_v46 = vld [vmem:[%s9352_s0 + $0x708] sm:$0xff]  ;;  %v258_v48 = vld [vmem:[%s9352_s0 + $0x710] sm:$0xff]  ;;  %v259_v50 = vld [vmem:[%s9352_s0 + $0x718] sm:$0xff] }
  0x12   :  { %v56_v51 = vld [vmem:[%s9352_s0 + $0xc0] sm:$0xff]  ;;  %v57_v53 = vld [vmem:[%s9352_s0 + $0xc8] sm:$0xff]  ;;  %v58_v55 = vld [vmem:[%s9352_s0 + $0xd0] sm:$0xff] }
  0x13   :  { %v260_v52 = vld [vmem:[%s9352_s0 + $0x720] sm:$0xff]  ;;  %v261_v54 = vld [vmem:[%s9352_s0 + $0x728] sm:$0xff]  ;;  %v262_v56 = vld [vmem:[%s9352_s0 + $0x730] sm:$0xff] }
  0x14   :  { %5644 = vmatmul.mubr.msk.f32.gmra.mrb[6].mxu0 %vm297_vm1, %v39_v17  ;;  %5950 = vmatmul.mubr.msk.f32.gmra.mrb[6].mxu1 %vm297_vm1, %v243_v18  ;;  %v59_v57 = vld [vmem:[%s9352_s0 + $0xd8] sm:$0xff]  ;;  %v60_v59 = vld [vmem:[%s9352_s0 + $0xe0] sm:$0xff]  ;;  %v61_v61 = vld [vmem:[%s9352_s0 + $0xe8] sm:$0xff] }
  0x15   :  { %5646 = vmatprep.mubr.msk.f32.mxu0 %vm297_vm1, %v40_v19  ;;  %5952 = vmatprep.mubr.msk.f32.mxu1 %vm297_vm1, %v244_v20  ;;  %v263_v58 = vld [vmem:[%s9352_s0 + $0x738] sm:$0xff]  ;;  %v264_v60 = vld [vmem:[%s9352_s0 + $0x740] sm:$0xff]  ;;  %v265_v62 = vld [vmem:[%s9352_s0 + $0x748] sm:$0xff] }
  0x16   :  { %v62_v63 = vld [vmem:[%s9352_s0 + $0xf0] sm:$0xff]  ;;  %v63_v1 = vld [vmem:[%s9352_s0 + $0xf8] sm:$0xff]  ;;  %v64_v3 = vld [vmem:[%s9352_s0 + $0x100] sm:$0xff] }
  0x17   :  { %v266_v0 = vld [vmem:[%s9352_s0 + $0x750] sm:$0xff]  ;;  %v267_v2 = vld [vmem:[%s9352_s0 + $0x758] sm:$0xff]  ;;  %v268_v4 = vld [vmem:[%s9352_s0 + $0x760] sm:$0xff] }
  0x18   :  { %5647 = vmatmul.mubr.msk.f32.gmra.mrb[8].mxu0 %vm297_vm1, %v41_v21  ;;  %5953 = vmatmul.mubr.msk.f32.gmra.mrb[8].mxu1 %vm297_vm1, %v245_v22  ;;  %v65_v5 = vld [vmem:[%s9352_s0 + $0x108] sm:$0xff]  ;;  %v66_v7 = vld [vmem:[%s9352_s0 + $0x110] sm:$0xff]  ;;  %v67_v9 = vld [vmem:[%s9352_s0 + $0x118] sm:$0xff] }
  0x19   :  { %5649 = vmatprep.mubr.msk.f32.mxu0 %vm297_vm1, %v42_v23  ;;  %5955 = vmatprep.mubr.msk.f32.mxu1 %vm297_vm1, %v246_v24  ;;  %v269_v6 = vld [vmem:[%s9352_s0 + $0x768] sm:$0xff]  ;;  %v270_v8 = vld [vmem:[%s9352_s0 + $0x770] sm:$0xff]  ;;  %v271_v10 = vld [vmem:[%s9352_s0 + $0x778] sm:$0xff] }
  0x1a   :  { %v68_v11 = vld [vmem:[%s9352_s0 + $0x120] sm:$0xff]  ;;  %v69_v13 = vld [vmem:[%s9352_s0 + $0x128] sm:$0xff]  ;;  %v70_v15 = vld [vmem:[%s9352_s0 + $0x130] sm:$0xff] }
  0x1b   :  { %v272_v12 = vld [vmem:[%s9352_s0 + $0x780] sm:$0xff]  ;;  %v273_v14 = vld [vmem:[%s9352_s0 + $0x788] sm:$0xff]  ;;  %v274_v16 = vld [vmem:[%s9352_s0 + $0x790] sm:$0xff] }
  0x1c   :  { %5650 = vmatmul.mubr.msk.f32.gmra.mrb[10].mxu0 %vm297_vm1, %v43_v25  ;;  %5956 = vmatmul.mubr.msk.f32.gmra.mrb[10].mxu1 %vm297_vm1, %v247_v26  ;;  %v71_v17 = vld [vmem:[%s9352_s0 + $0x138] sm:$0xff]  ;;  %v72_v19 = vld [vmem:[%s9352_s0 + $0x140] sm:$0xff]  ;;  %v73_v21 = vld [vmem:[%s9352_s0 + $0x148] sm:$0xff] }
  0x1d   :  { %5652 = vmatprep.mubr.msk.f32.mxu0 %vm297_vm1, %v44_v27  ;;  %5958 = vmatprep.mubr.msk.f32.mxu1 %vm297_vm1, %v248_v28  ;;  %v275_v18 = vld [vmem:[%s9352_s0 + $0x798] sm:$0xff]  ;;  %v276_v20 = vld [vmem:[%s9352_s0 + $0x7a0] sm:$0xff]  ;;  %v277_v22 = vld [vmem:[%s9352_s0 + $0x7a8] sm:$0xff] }
  0x1e   :  { %v74_v23 = vld [vmem:[%s9352_s0 + $0x150] sm:$0xff]  ;;  %v75_v25 = vld [vmem:[%s9352_s0 + $0x158] sm:$0xff]  ;;  %v76_v27 = vld [vmem:[%s9352_s0 + $0x160] sm:$0xff] }
  0x1f   :  { %v278_v24 = vld [vmem:[%s9352_s0 + $0x7b0] sm:$0xff]  ;;  %v279_v26 = vld [vmem:[%s9352_s0 + $0x7b8] sm:$0xff]  ;;  %v280_v28 = vld [vmem:[%s9352_s0 + $0x7c0] sm:$0xff] }
  0x20   :  { %5653 = vmatmul.mubr.msk.f32.gmra.mrb[12].mxu0 %vm297_vm1, %v45_v29  ;;  %5959 = vmatmul.mubr.msk.f32.gmra.mrb[12].mxu1 %vm297_vm1, %v249_v30  ;;  %v77_v29 = vld [vmem:[%s9352_s0 + $0x168] sm:$0xff] }
  0x21   :  { %5655 = vmatprep.mubr.msk.f32.mxu0 %vm297_vm1, %v46_v31  ;;  %5961 = vmatprep.mubr.msk.f32.mxu1 %vm297_vm1, %v250_v32  ;;  %v281_v30 = vld [vmem:[%s9352_s0 + $0x7c8] sm:$0xff]  ;;  %v78_v31 = vld [vmem:[%s9352_s0 + $0x170] sm:$0xff] }
  0x22   :  { %v282_v32 = vld [vmem:[%s9352_s0 + $0x7d0] sm:$0xff] }
  0x24   :  { %5656 = vmatmul.mubr.msk.f32.gmra.mrb[14].mxu0 %vm297_vm1, %v47_v33  ;;  %5962 = vmatmul.mubr.msk.f32.gmra.mrb[14].mxu1 %vm297_vm1, %v251_v34  ;;  %v79_v33 = vld [vmem:[%s9352_s0 + $0x178] sm:$0xff] }
  0x25   :  { %5658 = vmatprep.mubr.msk.f32.mxu0 %vm297_vm1, %v48_v35  ;;  %5964 = vmatprep.mubr.msk.f32.mxu1 %vm297_vm1, %v252_v36  ;;  %v283_v34 = vld [vmem:[%s9352_s0 + $0x7d8] sm:$0xff]  ;;  %v80_v35 = vld [vmem:[%s9352_s0 + $0x180] sm:$0xff] }
  0x26   :  { %v284_v36 = vld [vmem:[%s9352_s0 + $0x7e0] sm:$0xff] }
  0x28   :  { %5659 = vmatmul.mubr.msk.f32.gmra.mrb[16].mxu0 %vm297_vm1, %v49_v37  ;;  %5965 = vmatmul.mubr.msk.f32.gmra.mrb[16].mxu1 %vm297_vm1, %v253_v38  ;;  %v81_v37 = vld [vmem:[%s9352_s0 + $0x188] sm:$0xff] }
  0x29   :  { %5661 = vmatprep.mubr.msk.f32.mxu0 %vm297_vm1, %v50_v39  ;;  %5967 = vmatprep.mubr.msk.f32.mxu1 %vm297_vm1, %v254_v40  ;;  %v285_v38 = vld [vmem:[%s9352_s0 + $0x7e8] sm:$0xff]  ;;  %v82_v39 = vld [vmem:[%s9352_s0 + $0x190] sm:$0xff] }
  0x2a   :  { %v286_v40 = vld [vmem:[%s9352_s0 + $0x7f0] sm:$0xff] }
  0x2c   :  { %5662 = vmatmul.mubr.msk.f32.gmra.mrb[18].mxu0 %vm297_vm1, %v51_v41  ;;  %5968 = vmatmul.mubr.msk.f32.gmra.mrb[18].mxu1 %vm297_vm1, %v255_v42  ;;  %v83_v41 = vld [vmem:[%s9352_s0 + $0x198] sm:$0xff] }
  0x2d   :  { %5664 = vmatprep.mubr.msk.f32.mxu0 %vm297_vm1, %v52_v43  ;;  %5970 = vmatprep.mubr.msk.f32.mxu1 %vm297_vm1, %v256_v44  ;;  %v287_v42 = vld [vmem:[%s9352_s0 + $0x7f8] sm:$0xff]  ;;  %v84_v43 = vld [vmem:[%s9352_s0 + $0x1a0] sm:$0xff]  ;;  %v85_v44 = vld [vmem:[%s9352_s0 + $0x1a8] sm:$0xff] }
  0x30   :  { %5665 = vmatmul.mubr.msk.f32.gmra.mrb[20].mxu0 %vm297_vm1, %v53_v45  ;;  %5971 = vmatmul.mubr.msk.f32.gmra.mrb[20].mxu1 %vm297_vm1, %v257_v46  ;;  %v86_v45 = vld [vmem:[%s9352_s0 + $0x1b0] sm:$0xff]  ;;  %v87_v46 = vld [vmem:[%s9352_s0 + $0x1b8] sm:$0xff] }
  0x31   :  { %5667 = vmatprep.mubr.msk.f32.mxu0 %vm297_vm1, %v54_v47  ;;  %5973 = vmatprep.mubr.msk.f32.mxu1 %vm297_vm1, %v258_v48  ;;  %v88_v47 = vld [vmem:[%s9352_s0 + $0x1c0] sm:$0xff]  ;;  %v89_v48 = vld [vmem:[%s9352_s0 + $0x1c8] sm:$0xff] }
  0x34   :  { %5668 = vmatmul.mubr.msk.f32.gmra.mrb[22].mxu0 %vm297_vm1, %v55_v49  ;;  %5974 = vmatmul.mubr.msk.f32.gmra.mrb[22].mxu1 %vm297_vm1, %v259_v50  ;;  %v90_v49 = vld [vmem:[%s9352_s0 + $0x1d0] sm:$0xff]  ;;  %v91_v50 = vld [vmem:[%s9352_s0 + $0x1d8] sm:$0xff] }
  0x35   :  { %5670 = vmatprep.mubr.msk.f32.mxu0 %vm297_vm1, %v56_v51  ;;  %5976 = vmatprep.mubr.msk.f32.mxu1 %vm297_vm1, %v260_v52  ;;  %v92_v51 = vld [vmem:[%s9352_s0 + $0x1e0] sm:$0xff]  ;;  %v93_v52 = vld [vmem:[%s9352_s0 + $0x1e8] sm:$0xff] }
  0x38   :  { %5671 = vmatmul.mubr.msk.f32.gmra.mrb[24].mxu0 %vm297_vm1, %v57_v53  ;;  %5977 = vmatmul.mubr.msk.f32.gmra.mrb[24].mxu1 %vm297_vm1, %v261_v54  ;;  %v94_v53 = vld [vmem:[%s9352_s0 + $0x1f0] sm:$0xff]  ;;  %v95_v54 = vld [vmem:[%s9352_s0 + $0x1f8] sm:$0xff] }
  0x39   :  { %5673 = vmatprep.mubr.msk.f32.mxu0 %vm297_vm1, %v58_v55  ;;  %5979 = vmatprep.mubr.msk.f32.mxu1 %vm297_vm1, %v262_v56  ;;  %v96_v55 = vld [vmem:[%s9352_s0 + $0x200] sm:$0xff]  ;;  %v97_v56 = vld [vmem:[%s9352_s0 + $0x208] sm:$0xff] }
  0x3c   :  { %5674 = vmatmul.mubr.msk.f32.gmra.mrb[26].mxu0 %vm297_vm1, %v59_v57  ;;  %5980 = vmatmul.mubr.msk.f32.gmra.mrb[26].mxu1 %vm297_vm1, %v263_v58  ;;  %v98_v57 = vld [vmem:[%s9352_s0 + $0x210] sm:$0xff]  ;;  %v99_v58 = vld [vmem:[%s9352_s0 + $0x218] sm:$0xff] }
  0x3d   :  { %5676 = vmatprep.mubr.msk.f32.mxu0 %vm297_vm1, %v60_v59  ;;  %5982 = vmatprep.mubr.msk.f32.mxu1 %vm297_vm1, %v264_v60  ;;  %v100_v59 = vld [vmem:[%s9352_s0 + $0x220] sm:$0xff]  ;;  %v101_v60 = vld [vmem:[%s9352_s0 + $0x228] sm:$0xff] }
  0x40   :  { %5677 = vmatmul.mubr.msk.f32.gmra.mrb[28].mxu0 %vm297_vm1, %v61_v61  ;;  %5983 = vmatmul.mubr.msk.f32.gmra.mrb[28].mxu1 %vm297_vm1, %v265_v62  ;;  %v102_v61 = vld [vmem:[%s9352_s0 + $0x230] sm:$0xff]  ;;  %v103_v62 = vld [vmem:[%s9352_s0 + $0x238] sm:$0xff] }
  0x41   :  { %5679 = vmatprep.mubr.msk.f32.mxu0 %vm297_vm1, %v62_v63  ;;  %5985 = vmatprep.mubr.msk.f32.mxu1 %vm297_vm1, %v266_v0  ;;  %v104_v63 = vld [vmem:[%s9352_s0 + $0x240] sm:$0xff]  ;;  %v105_v0 = vld [vmem:[%s9352_s0 + $0x248] sm:$0xff] }
  0x44   :  { %5680 = vmatmul.mubr.msk.f32.gmra.mrb[30].mxu0 %vm297_vm1, %v63_v1  ;;  %5986 = vmatmul.mubr.msk.f32.gmra.mrb[30].mxu1 %vm297_vm1, %v267_v2  ;;  %v106_v1 = vld [vmem:[%s9352_s0 + $0x250] sm:$0xff]  ;;  %v107_v2 = vld [vmem:[%s9352_s0 + $0x258] sm:$0xff] }
  0x45   :  { %5682 = vmatprep.mubr.msk.f32.mxu0 %vm297_vm1, %v64_v3  ;;  %5988 = vmatprep.mubr.msk.f32.mxu1 %vm297_vm1, %v268_v4  ;;  %v108_v3 = vld [vmem:[%s9352_s0 + $0x260] sm:$0xff]  ;;  %v109_v4 = vld [vmem:[%s9352_s0 + $0x268] sm:$0xff] }
  0x48   :  { %5683 = vmatmul.mubr.msk.f32.gmra.mrb[32].mxu0 %vm297_vm1, %v65_v5  ;;  %5989 = vmatmul.mubr.msk.f32.gmra.mrb[32].mxu1 %vm297_vm1, %v269_v6  ;;  %v110_v5 = vld [vmem:[%s9352_s0 + $0x270] sm:$0xff]  ;;  %v111_v6 = vld [vmem:[%s9352_s0 + $0x278] sm:$0xff] }
  0x49   :  { %5685 = vmatprep.mubr.msk.f32.mxu0 %vm297_vm1, %v66_v7  ;;  %5991 = vmatprep.mubr.msk.f32.mxu1 %vm297_vm1, %v270_v8  ;;  %v112_v7 = vld [vmem:[%s9352_s0 + $0x280] sm:$0xff]  ;;  %v113_v8 = vld [vmem:[%s9352_s0 + $0x288] sm:$0xff] }
  0x4c   :  { %5686 = vmatmul.mubr.msk.f32.gmra.mrb[34].mxu0 %vm297_vm1, %v67_v9  ;;  %5992 = vmatmul.mubr.msk.f32.gmra.mrb[34].mxu1 %vm297_vm1, %v271_v10  ;;  %v114_v9 = vld [vmem:[%s9352_s0 + $0x290] sm:$0xff]  ;;  %v115_v10 = vld [vmem:[%s9352_s0 + $0x298] sm:$0xff] }
  0x4d   :  { %5688 = vmatprep.mubr.msk.f32.mxu0 %vm297_vm1, %v68_v11  ;;  %5994 = vmatprep.mubr.msk.f32.mxu1 %vm297_vm1, %v272_v12  ;;  %v116_v11 = vld [vmem:[%s9352_s0 + $0x2a0] sm:$0xff]  ;;  %v117_v12 = vld [vmem:[%s9352_s0 + $0x2a8] sm:$0xff] }
  0x50   :  { %5689 = vmatmul.mubr.msk.f32.gmra.mrb[36].mxu0 %vm297_vm1, %v69_v13  ;;  %5995 = vmatmul.mubr.msk.f32.gmra.mrb[36].mxu1 %vm297_vm1, %v273_v14  ;;  %v118_v13 = vld [vmem:[%s9352_s0 + $0x2b0] sm:$0xff]  ;;  %v119_v14 = vld [vmem:[%s9352_s0 + $0x2b8] sm:$0xff] }
  0x51   :  { %5691 = vmatprep.mubr.msk.f32.mxu0 %vm297_vm1, %v70_v15  ;;  %5997 = vmatprep.mubr.msk.f32.mxu1 %vm297_vm1, %v274_v16  ;;  %v120_v15 = vld [vmem:[%s9352_s0 + $0x2c0] sm:$0xff]  ;;  %v121_v16 = vld [vmem:[%s9352_s0 + $0x2c8] sm:$0xff] }
  0x54   :  { %5692 = vmatmul.mubr.msk.f32.gmra.mrb[38].mxu0 %vm297_vm1, %v71_v17  ;;  %5998 = vmatmul.mubr.msk.f32.gmra.mrb[38].mxu1 %vm297_vm1, %v275_v18  ;;  %v122_v17 = vld [vmem:[%s9352_s0 + $0x2d0] sm:$0xff]  ;;  %v123_v18 = vld [vmem:[%s9352_s0 + $0x2d8] sm:$0xff] }
  0x55   :  { %5694 = vmatprep.mubr.msk.f32.mxu0 %vm297_vm1, %v72_v19  ;;  %6000 = vmatprep.mubr.msk.f32.mxu1 %vm297_vm1, %v276_v20  ;;  %v124_v19 = vld [vmem:[%s9352_s0 + $0x2e0] sm:$0xff]  ;;  %v125_v20 = vld [vmem:[%s9352_s0 + $0x2e8] sm:$0xff] }
  0x58   :  { %5695 = vmatmul.mubr.msk.f32.gmra.mrb[40].mxu0 %vm297_vm1, %v73_v21  ;;  %6001 = vmatmul.mubr.msk.f32.gmra.mrb[40].mxu1 %vm297_vm1, %v277_v22  ;;  %v126_v21 = vld [vmem:[%s9352_s0 + $0x2f0] sm:$0xff]  ;;  %v127_v22 = vld [vmem:[%s9352_s0 + $0x2f8] sm:$0xff] }
  0x59   :  { %5697 = vmatprep.mubr.msk.f32.mxu0 %vm297_vm1, %v74_v23  ;;  %6003 = vmatprep.mubr.msk.f32.mxu1 %vm297_vm1, %v278_v24  ;;  %v128_v23 = vld [vmem:[%s9352_s0 + $0x300] sm:$0xff]  ;;  %v129_v24 = vld [vmem:[%s9352_s0 + $0x308] sm:$0xff] }
  0x5c   :  { %5698 = vmatmul.mubr.msk.f32.gmra.mrb[42].mxu0 %vm297_vm1, %v75_v25  ;;  %6004 = vmatmul.mubr.msk.f32.gmra.mrb[42].mxu1 %vm297_vm1, %v279_v26  ;;  %v130_v25 = vld [vmem:[%s9352_s0 + $0x310] sm:$0xff]  ;;  %v131_v26 = vld [vmem:[%s9352_s0 + $0x318] sm:$0xff] }
  0x5d   :  { %5700 = vmatprep.mubr.msk.f32.mxu0 %vm297_vm1, %v76_v27  ;;  %6006 = vmatprep.mubr.msk.f32.mxu1 %vm297_vm1, %v280_v28  ;;  %v132_v27 = vld [vmem:[%s9352_s0 + $0x320] sm:$0xff]  ;;  %v133_v28 = vld [vmem:[%s9352_s0 + $0x328] sm:$0xff] }
  0x60   :  { %5701 = vmatmul.mubr.msk.f32.gmra.mrb[44].mxu0 %vm297_vm1, %v77_v29  ;;  %6007 = vmatmul.mubr.msk.f32.gmra.mrb[44].mxu1 %vm297_vm1, %v281_v30  ;;  %v134_v29 = vld [vmem:[%s9352_s0 + $0x330] sm:$0xff]  ;;  %v135_v30 = vld [vmem:[%s9352_s0 + $0x338] sm:$0xff] }
  0x61   :  { %5703 = vmatprep.mubr.msk.f32.mxu0 %vm297_vm1, %v78_v31  ;;  %6009 = vmatprep.mubr.msk.f32.mxu1 %vm297_vm1, %v282_v32  ;;  %v136_v31 = vld [vmem:[%s9352_s0 + $0x340] sm:$0xff]  ;;  %v137_v32 = vld [vmem:[%s9352_s0 + $0x348] sm:$0xff] }
  0x64   :  { %5704 = vmatmul.mubr.msk.f32.gmra.mrb[46].mxu0 %vm297_vm1, %v79_v33  ;;  %6010 = vmatmul.mubr.msk.f32.gmra.mrb[46].mxu1 %vm297_vm1, %v283_v34  ;;  %v138_v33 = vld [vmem:[%s9352_s0 + $0x350] sm:$0xff]  ;;  %v139_v34 = vld [vmem:[%s9352_s0 + $0x358] sm:$0xff] }
  0x65   :  { %5706 = vmatprep.mubr.msk.f32.mxu0 %vm297_vm1, %v80_v35  ;;  %6012 = vmatprep.mubr.msk.f32.mxu1 %vm297_vm1, %v284_v36  ;;  %v140_v35 = vld [vmem:[%s9352_s0 + $0x360] sm:$0xff] }
  0x68   :  { %5707 = vmatmul.mubr.msk.f32.gmra.mrb[48].mxu0 %vm297_vm1, %v81_v37  ;;  %6013 = vmatmul.mubr.msk.f32.gmra.mrb[48].mxu1 %vm297_vm1, %v285_v38 }
  0x69   :  { %5709 = vmatprep.mubr.msk.f32.mxu0 %vm297_vm1, %v82_v39  ;;  %6015 = vmatprep.mubr.msk.f32.mxu1 %vm297_vm1, %v286_v40  ;;  %v141_v40 = vld [vmem:[%s9352_s0 + $0x368] sm:$0xff] }
  0x6c   :  { %5710 = vmatmul.mubr.msk.f32.gmra.mrb[50].mxu0 %vm297_vm1, %v83_v41  ;;  %6016 = vmatmul.mubr.msk.f32.gmra.mrb[50].mxu1 %vm297_vm1, %v287_v42  ;;  %v142_v41 = vld [vmem:[%s9352_s0 + $0x370] sm:$0xff] }
  0x6d   :  { %5712 = vmatprep.mubr.msk.f32.mxu0 %vm297_vm1, %v84_v43 }
  0x70   :  { %5713 = vmatmul.mubr.msk.f32.gmra.mrb[52].mxu0 %vm297_vm1, %v85_v44 }
  0x71   :  { %5715 = vmatprep.mubr.msk.f32.mxu0 %vm297_vm1, %v86_v45 }
  0x74   :  { %5716 = vmatmul.mubr.msk.f32.gmra.mrb[54].mxu0 %vm297_vm1, %v87_v46  ;;  %v143_v46 = vld [vmem:[%s9352_s0 + $0x378] sm:$0xff] }
  0x75   :  { %5718 = vmatprep.mubr.msk.f32.mxu0 %vm297_vm1, %v88_v47  ;;  %v144_v47 = vld [vmem:[%s9352_s0 + $0x380] sm:$0xff] }
  0x78   :  { %5719 = vmatmul.mubr.msk.f32.gmra.mrb[56].mxu0 %vm297_vm1, %v89_v48 }
  0x79   :  { %5721 = vmatprep.mubr.msk.f32.mxu0 %vm297_vm1, %v90_v49 }
  0x7c   :  { %5722 = vmatmul.mubr.msk.f32.gmra.mrb[58].mxu0 %vm297_vm1, %v91_v50 }
  0x7d   :  { %5724 = vmatprep.mubr.msk.f32.mxu0 %vm297_vm1, %v92_v51 }
  0x80   :  { %5725 = vmatmul.mubr.msk.f32.gmra.mrb[60].mxu0 %vm297_vm1, %v93_v52  ;;  %v145_v52 = vld [vmem:[%s9352_s0 + $0x388] sm:$0xff] }
  0x81   :  { %5727 = vmatprep.mubr.msk.f32.mxu0 %vm297_vm1, %v94_v53  ;;  %v146_v53 = vld [vmem:[%s9352_s0 + $0x390] sm:$0xff] }
  0x84   :  { %5728 = vmatmul.mubr.msk.f32.gmra.mrb[62].mxu0 %vm297_vm1, %v95_v54 }
  0x85   :  { %5730 = vmatprep.mubr.msk.f32.mxu0 %vm297_vm1, %v96_v55 }
  0x88   :  { %5731 = vmatmul.mubr.msk.f32.gmra.mrb[64].mxu0 %vm297_vm1, %v97_v56 }
  0x89   :  { %5733 = vmatprep.mubr.msk.f32.mxu0 %vm297_vm1, %v98_v57 }
  0x8c   :  { %5734 = vmatmul.mubr.msk.f32.gmra.mrb[66].mxu0 %vm297_vm1, %v99_v58  ;;  %v147_v58 = vld [vmem:[%s9352_s0 + $0x398] sm:$0xff] }
  0x8d   :  { %5736 = vmatprep.mubr.msk.f32.mxu0 %vm297_vm1, %v100_v59  ;;  %v148_v59 = vld [vmem:[%s9352_s0 + $0x3a0] sm:$0xff] }
  0x90   :  { %5737 = vmatmul.mubr.msk.f32.gmra.mrb[68].mxu0 %vm297_vm1, %v101_v60 }
  0x91   :  { %5739 = vmatprep.mubr.msk.f32.mxu0 %vm297_vm1, %v102_v61 }
  0x94   :  { %5740 = vmatmul.mubr.msk.f32.gmra.mrb[70].mxu0 %vm297_vm1, %v103_v62 }
  0x95   :  { %5742 = vmatprep.mubr.msk.f32.mxu0 %vm297_vm1, %v104_v63 }
  0x98   :  { %5743 = vmatmul.mubr.msk.f32.gmra.mrb[72].mxu0 %vm297_vm1, %v105_v0  ;;  %v149_v0 = vld [vmem:[%s9352_s0 + $0x3a8] sm:$0xff] }
  0x99   :  { %5745 = vmatprep.mubr.msk.f32.mxu0 %vm297_vm1, %v106_v1  ;;  %v150_v1 = vld [vmem:[%s9352_s0 + $0x3b0] sm:$0xff] }
  0x9c   :  { %5746 = vmatmul.mubr.msk.f32.gmra.mrb[74].mxu0 %vm297_vm1, %v107_v2 }
  0x9d   :  { %5748 = vmatprep.mubr.msk.f32.mxu0 %vm297_vm1, %v108_v3 }
  0xa0   :  { %5749 = vmatmul.mubr.msk.f32.gmra.mrb[76].mxu0 %vm297_vm1, %v109_v4 }
  0xa1   :  { %5751 = vmatprep.mubr.msk.f32.mxu0 %vm297_vm1, %v110_v5 }
  0xa4   :  { %5752 = vmatmul.mubr.msk.f32.gmra.mrb[78].mxu0 %vm297_vm1, %v111_v6  ;;  %v151_v6 = vld [vmem:[%s9352_s0 + $0x3b8] sm:$0xff] }
  0xa5   :  { %5754 = vmatprep.mubr.msk.f32.mxu0 %vm297_vm1, %v112_v7  ;;  %v152_v7 = vld [vmem:[%s9352_s0 + $0x3c0] sm:$0xff] }
  0xa8   :  { %5755 = vmatmul.mubr.msk.f32.gmra.mrb[80].mxu0 %vm297_vm1, %v113_v8 }
  0xa9   :  { %5757 = vmatprep.mubr.msk.f32.mxu0 %vm297_vm1, %v114_v9 }
  0xac   :  { %5758 = vmatmul.mubr.msk.f32.gmra.mrb[82].mxu0 %vm297_vm1, %v115_v10 }
  0xad   :  { %5760 = vmatprep.mubr.msk.f32.mxu0 %vm297_vm1, %v116_v11 }
  0xb0   :  { %5761 = vmatmul.mubr.msk.f32.gmra.mrb[84].mxu0 %vm297_vm1, %v117_v12  ;;  %v7107_v12 = vld [vmem:[%s9353_s2] ss:$0 sm:$0xff] }
  0xb1   :  { %5763 = vmatprep.mubr.msk.f32.mxu0 %vm297_vm1, %v118_v13  ;;  %v153_v13 = vld [vmem:[%s9352_s0 + $0x3c8] sm:$0xff] }
  0xb4   :  { %5764 = vmatmul.mubr.msk.f32.gmra.mrb[86].mxu0 %vm297_vm1, %v119_v14  ;;  %v154_v14 = vld [vmem:[%s9352_s0 + $0x3d0] sm:$0xff] }
  0xb5   :  { %5766 = vmatprep.mubr.msk.f32.mxu0 %vm297_vm1, %v120_v15 }
  0xb8   :  { %5767 = vmatmul.mubr.msk.f32.gmra.mrb[88].mxu0 %vm297_vm1, %v121_v16 }
  0xb9   :  { %5769 = vmatprep.mubr.msk.f32.mxu0 %vm297_vm1, %v122_v17 }
  0xbc   :  { %5770 = vmatmul.mubr.msk.f32.gmra.mrb[90].mxu0 %vm297_vm1, %v123_v18 }
  0xbd   :  { %5772 = vmatprep.mubr.msk.f32.mxu0 %vm297_vm1, %v124_v19 }
  0xc0   :  { %5773 = vmatmul.mubr.msk.f32.gmra.mrb[92].mxu0 %vm297_vm1, %v125_v20 }
  0xc1   :  { %5775 = vmatprep.mubr.msk.f32.mxu0 %vm297_vm1, %v126_v21 }
  0xc4   :  { %5776 = vmatmul.mubr.msk.f32.gmra.mrb[94].mxu0 %vm297_vm1, %v127_v22 }
  0xc5   :  { %5778 = vmatprep.mubr.msk.f32.mxu0 %vm297_vm1, %v128_v23  ;;  %v155_v23 = vld [vmem:[%s9352_s0 + $0x3d8] sm:$0xff] }
  0xc8   :  { %5779 = vmatmul.mubr.msk.f32.gmra.mrb[96].mxu0 %vm297_vm1, %v129_v24 }
  0xc9   :  { %5781 = vmatprep.mubr.msk.f32.mxu0 %vm297_vm1, %v130_v25 }
  0xcc   :  { %5782 = vmatmul.mubr.msk.f32.gmra.mrb[98].mxu0 %vm297_vm1, %v131_v26  ;;  %v156_v26 = vld [vmem:[%s9352_s0 + $0x3e0] sm:$0xff] }
  0xcd   :  { %5784 = vmatprep.mubr.msk.f32.mxu0 %vm297_vm1, %v132_v27 }
  0xd0   :  { %5785 = vmatmul.mubr.msk.f32.gmra.mrb[100].mxu0 %vm297_vm1, %v133_v28 }
  0xd1   :  { %5787 = vmatprep.mubr.msk.f32.mxu0 %vm297_vm1, %v134_v29 }
  0xd4   :  { %5788 = vmatmul.mubr.msk.f32.gmra.mrb[102].mxu0 %vm297_vm1, %v135_v30 }
  0xd5   :  { %5790 = vmatprep.mubr.msk.f32.mxu0 %vm297_vm1, %v136_v31 }
  0xd8   :  { %5791 = vmatmul.mubr.msk.f32.gmra.mrb[104].mxu0 %vm297_vm1, %v137_v32 }
  0xd9   :  { %5793 = vmatprep.mubr.msk.f32.mxu0 %vm297_vm1, %v138_v33 }
  0xdb   :  { %v5636_v36 = vpop.f32.mrb[0].mxu0  ;;  %v5942_v37 = vpop.f32.mrb[0].mxu1 }
  0xdc   :  { %v7013_v38 = vpop.f32.mrb[1].mxu0  ;;  %5794 = vmatmul.mubr.msk.f32.gmra.mrb[106].mxu0 %vm297_vm1, %v139_v34  ;;  %v2156_v39 = vpop.f32.mrb[1].mxu1  ;;  %v1142_v17 = vadd.f32 %v5636_v36, %v7107_v12  ;;  %v2162_v18 = vadd.f32 %v5942_v37, %v7107_v12 }
  0xdd   :  { %5796 = vmatprep.mubr.msk.f32.mxu0 %vm297_vm1, %v140_v35  ;;  %v1137_v21 = vadd.f32 %v7107_v12, %v7013_v38  ;;  %v2157_v22 = vadd.f32 %v7107_v12, %v2156_v39 }
  0xde   :  { %v2416_v31 = vmax.f32 %v1142_v17, 0.0  ;;  %v2620_v32 = vmax.f32 %v2162_v18, 0.0 }
  0xdf   :  { %v5639_v42 = vpop.f32.mrb[2].mxu0  ;;  %v5945_v43 = vpop.f32.mrb[2].mxu1  ;;  %v2415_v37 = vmax.f32 %v1137_v21, 0.0  ;;  %v2619_v38 = vmax.f32 %v2157_v22, 0.0 }
  0xe0   :  { %v1146_v44 = vpop.f32.mrb[3].mxu0  ;;  %5797 = vmatmul.mubr.msk.f32.gmra.mrb[108].mxu0 %vm297_vm1, %v141_v40  ;;  %v2166_v45 = vpop.f32.mrb[3].mxu1  ;;  %v1152_v24 = vadd.f32 %v5639_v42, %v7107_v12  ;;  %v2172_v25 = vadd.f32 %v5945_v43, %v7107_v12  ;;  %v157_v40 = vld [vmem:[%s9352_s0 + $0x3e8] sm:$0xff] }
  0xe1   :  { %5799 = vmatprep.mubr.msk.f32.mxu0 %vm297_vm1, %v142_v41  ;;  %v1147_v27 = vadd.f32 %v7107_v12, %v1146_v44  ;;  %v7141_v28 = vadd.f32 %v7107_v12, %v2166_v45 }
  0xe2   :  { %v2418_v42 = vmax.f32 %v1152_v24, 0.0  ;;  %v2622_v43 = vmax.f32 %v2172_v25, 0.0 }
  0xe3   :  { %v7031_v48 = vpop.f32.mrb[4].mxu0  ;;  %v7033_v49 = vpop.f32.mrb[4].mxu1 }
  0xe4   :  { %v7035_v50 = vpop.f32.mrb[5].mxu0  ;;  %5800 = vmatmul.mubr.msk.f32.gmra.mrb[110].mxu0 %vm297_vm1, %v143_v46  ;;  %v7038_v51 = vpop.f32.mrb[5].mxu1  ;;  %v158_v46 = vld [vmem:[%s9352_s0 + $0x3f0] sm:$0xff]  ;;  %v1162_v25 = vadd.f32 %v7031_v48, %v7107_v12 }
  0xe5   :  { %5802 = vmatprep.mubr.msk.f32.mxu0 %vm297_vm1, %v144_v47  ;;  %v2417_v47 = vmax.f32 %v1147_v27, 0.0 }
  0xe7   :  { %v7047_v54 = vpop.f32.mrb[6].mxu0  ;;  %v7049_v55 = vpop.f32.mrb[6].mxu1 }
  0xe8   :  { %v7051_v56 = vpop.f32.mrb[7].mxu0  ;;  %5803 = vmatmul.mubr.msk.f32.gmra.mrb[112].mxu0 %vm297_vm1, %v145_v52  ;;  %v7054_v57 = vpop.f32.mrb[7].mxu1  ;;  %v2621_v52 = vmax.f32 %v7141_v28, 0.0  ;;  %v160_v28 = vld [vmem:[%s9352_s0 + $0x400] sm:$0xff] }
  0xe9   :  { %5805 = vmatprep.mubr.msk.f32.mxu0 %vm297_vm1, %v146_v53 }
  0xeb   :  { %v7063_v60 = vpop.f32.mrb[8].mxu0  ;;  %v7065_v61 = vpop.f32.mrb[8].mxu1 }
  0xec   :  { %v7067_v62 = vpop.f32.mrb[9].mxu0  ;;  %5806 = vmatmul.mubr.msk.f32.gmra.mrb[114].mxu0 %vm297_vm1, %v147_v58  ;;  %v7070_v63 = vpop.f32.mrb[9].mxu1 }
  0xed   :  { %5808 = vmatprep.mubr.msk.f32.mxu0 %vm297_vm1, %v148_v59 }
  0xef   :  { %v7079_v2 = vpop.f32.mrb[10].mxu0  ;;  %v7081_v3 = vpop.f32.mrb[10].mxu1 }
  0xf0   :  { %v7083_v4 = vpop.f32.mrb[11].mxu0  ;;  %5809 = vmatmul.mubr.msk.f32.gmra.mrb[116].mxu0 %vm297_vm1, %v149_v0  ;;  %v7086_v5 = vpop.f32.mrb[11].mxu1 }
  0xf1   :  { %5811 = vmatprep.mubr.msk.f32.mxu0 %vm297_vm1, %v150_v1 }
  0xf3   :  { %v7095_v8 = vpop.f32.mrb[12].mxu0  ;;  %v7097_v9 = vpop.f32.mrb[12].mxu1 }
  0xf4   :  { %v7099_v10 = vpop.f32.mrb[13].mxu0  ;;  %5812 = vmatmul.mubr.msk.f32.gmra.mrb[118].mxu0 %vm297_vm1, %v151_v6  ;;  %v7102_v11 = vpop.f32.mrb[13].mxu1 }
  0xf5   :  { %5814 = vmatprep.mubr.msk.f32.mxu0 %vm297_vm1, %v152_v7 }
  0xf7   :  { %v7116_v15 = vpop.f32.mrb[14].mxu0  ;;  %v7118_v16 = vpop.f32.mrb[14].mxu1 }
  0xf8   :  { %v7122_v19 = vpop.f32.mrb[15].mxu0  ;;  %5815 = vmatmul.mubr.msk.f32.gmra.mrb[120].mxu0 %vm297_vm1, %v153_v13  ;;  %v7125_v20 = vpop.f32.mrb[15].mxu1 }
  0xf9   :  { %5817 = vmatprep.mubr.msk.f32.mxu0 %vm297_vm1, %v154_v14 }
  0xfb   :  { %v5660_v29 = vpop.f32.mrb[16].mxu0  ;;  %v5966_v30 = vpop.f32.mrb[16].mxu1 }
  0xfc   :  { %v1222_v33 = vadd.f32 %v5660_v29, %v7107_v12  ;;  %v1216_v34 = vpop.f32.mrb[17].mxu0  ;;  %5818 = vmatmul.mubr.msk.f32.gmra.mrb[122].mxu0 %vm297_vm1, %v155_v23  ;;  %v2242_v35 = vadd.f32 %v5966_v30, %v7107_v12  ;;  %v2236_v36 = vpop.f32.mrb[17].mxu1  ;;  %v159_v23 = vld [vmem:[%s9352_s0 + $0x3f8] sm:$0xff] }
  0xfd   :  { %v1217_v39 = vadd.f32 %v7107_v12, %v1216_v34  ;;  %5820 = vmatprep.mubr.msk.f32.mxu0 %vm297_vm1, %v156_v26  ;;  %v2237_v41 = vadd.f32 %v7107_v12, %v2236_v36  ;;  %v1157_v26 = vadd.f32 %v7107_v12, %v7035_v50 }
  0xfe   :  { %v2432_v44 = vmax.f32 %v1222_v33, 0.0  ;;  %v2636_v45 = vmax.f32 %v2242_v35, 0.0 }
  0xff   :  { %v2431_v53 = vmax.f32 %v1217_v39, 0.0  ;;  %v5663_v58 = vpop.f32.mrb[18].mxu0  ;;  %v2635_v59 = vmax.f32 %v2237_v41, 0.0  ;;  %v5969_v0 = vpop.f32.mrb[18].mxu1  ;;  %v161_v41 = vld [vmem:[%s9352_s0 + $0x408] sm:$0xff] }
 0x100   :  { %v2672_v1 = vmax.f32 %v2416_v31, %v2432_v44  ;;  %v1232_v6 = vadd.f32 %v5663_v58, %v7107_v12  ;;  %v2780_v7 = vmax.f32 %v2620_v32, %v2636_v45  ;;  %v1226_v13 = vpop.f32.mrb[19].mxu0  ;;  %5821 = vmatmul.mubr.msk.f32.gmra.mrb[124].mxu0 %vm297_vm1, %v157_v40  ;;  %v2252_v14 = vadd.f32 %v5969_v0, %v7107_v12  ;;  %v2246_v17 = vpop.f32.mrb[19].mxu1 }
 0x101   :  { %v2671_v18 = vmax.f32 %v2415_v37, %v2431_v53  ;;  %v1227_v21 = vadd.f32 %v7107_v12, %v1226_v13  ;;  %v2779_v22 = vmax.f32 %v2619_v38, %v2635_v59  ;;  %5823 = vmatprep.mubr.msk.f32.mxu0 %vm297_vm1, %v158_v46  ;;  %v2247_v24 = vadd.f32 %v7107_v12, %v2246_v17 }
 0x102   :  { %v2434_v27 = vmax.f32 %v1232_v6, 0.0  ;;  %v2638_v29 = vmax.f32 %v2252_v14, 0.0  ;;  %v2419_v44 = vmax.f32 %v1157_v26, 0.0  ;;  %v1172_v45 = vadd.f32 %v7047_v54, %v7107_v12 }
 0x103   :  { %v2799_v30 = vmax.f32 %v2671_v18, %v2672_v1  ;;  %v2433_v31 = vmax.f32 %v1227_v21, 0.0  ;;  %v7172_v32 = vmax.f32 %v2779_v22, %v2780_v7  ;;  %v5666_v33 = vpop.f32.mrb[20].mxu0  ;;  %v2637_v34 = vmax.f32 %v2247_v24, 0.0  ;;  %v7174_v35 = vpop.f32.mrb[20].mxu1 }
 0x104   :  { %v2674_v36 = vmax.f32 %v2418_v42, %v2434_v27  ;;  %v1242_v48 = vadd.f32 %v5666_v33, %v7107_v12  ;;  %v1236_v37 = vpop.f32.mrb[21].mxu0  ;;  %5824 = vmatmul.mubr.msk.f32.gmra.mrb[126].mxu0 %vm297_vm1, %v159_v23  ;;  %v2782_v50 = vmax.f32 %v2622_v43, %v2638_v29  ;;  %v7178_v38 = vpop.f32.mrb[21].mxu1  ;;  %v2420_v43 = vmax.f32 %v1162_v25, 0.0  ;;  %v164_v23 = vld [vmem:[%s9352_s0 + $0x420] sm:$0xff] }
 0x105   :  { %v2673_v39 = vmax.f32 %v2417_v47, %v2433_v31  ;;  %3695 = vst.msk [vmem:[#allocation2 + $0x2b0] sm:$0xff] %vm2863_vm4, %v7172_v32  ;;  %2864 = vst.msk [vmem:[#allocation2] sm:$0xff] %vm2863_vm4, %v2799_v30  ;;  %v1237_v40 = vadd.f32 %v7107_v12, %v1236_v37  ;;  %5826 = vmatprep.mubr.msk.f32.mxu0 %vm297_vm1, %v160_v28  ;;  %3606 = vrot.lane.b32.xlu1 %v7172_v32, %s6309_s26  ;;  %v162_v47 = vld [vmem:[%s9352_s0 + $0x410] sm:$0xff]  ;;  %v2422_v18 = vmax.f32 %v1172_v45, 0.0 }
 0x106   :  { %3423 = vst.msk [vmem:[#allocation2 + $0x350] sm:$0xff] %vm2863_vm4, %v7172_v32  ;;  %v2781_v42 = vmax.f32 %v2621_v52, %v2637_v34  ;;  %v2436_v46 = vmax.f32 %v1242_v48, 0.0  ;;  %v1167_v53 = vadd.f32 %v7107_v12, %v7051_v56  ;;  %v163_v56 = vld [vmem:[%s9352_s0 + $0x418] sm:$0xff]  ;;  %v1182_v21 = vadd.f32 %v7063_v60, %v7107_v12 }
 0x107   :  { %v2435_v58 = vmax.f32 %v1237_v40, 0.0  ;;  %v5669_v59 = vpop.f32.mrb[22].mxu0  ;;  %v2800_v0 = vmax.f32 %v2673_v39, %v2674_v36  ;;  %v7201_v6 = vpop.f32.mrb[22].mxu1  ;;  %v1177_v25 = vadd.f32 %v7107_v12, %v7067_v62  ;;  %v165_v62 = vld [vmem:[%s9352_s0 + $0x428] sm:$0xff]  ;;  %v1192_v37 = vadd.f32 %v7079_v2, %v7107_v12  ;;  %v166_v39 = vld [vmem:[%s9352_s0 + $0x430] sm:$0xff] }
 0x108   :  { %v7199_v1 = vmax.f32 %v2781_v42, %v2782_v50  ;;  %v2676_v52 = vmax.f32 %v2420_v43, %v2436_v46  ;;  %v1252_v7 = vadd.f32 %v5669_v59, %v7107_v12  ;;  %v1246_v13 = vpop.f32.mrb[23].mxu0  ;;  %5827 = vmatmul.mubr.msk.f32.gmra.mrb[128].mxu0 %vm297_vm1, %v161_v41  ;;  %v7205_v54 = vpop.f32.mrb[23].mxu1  ;;  %v2421_v24 = vmax.f32 %v1167_v53, 0.0 }
 0x109   :  { %v2675_v14 = vmax.f32 %v2419_v44, %v2435_v58  ;;  %v1247_v17 = vadd.f32 %v7107_v12, %v1246_v13  ;;  %2936 = vrot.lane.b32.xlu0 %v2800_v0, %s6310_s29  ;;  %2865 = vst.msk [vmem:[#allocation2 + $0x18] sm:$0xff] %vm2863_vm4, %v2800_v0  ;;  %5829 = vmatprep.mubr.msk.f32.mxu0 %vm297_vm1, %v162_v47  ;;  %v2424_v48 = vmax.f32 %v1182_v21, 0.0  ;;  %v2423_v40 = vmax.f32 %v1177_v25, 0.0  ;;  %v168_v13 = vld [vmem:[%s9352_s0 + $0x440] sm:$0xff] }
 0x10a   :  { %3696 = vst.msk [vmem:[#allocation2 + $0x2c8] sm:$0xff] %vm2863_vm4, %v7199_v1  ;;  %v2438_v22 = vmax.f32 %v1252_v7, 0.0  ;;  %v1187_v41 = vadd.f32 %v7107_v12, %v7083_v4  ;;  %v167_v4 = vld [vmem:[%s9352_s0 + $0x438] sm:$0xff]  ;;  %v2426_v0 = vmax.f32 %v1192_v37, 0.0 }
 0x10b   :  { %v2437_v26 = vmax.f32 %v1247_v17, 0.0  ;;  %v5672_v27 = vpop.f32.mrb[24].mxu0  ;;  %v2801_v28 = vmax.f32 %v2675_v14, %v2676_v52  ;;  %v7223_v29 = vpop.f32.mrb[24].mxu1  ;;  %v1202_v52 = vadd.f32 %v7095_v8, %v7107_v12  ;;  %v1197_v17 = vadd.f32 %v7107_v12, %v7099_v10  ;;  %v169_v10 = vld [vmem:[%s9352_s0 + $0x448] sm:$0xff] }
 0x10c   :  { %v2678_v30 = vmax.f32 %v2422_v18, %v2438_v22  ;;  %v1262_v31 = vadd.f32 %v5672_v27, %v7107_v12  ;;  %v1256_v33 = vpop.f32.mrb[25].mxu0  ;;  %5830 = vmatmul.mubr.msk.f32.gmra.mrb[130].mxu0 %vm297_vm1, %v163_v56  ;;  %v7227_v60 = vpop.f32.mrb[25].mxu1  ;;  %v2425_v14 = vmax.f32 %v1187_v41, 0.0 }
 0x10d   :  { %v2677_v34 = vmax.f32 %v2421_v24, %v2437_v26  ;;  %v1257_v36 = vadd.f32 %v7107_v12, %v1256_v33  ;;  %3087 = vrot.lane.b32.xlu1 %v2801_v28, %s6311_s13  ;;  %2866 = vst.msk [vmem:[#allocation2 + $0x30] sm:$0xff] %vm2863_vm4, %v2801_v28  ;;  %5832 = vmatprep.mubr.msk.f32.mxu0 %vm297_vm1, %v164_v23  ;;  %v170_v33 = vld [vmem:[%s9352_s0 + $0x450] sm:$0xff] }
 0x10e   :  { %v2440_v50 = vmax.f32 %v1262_v31, 0.0 }
 0x10f   :  { %v2439_v42 = vmax.f32 %v1257_v36, 0.0  ;;  %v5675_v43 = vpop.f32.mrb[26].mxu0  ;;  %v2802_v44 = vmax.f32 %v2677_v34, %v2678_v30  ;;  %v7243_v45 = vpop.f32.mrb[26].mxu1  ;;  %v1212_v30 = vadd.f32 %v7116_v15, %v7107_v12  ;;  %v2427_v34 = vmax.f32 %v1197_v17, 0.0  ;;  %v173_v17 = vld [vmem:[%s9352_s0 + $0x468] sm:$0xff] }
 0x110   :  { %v2680_v46 = vmax.f32 %v2424_v48, %v2440_v50  ;;  %v1272_v47 = vadd.f32 %v5675_v43, %v7107_v12  ;;  %v1266_v53 = vpop.f32.mrb[27].mxu0  ;;  %5833 = vmatmul.mubr.msk.f32.gmra.mrb[132].mxu0 %vm297_vm1, %v165_v62  ;;  %v7247_v2 = vpop.f32.mrb[27].mxu1  ;;  %v1207_v36 = vadd.f32 %v7107_v12, %v7122_v19  ;;  %v171_v19 = vld [vmem:[%s9352_s0 + $0x458] sm:$0xff] }
 0x111   :  { %v2679_v58 = vmax.f32 %v2423_v40, %v2439_v42  ;;  %v1267_v59 = vadd.f32 %v7107_v12, %v1266_v53  ;;  %2938 = vrot.lane.b32.xlu1 %v2801_v28, %s6310_s29  ;;  %5835 = vmatprep.mubr.msk.f32.mxu0 %vm297_vm1, %v166_v39  ;;  %2867 = vst.msk [vmem:[#allocation2 + $0x48] sm:$0xff] %vm2863_vm4, %v2802_v44  ;;  %v2428_v28 = vmax.f32 %v1202_v52, 0.0  ;;  %v172_v53 = vld [vmem:[%s9352_s0 + $0x460] sm:$0xff] }
 0x112   :  { %v2442_v7 = vmax.f32 %v1272_v47, 0.0 }
 0x113   :  { %v2441_v56 = vmax.f32 %v1267_v59, 0.0  ;;  %v5678_v18 = vpop.f32.mrb[28].mxu0  ;;  %v2803_v21 = vmax.f32 %v2679_v58, %v2680_v46  ;;  %v7263_v22 = vpop.f32.mrb[28].mxu1  ;;  %v2430_v46 = vmax.f32 %v1212_v30, 0.0  ;;  %v2429_v58 = vmax.f32 %v1207_v36, 0.0  ;;  %v176_v30 = vld [vmem:[%s9352_s0 + $0x480] sm:$0xff] }
 0x114   :  { %v2682_v23 = vmax.f32 %v2426_v0, %v2442_v7  ;;  %v1282_v24 = vadd.f32 %v5678_v18, %v7107_v12  ;;  %v1276_v25 = vpop.f32.mrb[29].mxu0  ;;  %5836 = vmatmul.mubr.msk.f32.gmra.mrb[134].mxu0 %vm297_vm1, %v167_v4  ;;  %v7267_v8 = vpop.f32.mrb[29].mxu1 }
 0x115   :  { %v2681_v26 = vmax.f32 %v2425_v14, %v2441_v56  ;;  %v1277_v27 = vadd.f32 %v7107_v12, %v1276_v25  ;;  %3089 = vrot.lane.b32.xlu1 %v2802_v44, %s6311_s13  ;;  %5838 = vmatprep.mubr.msk.f32.mxu0 %vm297_vm1, %v168_v13  ;;  %2868 = vst.msk [vmem:[#allocation2 + $0x60] sm:$0xff] %vm2863_vm4, %v2803_v21  ;;  %v174_v56 = vld [vmem:[%s9352_s0 + $0x470] sm:$0xff] }
 0x116   :  { %v2444_v31 = vmax.f32 %v1282_v24, 0.0 }
 0x117   :  { %v2443_v62 = vmax.f32 %v1277_v27, 0.0  ;;  %v5681_v48 = vpop.f32.mrb[30].mxu0  ;;  %v7283_v37 = vmax.f32 %v2681_v26, %v2682_v23  ;;  %v7285_v50 = vpop.f32.mrb[30].mxu1  ;;  %v2262_v26 = vadd.f32 %v7174_v35, %v7107_v12 }
 0x118   :  { %v2684_v39 = vmax.f32 %v2428_v28, %v2444_v31  ;;  %v1292_v40 = vadd.f32 %v5681_v48, %v7107_v12  ;;  %v1286_v41 = vpop.f32.mrb[31].mxu0  ;;  %5839 = vmatmul.mubr.msk.f32.gmra.mrb[136].mxu0 %vm297_vm1, %v169_v10  ;;  %v7289_v15 = vpop.f32.mrb[31].mxu1  ;;  %v175_v10 = vld [vmem:[%s9352_s0 + $0x478] sm:$0xff]  ;;  %v2257_v28 = vadd.f32 %v7107_v12, %v7178_v38  ;;  %v177_v48 = vld [vmem:[%s9352_s0 + $0x488] sm:$0xff] }
 0x119   :  { %v2683_v42 = vmax.f32 %v2427_v34, %v2443_v62  ;;  %v1287_v43 = vadd.f32 %v7107_v12, %v1286_v41  ;;  %2940 = vrot.lane.b32.xlu1 %v2802_v44, %s6310_s29  ;;  %5841 = vmatprep.mubr.msk.f32.mxu0 %vm297_vm1, %v170_v33  ;;  %2869 = vst.msk [vmem:[#allocation2 + $0x78] sm:$0xff] %vm2863_vm4, %v7283_v37 }
 0x11a   :  { %v2446_v47 = vmax.f32 %v1292_v40, 0.0  ;;  %v2272_v34 = vadd.f32 %v7201_v6, %v7107_v12  ;;  %v2639_v38 = vmax.f32 %v2257_v28, 0.0  ;;  %v178_v6 = vld [vmem:[%s9352_s0 + $0x490] sm:$0xff]  ;;  %v180_v28 = vld [vmem:[%s9352_s0 + $0x4a0] sm:$0xff] }
 0x11b   :  { %v2445_v59 = vmax.f32 %v1287_v43, 0.0  ;;  %v7302_v4 = vpop.f32.mrb[32].mxu0  ;;  %v7304_v44 = vmax.f32 %v2683_v42, %v2684_v39  ;;  %v7306_v0 = vpop.f32.mrb[32].mxu1  ;;  %v2267_v39 = vadd.f32 %v7107_v12, %v7205_v54 }
 0x11c   :  { %v7308_v52 = vmax.f32 %v2430_v46, %v2446_v47  ;;  %v7310_v7 = vpop.f32.mrb[33].mxu0  ;;  %5842 = vmatmul.mubr.msk.f32.gmra.mrb[138].mxu0 %vm297_vm1, %v171_v19  ;;  %v7313_v13 = vpop.f32.mrb[33].mxu1  ;;  %v2642_v46 = vmax.f32 %v2272_v34, 0.0 }
 0x11d   :  { %v7315_v14 = vmax.f32 %v2429_v58, %v2445_v59  ;;  %3091 = vrot.lane.b32.xlu1 %v2803_v21, %s6311_s13  ;;  %5844 = vmatprep.mubr.msk.f32.mxu0 %vm297_vm1, %v172_v53  ;;  %v2282_v53 = vadd.f32 %v7223_v29, %v7107_v12 }
 0x11f   :  { %v7325_v18 = vpop.f32.mrb[34].mxu0  ;;  %v7327_v23 = vpop.f32.mrb[34].mxu1  ;;  %v2806_v24 = vmax.f32 %v7315_v14, %v7308_v52  ;;  %v186_v52 = vld [vmem:[%s9352_s0 + $0x4d0] sm:$0xff] }
 0x120   :  { %v7331_v25 = vpop.f32.mrb[35].mxu0  ;;  %5845 = vmatmul.mubr.msk.f32.gmra.mrb[140].mxu0 %vm297_vm1, %v173_v17  ;;  %v7336_v27 = vpop.f32.mrb[35].mxu1  ;;  %v2641_v17 = vmax.f32 %v2267_v39, 0.0 }
 0x121   :  { %2942 = vrot.lane.b32.xlu1 %v2803_v21, %s6310_s29  ;;  %5847 = vmatprep.mubr.msk.f32.mxu0 %vm297_vm1, %v174_v56  ;;  %v2640_v21 = vmax.f32 %v2262_v26, 0.0  ;;  %v2277_v56 = vadd.f32 %v7107_v12, %v7227_v60  ;;  %v179_v26 = vld [vmem:[%s9352_s0 + $0x498] sm:$0xff]  ;;  %v2644_v60 = vmax.f32 %v2282_v53, 0.0 }
 0x123   :  { %v7348_v31 = vpop.f32.mrb[36].mxu0  ;;  %v5996_v35 = vpop.f32.mrb[36].mxu1 }
 0x124   :  { %v7350_v33 = vpop.f32.mrb[37].mxu0  ;;  %5848 = vmatmul.mubr.msk.f32.gmra.mrb[142].mxu0 %vm297_vm1, %v175_v10  ;;  %v2342_v36 = vadd.f32 %v5996_v35, %v7107_v12  ;;  %v2336_v62 = vpop.f32.mrb[37].mxu1 }
 0x125   :  { %3093 = vrot.lane.b32.xlu1 %v7283_v37, %s6311_s13  ;;  %5850 = vmatprep.mubr.msk.f32.mxu0 %vm297_vm1, %v176_v30  ;;  %v2337_v40 = vadd.f32 %v7107_v12, %v2336_v62 }
 0x126   :  { %v2656_v41 = vmax.f32 %v2342_v36, 0.0  ;;  %v2292_v36 = vadd.f32 %v7243_v45, %v7107_v12  ;;  %v181_v45 = vld [vmem:[%s9352_s0 + $0x4a8] sm:$0xff] }
 0x127   :  { %v7368_v42 = vpop.f32.mrb[38].mxu0  ;;  %v2655_v43 = vmax.f32 %v2337_v40, 0.0  ;;  %v5999_v19 = vpop.f32.mrb[38].mxu1  ;;  %v2643_v40 = vmax.f32 %v2277_v56, 0.0 }
 0x128   :  { %v7370_v47 = vpop.f32.mrb[39].mxu0  ;;  %5851 = vmatmul.mubr.msk.f32.gmra.mrb[144].mxu0 %vm297_vm1, %v177_v48  ;;  %v2784_v54 = vmax.f32 %v2640_v21, %v2656_v41  ;;  %v2352_v58 = vadd.f32 %v5999_v19, %v7107_v12  ;;  %v2346_v59 = vpop.f32.mrb[39].mxu1  ;;  %v182_v19 = vld [vmem:[%s9352_s0 + $0x4b0] sm:$0xff]  ;;  %v2646_v56 = vmax.f32 %v2292_v36, 0.0 }
 0x129   :  { %2944 = vrot.lane.b32.xlu1 %v7283_v37, %s6310_s29  ;;  %5853 = vmatprep.mubr.msk.f32.mxu0 %vm297_vm1, %v178_v6  ;;  %v2783_v10 = vmax.f32 %v2639_v38, %v2655_v43  ;;  %v2347_v29 = vadd.f32 %v7107_v12, %v2346_v59  ;;  %v2287_v6 = vadd.f32 %v7107_v12, %v7247_v2 }
 0x12a   :  { %v2658_v30 = vmax.f32 %v2352_v58, 0.0  ;;  %v2302_v2 = vadd.f32 %v7263_v22, %v7107_v12  ;;  %v183_v22 = vld [vmem:[%s9352_s0 + $0x4b8] sm:$0xff] }
 0x12b   :  { %v7388_v35 = vpop.f32.mrb[40].mxu0  ;;  %v2657_v37 = vmax.f32 %v2347_v29, 0.0  ;;  %v2855_v21 = vmax.f32 %v2783_v10, %v2784_v54  ;;  %v6002_v34 = vpop.f32.mrb[40].mxu1 }
 0x12c   :  { %v7392_v62 = vpop.f32.mrb[41].mxu0  ;;  %5854 = vmatmul.mubr.msk.f32.gmra.mrb[146].mxu0 %vm297_vm1, %v179_v26  ;;  %v2786_v38 = vmax.f32 %v2642_v46, %v2658_v30  ;;  %v2362_v48 = vadd.f32 %v6002_v34, %v7107_v12  ;;  %v2356_v39 = vpop.f32.mrb[41].mxu1  ;;  %v2297_v30 = vadd.f32 %v7107_v12, %v7267_v8  ;;  %v184_v34 = vld [vmem:[%s9352_s0 + $0x4c0] sm:$0xff]  ;;  %v2648_v36 = vmax.f32 %v2302_v2, 0.0 }
 0x12d   :  { %3095 = vrot.lane.b32.xlu1 %v7304_v44, %s6311_s13  ;;  %5856 = vmatprep.mubr.msk.f32.mxu0 %vm297_vm1, %v180_v28  ;;  %v2785_v41 = vmax.f32 %v2641_v17, %v2657_v37  ;;  %v2357_v43 = vadd.f32 %v7107_v12, %v2356_v39  ;;  %v2645_v28 = vmax.f32 %v2287_v6, 0.0  ;;  %v2312_v39 = vadd.f32 %v7285_v50, %v7107_v12  ;;  %v185_v50 = vld [vmem:[%s9352_s0 + $0x4c8] sm:$0xff] }
 0x12e   :  { %3529 = vrot.lane.b32.xlu0 %v2855_v21, %s6311_s13  ;;  %v2660_v46 = vmax.f32 %v2362_v48, 0.0 }
 0x12f   :  { %v7411_v53 = vpop.f32.mrb[42].mxu0  ;;  %v7413_v54 = vmax.f32 %v2785_v41, %v2786_v38  ;;  %v2659_v58 = vmax.f32 %v2357_v43, 0.0  ;;  %v6005_v59 = vpop.f32.mrb[42].mxu1 }
 0x130   :  { %v7415_v17 = vpop.f32.mrb[43].mxu0  ;;  %5857 = vmatmul.mubr.msk.f32.gmra.mrb[148].mxu0 %vm297_vm1, %v181_v45  ;;  %v2788_v26 = vmax.f32 %v2644_v60, %v2660_v46  ;;  %v2372_v10 = vadd.f32 %v6005_v59, %v7107_v12  ;;  %v2366_v29 = vpop.f32.mrb[43].mxu1  ;;  %v2647_v46 = vmax.f32 %v2297_v30, 0.0 }
 0x131   :  { %2946 = vrot.lane.b32.xlu1 %v7304_v44, %s6310_s29  ;;  %5859 = vmatprep.mubr.msk.f32.mxu0 %vm297_vm1, %v182_v19  ;;  %v2787_v37 = vmax.f32 %v2643_v40, %v2659_v58  ;;  %v2367_v21 = vadd.f32 %v7107_v12, %v2366_v29  ;;  %v2307_v40 = vadd.f32 %v7107_v12, %v7289_v15 }
 0x132   :  { %v2662_v60 = vmax.f32 %v2372_v10, 0.0  ;;  %v7445_v19 = vadd.f32 %v7302_v4, %v7107_v12  ;;  %v7460_v4 = vadd.f32 %v7306_v0, %v7107_v12  ;;  %v7471_v58 = vadd.f32 %v7107_v12, %v7313_v13 }
 0x133   :  { %v7431_v38 = vpop.f32.mrb[44].mxu0  ;;  %v7433_v8 = vmax.f32 %v2787_v37, %v2788_v26  ;;  %v2661_v44 = vmax.f32 %v2367_v21, 0.0  ;;  %v6008_v48 = vpop.f32.mrb[44].mxu1  ;;  %v2650_v10 = vmax.f32 %v2312_v39, 0.0  ;;  %v2649_v29 = vmax.f32 %v2307_v40, 0.0  ;;  %v187_v21 = vld [vmem:[%s9352_s0 + $0x4d8] sm:$0xff] }
 0x134   :  { %v7439_v6 = vpop.f32.mrb[45].mxu0  ;;  %5860 = vmatmul.mubr.msk.f32.gmra.mrb[150].mxu0 %vm297_vm1, %v183_v22  ;;  %v2790_v45 = vmax.f32 %v2646_v56, %v2662_v60  ;;  %v2382_v41 = vadd.f32 %v6008_v48, %v7107_v12  ;;  %v2376_v43 = vpop.f32.mrb[45].mxu1  ;;  %v2448_v37 = vmax.f32 %v7445_v19, 0.0  ;;  %v7484_v13 = vadd.f32 %v7325_v18, %v7107_v12  ;;  %v188_v48 = vld [vmem:[%s9352_s0 + $0x4e0] sm:$0xff] }
 0x135   :  { %3097 = vrot.lane.b32.xlu1 %v2806_v24, %s6311_s13  ;;  %5862 = vmatprep.mubr.msk.f32.mxu0 %vm297_vm1, %v184_v34  ;;  %3697 = vst.msk [vmem:[#allocation2 + $0x2e0] sm:$0xff] %vm2863_vm4, %v7433_v8  ;;  %v2789_v15 = vmax.f32 %v2645_v28, %v2661_v44  ;;  %v2377_v2 = vadd.f32 %v7107_v12, %v2376_v43 }
 0x136   :  { %v2664_v14 = vmax.f32 %v2382_v41, 0.0  ;;  %v7467_v24 = vadd.f32 %v7107_v12, %v7310_v7  ;;  %v7498_v18 = vadd.f32 %v7327_v23, %v7107_v12  ;;  %v7502_v44 = vadd.f32 %v7107_v12, %v7336_v27 }
 0x137   :  { %v7473_v59 = vpop.f32.mrb[46].mxu0  ;;  %v7475_v56 = vmax.f32 %v2789_v15, %v2790_v45  ;;  %v2663_v26 = vmax.f32 %v2377_v2, 0.0  ;;  %v6011_v0 = vpop.f32.mrb[46].mxu1  ;;  %v2651_v45 = vmax.f32 %v7471_v58, 0.0  ;;  %v1307_v23 = vadd.f32 %v7107_v12, %v7331_v25 }
 0x138   :  { %v7477_v28 = vpop.f32.mrb[47].mxu0  ;;  %5863 = vmatmul.mubr.msk.f32.gmra.mrb[152].mxu0 %vm297_vm1, %v185_v50  ;;  %v2792_v30 = vmax.f32 %v2648_v36, %v2664_v14  ;;  %v2392_v7 = vadd.f32 %v6011_v0, %v7107_v12  ;;  %v2386_v22 = vpop.f32.mrb[47].mxu1  ;;  %v2652_v36 = vmax.f32 %v7460_v4, 0.0  ;;  %v2447_v40 = vmax.f32 %v7467_v24, 0.0  ;;  %v189_v24 = vld [vmem:[%s9352_s0 + $0x4e8] sm:$0xff] }
 0x139   :  { %5865 = vmatprep.mubr.msk.f32.mxu0 %vm297_vm1, %v186_v52  ;;  %3608 = vrot.lane.b32.xlu1 %v7413_v54, %s6309_s26  ;;  %3698 = vst.msk [vmem:[#allocation2 + $0x2f8] sm:$0xff] %vm2863_vm4, %v7475_v56  ;;  %v2791_v34 = vmax.f32 %v2647_v46, %v2663_v26  ;;  %v2387_v60 = vadd.f32 %v7107_v12, %v2386_v22  ;;  %v2450_v52 = vmax.f32 %v7484_v13, 0.0  ;;  %v2654_v26 = vmax.f32 %v7498_v18, 0.0 }
 0x13a   :  { %v2666_v39 = vmax.f32 %v2392_v7, 0.0  ;;  %v2653_v0 = vmax.f32 %v7502_v44, 0.0  ;;  %v1322_v22 = vadd.f32 %v7348_v31, %v7107_v12  ;;  %v191_v31 = vld [vmem:[%s9352_s0 + $0x4f8] sm:$0xff] }
 0x13b   :  { %v5708_v41 = vpop.f32.mrb[48].mxu0  ;;  %v7509_v43 = vmax.f32 %v2791_v34, %v2792_v30  ;;  %v2665_v19 = vmax.f32 %v2387_v60, 0.0  ;;  %v6014_v46 = vpop.f32.mrb[48].mxu1  ;;  %v190_v30 = vld [vmem:[%s9352_s0 + $0x4f0] sm:$0xff] }
 0x13c   :  { %v1382_v27 = vadd.f32 %v5708_v41, %v7107_v12  ;;  %v1376_v50 = vpop.f32.mrb[49].mxu0  ;;  %5866 = vmatmul.mubr.msk.f32.gmra.mrb[154].mxu0 %vm297_vm1, %v187_v21  ;;  %v2794_v15 = vmax.f32 %v2650_v10, %v2666_v39  ;;  %v2402_v2 = vadd.f32 %v6014_v46, %v7107_v12  ;;  %v2396_v4 = vpop.f32.mrb[49].mxu1 }
 0x13d   :  { %v1377_v14 = vadd.f32 %v7107_v12, %v1376_v50  ;;  %5868 = vmatprep.mubr.msk.f32.mxu0 %vm297_vm1, %v188_v48  ;;  %3699 = vst.msk [vmem:[#allocation2 + $0x310] sm:$0xff] %vm2863_vm4, %v7509_v43  ;;  %v2793_v25 = vmax.f32 %v2649_v29, %v2665_v19  ;;  %v2397_v58 = vadd.f32 %v7107_v12, %v2396_v4 }
 0x13e   :  { %v2464_v10 = vmax.f32 %v1382_v27, 0.0  ;;  %v2668_v7 = vmax.f32 %v2402_v2, 0.0 }
 0x13f   :  { %v2463_v13 = vmax.f32 %v1377_v14, 0.0  ;;  %v5711_v21 = vpop.f32.mrb[50].mxu0  ;;  %v7532_v34 = vmax.f32 %v2793_v25, %v2794_v15  ;;  %v2667_v29 = vmax.f32 %v2397_v58, 0.0  ;;  %v6017_v60 = vpop.f32.mrb[50].mxu1  ;;  %v2449_v15 = vmax.f32 %v1307_v23, 0.0 }
 0x140   :  { %v2688_v48 = vmax.f32 %v2448_v37, %v2464_v10  ;;  %v1392_v18 = vadd.f32 %v5711_v21, %v7107_v12  ;;  %v1386_v39 = vpop.f32.mrb[51].mxu0  ;;  %5869 = vmatmul.mubr.msk.f32.gmra.mrb[156].mxu0 %vm297_vm1, %v189_v24  ;;  %v2796_v44 = vmax.f32 %v2652_v36, %v2668_v7  ;;  %v2412_v41 = vadd.f32 %v6017_v60, %v7107_v12  ;;  %v2406_v19 = vpop.f32.mrb[51].mxu1  ;;  %v3812_v21 = vld [vmem:[%s9354_s3 + $0x8] sm:$0xff] }
 0x141   :  { %v2687_v46 = vmax.f32 %v2447_v40, %v2463_v13  ;;  %v1387_v27 = vadd.f32 %v7107_v12, %v1386_v39  ;;  %5871 = vmatprep.mubr.msk.f32.mxu0 %vm297_vm1, %v190_v30  ;;  %3700 = vst.msk [vmem:[#allocation2 + $0x328] sm:$0xff] %vm2863_vm4, %v7532_v34  ;;  %v2795_v37 = vmax.f32 %v2651_v45, %v2667_v29  ;;  %v192_v40 = vld [vmem:[%s9352_s0 + $0x500] sm:$0xff]  ;;  %v2452_v30 = vmax.f32 %v1322_v22, 0.0  ;;  %v194_v39 = vld [vmem:[%s9352_s0 + $0x510] sm:$0xff] }
 0x142   :  { %v2407_v50 = vadd.f32 %v7107_v12, %v2406_v19  ;;  %v1317_v36 = vadd.f32 %v7107_v12, %v7350_v33  ;;  %v2466_v2 = vmax.f32 %v1392_v18, 0.0  ;;  %v2670_v4 = vmax.f32 %v2412_v41, 0.0  ;;  %v3811_v13 = vld [vmem:[%s9354_s3] sm:$0xff] }
 0x143   :  { %v2465_v14 = vmax.f32 %v1387_v27, 0.0  ;;  %v5714_v24 = vpop.f32.mrb[52].mxu0  ;;  %v2807_v25 = vmax.f32 %v2687_v46, %v2688_v48  ;;  %v7550_v58 = vmax.f32 %v2795_v37, %v2796_v44  ;;  %v1332_v48 = vadd.f32 %v7368_v42, %v7107_v12 }
 0x144   :  { %v2669_v10 = vmax.f32 %v2407_v50, 0.0  ;;  %v2690_v45 = vmax.f32 %v2450_v52, %v2466_v2  ;;  %v1402_v7 = vadd.f32 %v5714_v24, %v7107_v12  ;;  %v1396_v23 = vpop.f32.mrb[53].mxu0  ;;  %5872 = vmatmul.mubr.msk.f32.gmra.mrb[158].mxu0 %vm297_vm1, %v191_v31  ;;  %v2798_v33 = vmax.f32 %v2654_v26, %v2670_v4  ;;  %v193_v52 = vld [vmem:[%s9352_s0 + $0x508] sm:$0xff] }
 0x145   :  { %v2689_v29 = vmax.f32 %v2449_v15, %v2465_v14  ;;  %v1397_v60 = vadd.f32 %v7107_v12, %v1396_v23  ;;  %3243 = vrot.lane.b32.xlu1 %v2807_v25, %s6309_s26  ;;  %2870 = vst.msk [vmem:[#allocation2 + $0x90] sm:$0xff] %vm2863_vm4, %v2807_v25  ;;  %5874 = vmatprep.mubr.msk.f32.mxu0 %vm297_vm1, %v192_v40  ;;  %3701 = vst.msk [vmem:[#allocation2 + $0x340] sm:$0xff] %vm2863_vm4, %v7550_v58  ;;  %v2451_v22 = vmax.f32 %v1317_v36, 0.0  ;;  %v6312_v44 = vmov 0.0|0.0   ;;  %v3813_v15 = vld [vmem:[%s9354_s3 + $0x10] sm:$0xff]  ;;  %v3814_v36 = vld [vmem:[%s9354_s3 + $0x18] sm:$0xff] }
 0x146   :  { %v2797_v26 = vmax.f32 %v2653_v0, %v2669_v10  ;;  %v2468_v18 = vmax.f32 %v1402_v7, 0.0  ;;  %6140 = vmatprep.subr.bf16.mxu1 %v6312_v44  ;;  %v6141_v41 = vpack.c.bf16 %v3812_v21, %v3811_v13  ;;  %v1327_v19 = vadd.f32 %v7107_v12, %v7370_v47  ;;  %v195_v40 = vld [vmem:[%s9352_s0 + $0x518] sm:$0xff] }
 0x147   :  { %v2808_v46 = vmax.f32 %v2689_v29, %v2690_v45  ;;  %v2467_v27 = vmax.f32 %v1397_v60, 0.0  ;;  %v5717_v31 = vpop.f32.mrb[54].mxu0  ;;  %v6144_v4 = vpack.c.bf16 %v3814_v36, %v3813_v15  ;;  %v2454_v14 = vmax.f32 %v1332_v48, 0.0 }
 0x148   :  { %v2862_v0 = vmax.f32 %v2797_v26, %v2798_v33  ;;  %v2692_v37 = vmax.f32 %v2452_v30, %v2468_v18  ;;  %v1412_v50 = vadd.f32 %v5717_v31, %v7107_v12  ;;  %v1406_v42 = vpop.f32.mrb[55].mxu0  ;;  %5875 = vmatmul.mubr.msk.f32.gmra.mrb[160].mxu0 %vm297_vm1, %v193_v52  ;;  %6142 = vmatpush1.bf16.msra.mxu1 %v6141_v41  ;;  %v2453_v10 = vmax.f32 %v1327_v19, 0.0  ;;  %v196_v33 = vld [vmem:[%s9352_s0 + $0x520] sm:$0xff]  ;;  %v197_v26 = vld [vmem:[%s9352_s0 + $0x528] sm:$0xff] }
 0x149   :  { %2871 = vst.msk [vmem:[#allocation2 + $0xa8] sm:$0xff] %vm2863_vm4, %v2808_v46  ;;  %3388 = vst.msk [vmem:[#allocation2 + $0x8] sm:$0xff] %vm2863_vm4, %v2808_v46  ;;  %v2691_v47 = vmax.f32 %v2451_v22, %v2467_v27  ;;  %v1407_v2 = vadd.f32 %v7107_v12, %v1406_v42  ;;  %3245 = vrot.lane.b32.xlu1 %v2808_v46, %s6309_s26  ;;  %5877 = vmatprep.mubr.msk.f32.mxu0 %vm297_vm1, %v194_v39  ;;  %v3817_v42 = vld [vmem:[%s9354_s3 + $0x30] sm:$0xff] }
 0x14a   :  { %3702 = vst.msk [vmem:[#allocation2 + $0x358] sm:$0xff] %vm2863_vm4, %v2862_v0  ;;  %v1342_v24 = vadd.f32 %v7388_v35, %v7107_v12  ;;  %v2470_v25 = vmax.f32 %v1412_v50, 0.0  ;;  %6143 = vmatprep.subr.bf16.mxu1 %v6312_v44  ;;  %v1337_v30 = vadd.f32 %v7107_v12, %v7392_v62  ;;  %v3815_v35 = vld [vmem:[%s9354_s3 + $0x20] sm:$0xff]  ;;  %v3816_v62 = vld [vmem:[%s9354_s3 + $0x28] sm:$0xff]  ;;  %v1352_v18 = vadd.f32 %v7411_v53, %v7107_v12  ;;  %v198_v0 = vld [vmem:[%s9352_s0 + $0x530] sm:$0xff] }
 0x14b   :  { %v7599_v45 = vmax.f32 %v2691_v47, %v2692_v37  ;;  %v2469_v7 = vmax.f32 %v1407_v2, 0.0  ;;  %v5720_v23 = vpop.f32.mrb[56].mxu0  ;;  %v6147_v22 = vpack.c.bf16 %v3816_v62, %v3815_v35  ;;  %v1347_v19 = vadd.f32 %v7107_v12, %v7415_v17  ;;  %v3818_v17 = vld [vmem:[%s9354_s3 + $0x38] sm:$0xff]  ;;  %v201_v62 = vld [vmem:[%s9352_s0 + $0x548] sm:$0xff] }
 0x14c   :  { %v2694_v13 = vmax.f32 %v2454_v14, %v2470_v25  ;;  %v1422_v21 = vadd.f32 %v5720_v23, %v7107_v12  ;;  %v1416_v29 = vpop.f32.mrb[57].mxu0  ;;  %5878 = vmatmul.mubr.msk.f32.gmra.mrb[162].mxu0 %vm297_vm1, %v195_v40  ;;  %6145 = vmatpush1.bf16.msra.mxu1 %v6144_v4  ;;  %v2456_v48 = vmax.f32 %v1342_v24, 0.0  ;;  %v2455_v41 = vmax.f32 %v1337_v30, 0.0  ;;  %v199_v47 = vld [vmem:[%s9352_s0 + $0x538] sm:$0xff]  ;;  %v200_v23 = vld [vmem:[%s9352_s0 + $0x540] sm:$0xff] }
 0x14d   :  { %2872 = vst.msk [vmem:[#allocation2 + $0xc0] sm:$0xff] %vm2863_vm4, %v7599_v45  ;;  %3389 = vst.msk [vmem:[#allocation2 + $0x20] sm:$0xff] %vm2863_vm4, %v7599_v45  ;;  %v2693_v60 = vmax.f32 %v2453_v10, %v2469_v7  ;;  %v1417_v52 = vadd.f32 %v7107_v12, %v1416_v29  ;;  %2948 = vrot.lane.b32.xlu1 %v2808_v46, %s6310_s29  ;;  %2950 = vrot.lane.b32.xlu0 %v7599_v45, %s6310_s29  ;;  %v2458_v40 = vmax.f32 %v1352_v18, 0.0 }
 0x14e   :  { %v2472_v39 = vmax.f32 %v1422_v21, 0.0  ;;  %5880 = vmatprep.mubr.msk.f32.mxu0 %vm297_vm1, %v196_v33  ;;  %6146 = vmatprep.subr.bf16.mxu1 %v6312_v44  ;;  %v6150_v2 = vpack.c.bf16 %v3818_v17, %v3817_v42  ;;  %v1362_v4 = vadd.f32 %v7431_v38, %v7107_v12  ;;  %v2457_v24 = vmax.f32 %v1347_v19, 0.0  ;;  %v7666_v38 = vld [vmem:[%s9353_s2] ss:$0 sm:$0xff]  ;;  %v202_v19 = vld [vmem:[%s9352_s0 + $0x550] sm:$0xff] }
 0x14f   :  { %v7629_v46 = vmax.f32 %v2693_v60, %v2694_v13  ;;  %v2471_v27 = vmax.f32 %v1417_v52, 0.0  ;;  %v5723_v31 = vpop.f32.mrb[58].mxu0  ;;  %v1357_v25 = vadd.f32 %v7107_v12, %v7439_v6  ;;  %v3820_v6 = vld [vmem:[%s9354_s3 + $0x48] sm:$0xff] }
 0x150   :  { %v2696_v37 = vmax.f32 %v2456_v48, %v2472_v39  ;;  %v1432_v53 = vadd.f32 %v5723_v31, %v7107_v12  ;;  %v1426_v50 = vpop.f32.mrb[59].mxu0  ;;  %5881 = vmatmul.mubr.msk.f32.gmra.mrb[164].mxu0 %vm297_vm1, %v197_v26  ;;  %6148 = vmatpush1.bf16.msra.mxu1 %v6147_v22  ;;  %v2460_v52 = vmax.f32 %v1362_v4, 0.0  ;;  %v1372_v26 = vadd.f32 %v7666_v38, %v7473_v59 }
 0x151   :  { %2873 = vst.msk [vmem:[#allocation2 + $0xd8] sm:$0xff] %vm2863_vm4, %v7629_v46  ;;  %3390 = vst.msk [vmem:[#allocation2 + $0x38] sm:$0xff] %vm2863_vm4, %v7629_v46  ;;  %v2695_v15 = vmax.f32 %v2455_v41, %v2471_v27  ;;  %v1427_v36 = vadd.f32 %v7107_v12, %v1426_v50  ;;  %3247 = vrot.lane.b32.xlu1 %v7599_v45, %s6309_s26  ;;  %2952 = vrot.lane.b32.xlu0 %v7629_v46, %s6310_s29  ;;  %v3819_v12 = vld [vmem:[%s9354_s3 + $0x40] sm:$0xff]  ;;  %v2459_v48 = vmax.f32 %v1357_v25, 0.0  ;;  %v203_v50 = vld [vmem:[%s9352_s0 + $0x558] sm:$0xff] }
 0x152   :  { %v2474_v14 = vmax.f32 %v1432_v53, 0.0  ;;  %5883 = vmatprep.mubr.msk.f32.mxu0 %vm297_vm1, %v198_v0  ;;  %6149 = vmatprep.subr.bf16.mxu1 %v6312_v44  ;;  %v6153_v60 = vpack.c.bf16 %v3820_v6, %v3819_v12  ;;  %v3821_v0 = vld [vmem:[%s9354_s3 + $0x50] sm:$0xff]  ;;  %v2462_v17 = vmax.f32 %v1372_v26, 0.0  ;;  %v3824_v25 = vld [vmem:[%s9354_s3 + $0x68] sm:$0xff]  ;;  %v3826_v6 = vld [vmem:[%s9354_s3 + $0x78] sm:$0xff] }
 0x153   :  { %v2811_v10 = vmax.f32 %v2695_v15, %v2696_v37  ;;  %v2473_v30 = vmax.f32 %v1427_v36, 0.0  ;;  %v5726_v7 = vpop.f32.mrb[60].mxu0  ;;  %v3825_v12 = vld [vmem:[%s9354_s3 + $0x70] sm:$0xff]  ;;  %v3827_v26 = vld [vmem:[%s9354_s3 + $0x80] sm:$0xff] }
 0x154   :  { %v2698_v33 = vmax.f32 %v2458_v40, %v2474_v14  ;;  %v1442_v13 = vadd.f32 %v7666_v38, %v5726_v7  ;;  %v1436_v21 = vpop.f32.mrb[61].mxu0  ;;  %5884 = vmatmul.mubr.msk.f32.gmra.mrb[166].mxu0 %vm297_vm1, %v199_v47  ;;  %6151 = vmatpush1.bf16.msra.mxu1 %v6150_v2  ;;  %v205_v7 = vld [vmem:[%s9352_s0 + $0x568] sm:$0xff] }
 0x155   :  { %2874 = vst.msk [vmem:[#allocation2 + $0xf0] sm:$0xff] %vm2863_vm4, %v2811_v10  ;;  %3391 = vst.msk [vmem:[#allocation2 + $0x50] sm:$0xff] %vm2863_vm4, %v2811_v10  ;;  %v2697_v29 = vmax.f32 %v2457_v24, %v2473_v30  ;;  %v1437_v35 = vadd.f32 %v7666_v38, %v1436_v21  ;;  %3099 = vrot.lane.b32.xlu1 %v7599_v45, %s6311_s13  ;;  %3101 = vrot.lane.b32.xlu0 %v7629_v46, %s6311_s13  ;;  %v3823_v24 = vld [vmem:[%s9354_s3 + $0x60] sm:$0xff] }
 0x156   :  { %v2476_v22 = vmax.f32 %v1442_v13, 0.0  ;;  %5886 = vmatprep.mubr.msk.f32.mxu0 %vm297_vm1, %v200_v23  ;;  %6152 = vmatprep.subr.bf16.mxu1 %v6312_v44  ;;  %v1367_v45 = vadd.f32 %v7666_v38, %v7477_v28  ;;  %v3822_v28 = vld [vmem:[%s9354_s3 + $0x58] sm:$0xff]  ;;  %v6159_v23 = vpack.c.bf16 %v3824_v25, %v3823_v24  ;;  %v206_v13 = vld [vmem:[%s9352_s0 + $0x570] sm:$0xff]  ;;  %v216_v25 = vld [vmem:[%s9352_s0 + $0x5c0] sm:$0xff] }
 0x157   :  { %v2812_v18 = vmax.f32 %v2697_v29, %v2698_v33  ;;  %v2475_v39 = vmax.f32 %v1437_v35, 0.0  ;;  %v5729_v41 = vpop.f32.mrb[62].mxu0  ;;  %v6156_v42 = vpack.c.bf16 %v3822_v28, %v3821_v0  ;;  %v207_v29 = vld [vmem:[%s9352_s0 + $0x578] sm:$0xff]  ;;  %v6162_v35 = vpack.c.bf16 %v3826_v6, %v3825_v12  ;;  %v212_v0 = vld [vmem:[%s9352_s0 + $0x5a0] sm:$0xff]  ;;  %v217_v12 = vld [vmem:[%s9352_s0 + $0x5c8] sm:$0xff] }
 0x158   :  { %v2700_v27 = vmax.f32 %v2460_v52, %v2476_v22  ;;  %v1452_v31 = vadd.f32 %v7666_v38, %v5729_v41  ;;  %v1446_v59 = vpop.f32.mrb[63].mxu0  ;;  %5887 = vmatmul.mubr.msk.f32.gmra.mrb[168].mxu0 %vm297_vm1, %v201_v62  ;;  %6154 = vmatpush1.bf16.msra.mxu1 %v6153_v60  ;;  %v2461_v36 = vmax.f32 %v1367_v45, 0.0  ;;  %v208_v62 = vld [vmem:[%s9352_s0 + $0x580] sm:$0xff]  ;;  %v3828_v22 = vld [vmem:[%s9354_s3 + $0x88] sm:$0xff] }
 0x159   :  { %2875 = vst.msk [vmem:[#allocation2 + $0x108] sm:$0xff] %vm2863_vm4, %v2812_v18  ;;  %3392 = vst.msk [vmem:[#allocation2 + $0x68] sm:$0xff] %vm2863_vm4, %v2812_v18  ;;  %v2699_v37 = vmax.f32 %v2459_v48, %v2475_v39  ;;  %v1447_v53 = vadd.f32 %v7666_v38, %v1446_v59  ;;  %3249 = vrot.lane.b32.xlu1 %v7629_v46, %s6309_s26  ;;  %2954 = vrot.lane.b32.xlu0 %v2811_v10, %s6310_s29  ;;  %v204_v46 = vld [vmem:[%s9352_s0 + $0x560] sm:$0xff]  ;;  %v209_v48 = vld [vmem:[%s9352_s0 + $0x588] sm:$0xff] }
 0x15a   :  { %v2478_v15 = vmax.f32 %v1452_v31, 0.0  ;;  %5889 = vmatprep.mubr.msk.f32.mxu0 %vm297_vm1, %v202_v19  ;;  %6155 = vmatprep.subr.bf16.mxu1 %v6312_v44  ;;  %v6165_v45 = vpack.c.bf16 %v3828_v22, %v3827_v26  ;;  %v210_v39 = vld [vmem:[%s9352_s0 + $0x590] sm:$0xff]  ;;  %v211_v31 = vld [vmem:[%s9352_s0 + $0x598] sm:$0xff] }
 0x15b   :  { %v2477_v47 = vmax.f32 %v1447_v53, 0.0  ;;  %v7714_v2 = vpop.f32.mrb[64].mxu0  ;;  %v2813_v40 = vmax.f32 %v2699_v37, %v2700_v27  ;;  %v3830_v27 = vld [vmem:[%s9354_s3 + $0x98] sm:$0xff]  ;;  %v3831_v53 = vld [vmem:[%s9354_s3 + $0xa0] sm:$0xff] }
 0x15c   :  { %v2702_v4 = vmax.f32 %v2462_v17, %v2478_v15  ;;  %v7719_v14 = vpop.f32.mrb[65].mxu0  ;;  %5890 = vmatmul.mubr.msk.f32.gmra.mrb[170].mxu0 %vm297_vm1, %v203_v50  ;;  %6157 = vmatpush1.bf16.msra.mxu1 %v6156_v42  ;;  %v3832_v50 = vld [vmem:[%s9354_s3 + $0xa8] sm:$0xff]  ;;  %v214_v15 = vld [vmem:[%s9352_s0 + $0x5b0] sm:$0xff]  ;;  %v3838_v26 = vld [vmem:[%s9354_s3 + $0xd8] sm:$0xff] }
 0x15d   :  { %v2701_v30 = vmax.f32 %v2461_v36, %v2477_v47  ;;  %3251 = vrot.lane.b32.xlu1 %v2811_v10, %s6309_s26  ;;  %3103 = vrot.lane.b32.xlu0 %v2811_v10, %s6311_s13  ;;  %3393 = vst.msk [vmem:[#allocation2 + $0x80] sm:$0xff] %vm2863_vm4, %v2813_v40  ;;  %v213_v42 = vld [vmem:[%s9352_s0 + $0x5a8] sm:$0xff]  ;;  %v6171_v17 = vpack.c.bf16 %v3832_v50, %v3831_v53 }
 0x15e   :  { %5892 = vmatprep.mubr.msk.f32.mxu0 %vm297_vm1, %v204_v46  ;;  %6158 = vmatprep.subr.bf16.mxu1 %v6312_v44  ;;  %v3833_v46 = vld [vmem:[%s9354_s3 + $0xb0] sm:$0xff]  ;;  %v3840_v50 = vld [vmem:[%s9354_s3 + $0xe8] sm:$0xff] }
 0x15f   :  { %v7736_v33 = vpop.f32.mrb[66].mxu0  ;;  %v7741_v21 = vmax.f32 %v2701_v30, %v2702_v4  ;;  %v215_v4 = vld [vmem:[%s9352_s0 + $0x5b8] sm:$0xff] }
 0x160   :  { %v7743_v10 = vpop.f32.mrb[67].mxu0  ;;  %5893 = vmatmul.mubr.msk.f32.gmra.mrb[172].mxu0 %vm297_vm1, %v205_v7  ;;  %6160 = vmatpush1.bf16.msra.mxu1 %v6159_v23  ;;  %v3835_v23 = vld [vmem:[%s9354_s3 + $0xc0] sm:$0xff] }
 0x161   :  { %3253 = vrot.lane.b32.xlu1 %v2812_v18, %s6309_s26  ;;  %2956 = vrot.lane.b32.xlu0 %v2812_v18, %s6310_s29 }
 0x162   :  { %5895 = vmatprep.mubr.msk.f32.mxu0 %vm297_vm1, %v206_v13  ;;  %6161 = vmatprep.subr.bf16.mxu1 %v6312_v44  ;;  %v3836_v13 = vld [vmem:[%s9354_s3 + $0xc8] sm:$0xff] }
 0x163   :  { %v7762_v60 = vpop.f32.mrb[68].mxu0  ;;  %v6177_v6 = vpack.c.bf16 %v3836_v13, %v3835_v23 }
 0x164   :  { %v7764_v52 = vpop.f32.mrb[69].mxu0  ;;  %5896 = vmatmul.mubr.msk.f32.gmra.mrb[174].mxu0 %vm297_vm1, %v207_v29  ;;  %6163 = vmatpush1.bf16.msra.mxu1 %v6162_v35  ;;  %v218_v29 = vld [vmem:[%s9352_s0 + $0x5d0] sm:$0xff] }
 0x165   :  { %3105 = vrot.lane.b32.xlu0 %v2812_v18, %s6311_s13  ;;  %5898 = vmatprep.mubr.msk.f32.mxu0 %vm297_vm1, %v208_v62  ;;  %v3829_v18 = vld [vmem:[%s9354_s3 + $0x90] sm:$0xff] }
 0x166   :  { %6164 = vmatprep.subr.bf16.mxu1 %v6312_v44  ;;  %v6168_v59 = vpack.c.bf16 %v3830_v27, %v3829_v18  ;;  %v220_v18 = vld [vmem:[%s9352_s0 + $0x5e0] sm:$0xff]  ;;  %v1457_v27 = vadd.f32 %v7666_v38, %v7719_v14 }
 0x167   :  { %v7782_v41 = vpop.f32.mrb[70].mxu0 }
 0x168   :  { %v7784_v19 = vpop.f32.mrb[71].mxu0  ;;  %5899 = vmatmul.mubr.msk.f32.gmra.mrb[176].mxu0 %vm297_vm1, %v209_v48  ;;  %6166 = vmatpush1.bf16.msra.mxu1 %v6165_v45  ;;  %v219_v48 = vld [vmem:[%s9352_s0 + $0x5d8] sm:$0xff] }
 0x169   :  { %2958 = vrot.lane.b32.xlu0 %v2813_v40, %s6310_s29  ;;  %5901 = vmatprep.mubr.msk.f32.mxu0 %vm297_vm1, %v210_v39  ;;  %v1462_v39 = vadd.f32 %v7666_v38, %v7714_v2  ;;  %v3839_v2 = vld [vmem:[%s9354_s3 + $0xe0] sm:$0xff] }
 0x16a   :  { %6167 = vmatprep.subr.bf16.mxu1 %v6312_v44 }
 0x16b   :  { %v7802_v28 = vpop.f32.mrb[72].mxu0 }
 0x16c   :  { %v7804_v37 = vpop.f32.mrb[73].mxu0  ;;  %5902 = vmatmul.mubr.msk.f32.gmra.mrb[178].mxu0 %vm297_vm1, %v211_v31  ;;  %6169 = vmatpush1.bf16.msra.mxu1 %v6168_v59 }
 0x16d   :  { %3107 = vrot.lane.b32.xlu0 %v2813_v40, %s6311_s13  ;;  %5904 = vmatprep.mubr.msk.f32.mxu0 %vm297_vm1, %v212_v0  ;;  %v3834_v40 = vld [vmem:[%s9354_s3 + $0xb8] sm:$0xff] }
 0x16e   :  { %6170 = vmatprep.subr.bf16.mxu1 %v6312_v44  ;;  %v6174_v24 = vpack.c.bf16 %v3834_v40, %v3833_v46  ;;  %v1472_v46 = vadd.f32 %v7666_v38, %v7736_v33  ;;  %v3841_v33 = vld [vmem:[%s9354_s3 + $0xf0] sm:$0xff] }
 0x16f   :  { %v7822_v36 = vpop.f32.mrb[74].mxu0 }
 0x170   :  { %v7824_v47 = vpop.f32.mrb[75].mxu0  ;;  %5905 = vmatmul.mubr.msk.f32.gmra.mrb[180].mxu0 %vm297_vm1, %v213_v42  ;;  %6172 = vmatpush1.bf16.msra.mxu1 %v6171_v17  ;;  %v221_v42 = vld [vmem:[%s9352_s0 + $0x5e8] sm:$0xff]  ;;  %v6183_v17 = vpack.c.bf16 %v3840_v50, %v3839_v2 }
 0x171   :  { %3426 = vrot.lane.b32.xlu0 %v7741_v21, %s6310_s29  ;;  %5907 = vmatprep.mubr.msk.f32.mxu0 %vm297_vm1, %v214_v15  ;;  %v2480_v15 = vmax.f32 %v1462_v39, 0.0 }
 0x172   :  { %6173 = vmatprep.subr.bf16.mxu1 %v6312_v44 }
 0x173   :  { %v7843_v30 = vpop.f32.mrb[76].mxu0 }
 0x174   :  { %v7845_v7 = vpop.f32.mrb[77].mxu0  ;;  %5908 = vmatmul.mubr.msk.f32.gmra.mrb[182].mxu0 %vm297_vm1, %v215_v4  ;;  %6175 = vmatpush1.bf16.msra.mxu1 %v6174_v24  ;;  %v222_v4 = vld [vmem:[%s9352_s0 + $0x5f0] sm:$0xff]  ;;  %v2479_v24 = vmax.f32 %v1457_v27, 0.0  ;;  %v1482_v27 = vadd.f32 %v7666_v38, %v7762_v60 }
 0x175   :  { %3109 = vrot.lane.b32.xlu0 %v7741_v21, %s6311_s13  ;;  %5910 = vmatprep.mubr.msk.f32.mxu0 %vm297_vm1, %v216_v25  ;;  %v3837_v21 = vld [vmem:[%s9354_s3 + $0xd0] sm:$0xff]  ;;  %v1467_v25 = vadd.f32 %v7666_v38, %v7743_v10  ;;  %v3842_v10 = vld [vmem:[%s9354_s3 + $0xf8] sm:$0xff] }
 0x176   :  { %6176 = vmatprep.subr.bf16.mxu1 %v6312_v44  ;;  %v6180_v45 = vpack.c.bf16 %v3838_v26, %v3837_v21  ;;  %v6186_v39 = vpack.c.bf16 %v3842_v10, %v3841_v33  ;;  %v226_v33 = vld [vmem:[%s9352_s0 + $0x610] sm:$0xff] }
 0x177   :  { %v7864_v35 = vpop.f32.mrb[78].mxu0  ;;  %v7875_v22 = vpop.permute.xlu1 %3606 }
 0x178   :  { %v7866_v62 = vpop.f32.mrb[79].mxu0  ;;  %5911 = vmatmul.mubr.msk.f32.gmra.mrb[184].mxu0 %vm297_vm1, %v217_v12  ;;  %6178 = vmatpush1.bf16.msra.mxu1 %v6177_v6 }
 0x179   :  { %5913 = vmatprep.mubr.msk.f32.mxu0 %vm297_vm1, %v218_v29  ;;  %6179 = vmatprep.subr.bf16.mxu1 %v6312_v44 }
 0x17b   :  { %v5756_v31 = vpop.f32.mrb[80].mxu0  ;;  %v2937_v59 = vpop.permute.xlu0 %2936 }
 0x17c   :  { %v1542_v0 = vadd.f32 %v7666_v38, %v5756_v31  ;;  %3045 = vst.msk [vmem:[#allocation2] sm:$0xff] %vm3044_vm5, %v2937_v59  ;;  %v1536_v53 = vpop.f32.mrb[81].mxu0  ;;  %5914 = vmatmul.mubr.msk.f32.gmra.mrb[186].mxu0 %vm297_vm1, %v219_v48  ;;  %6181 = vmatpush1.bf16.msra.mxu1 %v6180_v45  ;;  %v223_v45 = vld [vmem:[%s9352_s0 + $0x5f8] sm:$0xff]  ;;  %v224_v59 = vld [vmem:[%s9352_s0 + $0x600] sm:$0xff] }
 0x17d   :  { %v1537_v14 = vadd.f32 %v7666_v38, %v1536_v53  ;;  %5916 = vmatprep.mubr.msk.f32.mxu0 %vm297_vm1, %v220_v18  ;;  %6182 = vmatprep.subr.bf16.mxu1 %v6312_v44  ;;  %v2482_v18 = vmax.f32 %v1472_v46, 0.0  ;;  %v1477_v53 = vadd.f32 %v7666_v38, %v7764_v52  ;;  %v225_v52 = vld [vmem:[%s9352_s0 + $0x608] sm:$0xff] }
 0x17e   :  { %v2496_v40 = vmax.f32 %v1542_v0, 0.0  ;;  %v2481_v0 = vmax.f32 %v1467_v25, 0.0 }
 0x17f   :  { %v2495_v23 = vmax.f32 %v1537_v14, 0.0  ;;  %v5759_v13 = vpop.f32.mrb[82].mxu0  ;;  %v3088_v12 = vpop.permute.xlu1 %3087 }
 0x180   :  { %v2704_v6 = vmax.f32 %v2480_v15, %v2496_v40  ;;  %v1552_v29 = vadd.f32 %v7666_v38, %v5759_v13  ;;  %3196 = vst.msk [vmem:[#allocation2] sm:$0xff] %vm3195_vm6, %v3088_v12  ;;  %v1546_v21 = vpop.f32.mrb[83].mxu0  ;;  %5917 = vmatmul.mubr.msk.f32.gmra.mrb[188].mxu0 %vm297_vm1, %v221_v42  ;;  %6184 = vmatpush1.bf16.msra.mxu1 %v6183_v17 }
 0x181   :  { %v2703_v26 = vmax.f32 %v2479_v24, %v2495_v23  ;;  %v1547_v48 = vadd.f32 %v7666_v38, %v1546_v21  ;;  %5919 = vmatprep.mubr.msk.f32.mxu0 %vm297_vm1, %v222_v4  ;;  %6185 = vmatprep.subr.bf16.mxu1 %v6312_v44  ;;  %v2484_v4 = vmax.f32 %v1482_v27, 0.0  ;;  %v1492_v24 = vadd.f32 %v7666_v38, %v7782_v41 }
 0x182   :  { %v2498_v31 = vmax.f32 %v1552_v29, 0.0  ;;  %v2483_v23 = vmax.f32 %v1477_v53, 0.0  ;;  %v1487_v13 = vadd.f32 %v7666_v38, %v7784_v19 }
 0x183   :  { %v2497_v2 = vmax.f32 %v1547_v48, 0.0  ;;  %v5762_v50 = vpop.f32.mrb[84].mxu0  ;;  %v2939_v14 = vpop.permute.xlu1 %2938  ;;  %v2815_v42 = vmax.f32 %v2703_v26, %v2704_v6 }
 0x184   :  { %v2706_v17 = vmax.f32 %v2482_v18, %v2498_v31  ;;  %v1562_v15 = vadd.f32 %v7666_v38, %v5762_v50  ;;  %3046 = vst.msk [vmem:[#allocation2 + $0x18] sm:$0xff] %vm3044_vm5, %v2939_v14  ;;  %v1556_v46 = vpop.f32.mrb[85].mxu0  ;;  %5920 = vmatmul.mubr.msk.f32.gmra.mrb[190].mxu0 %vm297_vm1, %v223_v45  ;;  %6187 = vmatpush1.bf16.msra.mxu1 %v6186_v39  ;;  %v227_v45 = vld [vmem:[%s9352_s0 + $0x618] sm:$0xff]  ;;  %v2486_v39 = vmax.f32 %v1492_v24, 0.0  ;;  %v2485_v31 = vmax.f32 %v1487_v13, 0.0  ;;  %v228_v14 = vld [vmem:[%s9352_s0 + $0x620] sm:$0xff] }
 0x185   :  { %v2705_v60 = vmax.f32 %v2481_v0, %v2497_v2  ;;  %v1557_v40 = vadd.f32 %v7666_v38, %v1556_v46  ;;  %3501 = vrot.lane.b32.xlu1 %v2815_v42, %s6311_s13  ;;  %2876 = vst.msk [vmem:[#allocation2 + $0x120] sm:$0xff] %vm2863_vm4, %v2815_v42  ;;  %5922 = vmatprep.mubr.msk.f32.mxu0 %vm297_vm1, %v224_v59  ;;  %v229_v46 = vld [vmem:[%s9352_s0 + $0x628] sm:$0xff] }
 0x186   :  { %v2500_v25 = vmax.f32 %v1562_v15, 0.0  ;;  %v1502_v18 = vadd.f32 %v7666_v38, %v7802_v28  ;;  %v1497_v59 = vadd.f32 %v7666_v38, %v7804_v37 }
 0x187   :  { %v2816_v12 = vmax.f32 %v2705_v60, %v2706_v17  ;;  %v2499_v6 = vmax.f32 %v1557_v40, 0.0  ;;  %v5765_v29 = vpop.f32.mrb[86].mxu0  ;;  %v3090_v21 = vpop.permute.xlu1 %3089  ;;  %v1512_v40 = vadd.f32 %v7666_v38, %v7822_v36 }
 0x188   :  { %v2708_v10 = vmax.f32 %v2484_v4, %v2500_v25  ;;  %v1572_v26 = vadd.f32 %v7666_v38, %v5765_v29  ;;  %3197 = vst.msk [vmem:[#allocation2 + $0x18] sm:$0xff] %vm3195_vm6, %v3090_v21  ;;  %v1566_v48 = vpop.f32.mrb[87].mxu0  ;;  %5923 = vmatmul.mubr.msk.f32.gmra.mrb[192].mxu0 %vm297_vm1, %v225_v52  ;;  %v2488_v60 = vmax.f32 %v1502_v18, 0.0  ;;  %v230_v4 = vld [vmem:[%s9352_s0 + $0x630] sm:$0xff]  ;;  %v2487_v24 = vmax.f32 %v1497_v59, 0.0 }
 0x189   :  { %2877 = vst.msk [vmem:[#allocation2 + $0x138] sm:$0xff] %vm2863_vm4, %v2816_v12  ;;  %3394 = vst.msk [vmem:[#allocation2 + $0x98] sm:$0xff] %vm2863_vm4, %v2816_v12  ;;  %v2707_v41 = vmax.f32 %v2483_v23, %v2499_v6  ;;  %v1567_v19 = vadd.f32 %v7666_v38, %v1566_v48  ;;  %3255 = vrot.lane.b32.xlu1 %v2815_v42, %s6309_s26  ;;  %3257 = vrot.lane.b32.xlu0 %v2816_v12, %s6309_s26 }
 0x18a   :  { %v2502_v27 = vmax.f32 %v1572_v26, 0.0  ;;  %5925 = vmatprep.mubr.msk.f32.mxu0 %vm297_vm1, %v226_v33  ;;  %v1507_v25 = vadd.f32 %v7666_v38, %v7824_v47  ;;  %v2490_v26 = vmax.f32 %v1512_v40, 0.0  ;;  %v1522_v48 = vadd.f32 %v7666_v38, %v7843_v30 }
 0x18b   :  { %v7966_v0 = vmax.f32 %v2707_v41, %v2708_v10  ;;  %v2501_v53 = vmax.f32 %v1567_v19, 0.0  ;;  %v5768_v2 = vpop.f32.mrb[88].mxu0  ;;  %v2941_v50 = vpop.permute.xlu1 %2940  ;;  %v231_v10 = vld [vmem:[%s9352_s0 + $0x638] sm:$0xff]  ;;  %v232_v19 = vld [vmem:[%s9352_s0 + $0x640] sm:$0xff] }
 0x18c   :  { %v2710_v42 = vmax.f32 %v2486_v39, %v2502_v27  ;;  %v1582_v17 = vadd.f32 %v7666_v38, %v5768_v2  ;;  %3047 = vst.msk [vmem:[#allocation2 + $0x30] sm:$0xff] %vm3044_vm5, %v2941_v50  ;;  %v1576_v28 = vpop.f32.mrb[89].mxu0  ;;  %5926 = vmatmul.mubr.msk.f32.gmra.mrb[194].mxu0 %vm297_vm1, %v227_v45  ;;  %v2489_v45 = vmax.f32 %v1507_v25, 0.0  ;;  %v1517_v39 = vadd.f32 %v7666_v38, %v7845_v7 }
 0x18d   :  { %3667 = vst.msk [vmem:[#allocation2 + $0x10] sm:$0xff] %vm2863_vm4, %v7966_v0  ;;  %2878 = vst.msk [vmem:[#allocation2 + $0x150] sm:$0xff] %vm2863_vm4, %v7966_v0  ;;  %v2709_v37 = vmax.f32 %v2485_v31, %v2501_v53  ;;  %v1577_v15 = vadd.f32 %v7666_v38, %v1576_v28  ;;  %2960 = vrot.lane.b32.xlu1 %v2816_v12, %s6310_s29  ;;  %3503 = vrot.lane.b32.xlu0 %v2816_v12, %s6311_s13 }
 0x18e   :  { %3395 = vst.msk [vmem:[#allocation2 + $0xb0] sm:$0xff] %vm2863_vm4, %v7966_v0  ;;  %v2504_v52 = vmax.f32 %v1582_v17, 0.0  ;;  %5928 = vmatprep.mubr.msk.f32.mxu0 %vm297_vm1, %v228_v14  ;;  %v233_v14 = vld [vmem:[%s9352_s0 + $0x648] sm:$0xff]  ;;  %v1532_v17 = vadd.f32 %v7666_v38, %v7864_v35 }
 0x18f   :  { %v7994_v23 = vmax.f32 %v2709_v37, %v2710_v42  ;;  %v2503_v13 = vmax.f32 %v1577_v15, 0.0  ;;  %v5771_v12 = vpop.f32.mrb[90].mxu0  ;;  %v3092_v6 = vpop.permute.xlu1 %3091  ;;  %v2492_v42 = vmax.f32 %v1522_v48, 0.0  ;;  %v234_v37 = vld [vmem:[%s9352_s0 + $0x650] sm:$0xff]  ;;  %v2491_v15 = vmax.f32 %v1517_v39, 0.0 }
 0x190   :  { %v2712_v29 = vmax.f32 %v2488_v60, %v2504_v52  ;;  %v1592_v21 = vadd.f32 %v7666_v38, %v5771_v12  ;;  %3198 = vst.msk [vmem:[#allocation2 + $0x30] sm:$0xff] %vm3195_vm6, %v3092_v6  ;;  %v1586_v36 = vpop.f32.mrb[91].mxu0  ;;  %5929 = vmatmul.mubr.msk.f32.gmra.mrb[196].mxu0 %vm297_vm1, %v229_v46  ;;  %v1527_v46 = vadd.f32 %v7666_v38, %v7866_v62  ;;  %v235_v12 = vld [vmem:[%s9352_s0 + $0x658] sm:$0xff]  ;;  %v2494_v6 = vmax.f32 %v1532_v17, 0.0 }
 0x191   :  { %3668 = vst.msk [vmem:[#allocation2 + $0x28] sm:$0xff] %vm2863_vm4, %v7994_v23  ;;  %2879 = vst.msk [vmem:[#allocation2 + $0x168] sm:$0xff] %vm2863_vm4, %v7994_v23  ;;  %v2711_v47 = vmax.f32 %v2487_v24, %v2503_v13  ;;  %v1587_v33 = vadd.f32 %v7666_v38, %v1586_v36  ;;  %3259 = vrot.lane.b32.xlu0 %v7966_v0, %s6309_s26  ;;  %5931 = vmatprep.mubr.msk.f32.mxu0 %vm297_vm1, %v230_v4 }
 0x192   :  { %3396 = vst.msk [vmem:[#allocation2 + $0xc8] sm:$0xff] %vm2863_vm4, %v7994_v23  ;;  %v2506_v41 = vmax.f32 %v1592_v21, 0.0  ;;  %v2493_v21 = vmax.f32 %v1527_v46, 0.0 }
 0x193   :  { %v8019_v18 = vmax.f32 %v2711_v47, %v2712_v29  ;;  %v2505_v27 = vmax.f32 %v1587_v33, 0.0  ;;  %v5774_v31 = vpop.f32.mrb[92].mxu0  ;;  %v2943_v59 = vpop.permute.xlu1 %2942 }
 0x194   :  { %v2714_v53 = vmax.f32 %v2490_v26, %v2506_v41  ;;  %v1602_v2 = vadd.f32 %v7666_v38, %v5774_v31  ;;  %3048 = vst.msk [vmem:[#allocation2 + $0x48] sm:$0xff] %vm3044_vm5, %v2943_v59  ;;  %v1596_v30 = vpop.f32.mrb[93].mxu0  ;;  %5932 = vmatmul.mubr.msk.f32.gmra.mrb[198].mxu0 %vm297_vm1, %v231_v10 }
 0x195   :  { %3669 = vst.msk [vmem:[#allocation2 + $0x40] sm:$0xff] %vm2863_vm4, %v8019_v18  ;;  %2880 = vst.msk [vmem:[#allocation2 + $0x180] sm:$0xff] %vm2863_vm4, %v8019_v18  ;;  %v2713_v7 = vmax.f32 %v2489_v45, %v2505_v27  ;;  %v1597_v50 = vadd.f32 %v7666_v38, %v1596_v30  ;;  %3111 = vrot.lane.b32.xlu0 %v7966_v0, %s6311_s13  ;;  %5934 = vmatprep.mubr.msk.f32.mxu0 %vm297_vm1, %v232_v19 }
 0x196   :  { %3397 = vst.msk [vmem:[#allocation2 + $0xe0] sm:$0xff] %vm2863_vm4, %v8019_v18  ;;  %v2508_v28 = vmax.f32 %v1602_v2, 0.0 }
 0x197   :  { %v8044_v60 = vmax.f32 %v2713_v7, %v2714_v53  ;;  %v2507_v40 = vmax.f32 %v1597_v50, 0.0  ;;  %v5777_v52 = vpop.f32.mrb[94].mxu0  ;;  %v3094_v4 = vpop.permute.xlu1 %3093 }
 0x198   :  { %v2716_v24 = vmax.f32 %v2492_v42, %v2508_v28  ;;  %v1612_v25 = vadd.f32 %v7666_v38, %v5777_v52  ;;  %3199 = vst.msk [vmem:[#allocation2 + $0x48] sm:$0xff] %vm3195_vm6, %v3094_v4  ;;  %v1606_v35 = vpop.f32.mrb[95].mxu0  ;;  %5935 = vmatmul.mubr.msk.f32.gmra.mrb[200].mxu0 %vm297_vm1, %v233_v14 }
 0x199   :  { %3670 = vst.msk [vmem:[#allocation2 + $0x58] sm:$0xff] %vm2863_vm4, %v8044_v60  ;;  %2881 = vst.msk [vmem:[#allocation2 + $0x198] sm:$0xff] %vm2863_vm4, %v8044_v60  ;;  %v2715_v62 = vmax.f32 %v2491_v15, %v2507_v40  ;;  %v1607_v13 = vadd.f32 %v7666_v38, %v1606_v35  ;;  %2962 = vrot.lane.b32.xlu0 %v7966_v0, %s6310_s29  ;;  %5937 = vmatprep.mubr.msk.f32.mxu0 %vm297_vm1, %v234_v37 }
 0x19a   :  { %3398 = vst.msk [vmem:[#allocation2 + $0xf8] sm:$0xff] %vm2863_vm4, %v8044_v60  ;;  %v2510_v29 = vmax.f32 %v1612_v25, 0.0 }
 0x19b   :  { %v8062_v36 = vmax.f32 %v2715_v62, %v2716_v24  ;;  %v2509_v47 = vmax.f32 %v1607_v13, 0.0  ;;  %v5780_v33 = vpop.f32.mrb[96].mxu0  ;;  %v2945_v10 = vpop.permute.xlu1 %2944 }
 0x19c   :  { %v2718_v26 = vmax.f32 %v2494_v6, %v2510_v29  ;;  %3049 = vst.msk [vmem:[#allocation2 + $0x60] sm:$0xff] %vm3044_vm5, %v2945_v10  ;;  %v1616_v48 = vpop.f32.mrb[97].mxu0  ;;  %5938 = vmatmul.mubr.msk.f32.gmra.mrb[202].mxu0 %vm297_vm1, %v235_v12 }
 0x19d   :  { %3671 = vst.msk [vmem:[#allocation2 + $0x70] sm:$0xff] %vm2863_vm4, %v8062_v36  ;;  %3399 = vst.msk [vmem:[#allocation2 + $0x110] sm:$0xff] %vm2863_vm4, %v8062_v36  ;;  %v2717_v0 = vmax.f32 %v2493_v21, %v2509_v47  ;;  %3261 = vrot.lane.b32.xlu0 %v7994_v23, %s6309_s26  ;;  %v1617_v52 = vadd.f32 %v7666_v38, %v1616_v48 }
 0x19f   :  { %v5783_v41 = vpop.f32.mrb[98].mxu0  ;;  %v3096_v19 = vpop.permute.xlu1 %3095  ;;  %v8072_v45 = vmax.f32 %v2717_v0, %v2718_v26  ;;  %v2511_v29 = vmax.f32 %v1617_v52, 0.0 }
 0x1a0   :  { %3200 = vst.msk [vmem:[#allocation2 + $0x60] sm:$0xff] %vm3195_vm6, %v3096_v19  ;;  %v1626_v39 = vpop.f32.mrb[99].mxu0  ;;  %v8117_v40 = vpop.permute.xlu0 %3529  ;;  %v1632_v12 = vadd.f32 %v7666_v38, %v5783_v41 }
 0x1a1   :  { %3113 = vrot.lane.b32.xlu0 %v7994_v23, %s6311_s13  ;;  %3672 = vst.msk [vmem:[#allocation2 + $0x88] sm:$0xff] %vm2863_vm4, %v8072_v45  ;;  %v1627_v21 = vadd.f32 %v7666_v38, %v1626_v39 }
 0x1a2   :  { %v2514_v41 = vmax.f32 %v1632_v12, 0.0 }
 0x1a3   :  { %v5786_v27 = vpop.f32.mrb[100].mxu0  ;;  %v2947_v31 = vpop.permute.xlu1 %2946 }
 0x1a4   :  { %3050 = vst.msk [vmem:[#allocation2 + $0x78] sm:$0xff] %vm3044_vm5, %v2947_v31  ;;  %v1636_v59 = vpop.f32.mrb[101].mxu0  ;;  %v1642_v39 = vadd.f32 %v7666_v38, %v5786_v27 }
 0x1a5   :  { %2964 = vrot.lane.b32.xlu0 %v7994_v23, %s6310_s29 }
 0x1a7   :  { %v8082_v53 = vpop.f32.mrb[102].mxu0  ;;  %v3098_v2 = vpop.permute.xlu1 %3097 }
 0x1a8   :  { %3201 = vst.msk [vmem:[#allocation2 + $0x78] sm:$0xff] %vm3195_vm6, %v3098_v2  ;;  %v8085_v30 = vpop.f32.mrb[103].mxu0  ;;  %v1652_v12 = vadd.f32 %v7666_v38, %v8082_v53 }
 0x1a9   :  { %3263 = vrot.lane.b32.xlu0 %v8019_v18, %s6309_s26 }
 0x1ab   :  { %v8089_v7 = vpop.f32.mrb[104].mxu0  ;;  %v8101_v42 = vpop.permute.xlu1 %3608 }
 0x1ac   :  { %v8091_v50 = vpop.f32.mrb[105].mxu0 }
 0x1ad   :  { %3115 = vrot.lane.b32.xlu0 %v8019_v18, %s6311_s13 }
 0x1af   :  { %v8095_v14 = vpop.f32.mrb[106].mxu0 }
 0x1b0   :  { %v8097_v23 = vpop.f32.mrb[107].mxu0 }
 0x1b1   :  { %2966 = vrot.lane.b32.xlu0 %v8019_v18, %s6310_s29  ;;  %v1622_v18 = vadd.f32 %v7666_v38, %v5780_v33 }
 0x1b3   :  { %v8103_v17 = vpop.f32.mrb[108].mxu0  ;;  %v2512_v13 = vmax.f32 %v1622_v18, 0.0  ;;  %v1637_v18 = vadd.f32 %v7666_v38, %v1636_v59  ;;  %v2516_v59 = vmax.f32 %v1642_v39, 0.0  ;;  %v2518_v39 = vmax.f32 %v1652_v12, 0.0 }
 0x1b4   :  { %v8105_v28 = vpop.f32.mrb[109].mxu0 }
 0x1b5   :  { %3265 = vrot.lane.b32.xlu0 %v8044_v60, %s6309_s26 }
 0x1b7   :  { %v8109_v37 = vpop.f32.mrb[110].mxu0  ;;  %v3244_v15 = vpop.permute.xlu1 %3243 }
 0x1b8   :  { %3352 = vst.msk [vmem:[#allocation2] sm:$0xff] %vm3351_vm7, %v3244_v15  ;;  %v8112_v46 = vpop.f32.mrb[111].mxu0  ;;  %v2513_v15 = vmax.f32 %v1627_v21, 0.0 }
 0x1b9   :  { %3117 = vrot.lane.b32.xlu0 %v8044_v60, %s6311_s13 }
 0x1bb   :  { %v5804_v4 = vpop.f32.mrb[112].mxu0  ;;  %v3246_v24 = vpop.permute.xlu1 %3245 }
 0x1bc   :  { %v1702_v25 = vadd.f32 %v7666_v38, %v5804_v4  ;;  %3353 = vst.msk [vmem:[#allocation2 + $0x18] sm:$0xff] %vm3351_vm7, %v3246_v24  ;;  %v1696_v35 = vpop.f32.mrb[113].mxu0 }
 0x1bd   :  { %v1697_v62 = vadd.f32 %v7666_v38, %v1696_v35  ;;  %2968 = vrot.lane.b32.xlu0 %v8044_v60, %s6310_s29 }
 0x1be   :  { %v2528_v6 = vmax.f32 %v1702_v25, 0.0 }
 0x1bf   :  { %v2527_v47 = vmax.f32 %v1697_v62, 0.0  ;;  %v5807_v33 = vpop.f32.mrb[114].mxu0  ;;  %v2949_v10 = vpop.permute.xlu1 %2948 }
 0x1c0   :  { %v2720_v26 = vmax.f32 %v2512_v13, %v2528_v6  ;;  %v1712_v48 = vadd.f32 %v7666_v38, %v5807_v33  ;;  %3051 = vst.msk [vmem:[#allocation2 + $0x90] sm:$0xff] %vm3044_vm5, %v2949_v10  ;;  %v2951_v0 = vpop.permute.xlu0 %2950  ;;  %v1706_v19 = vpop.f32.mrb[115].mxu0  ;;  %v1647_v33 = vadd.f32 %v7666_v38, %v8085_v30 }
 0x1c1   :  { %v2719_v31 = vmax.f32 %v2511_v29, %v2527_v47  ;;  %3052 = vst.msk [vmem:[#allocation2 + $0xa8] sm:$0xff] %vm3044_vm5, %v2951_v0  ;;  %3459 = vst.msk [vmem:[#allocation2 + $0x8] sm:$0xff] %vm3044_vm5, %v2951_v0  ;;  %v1707_v60 = vadd.f32 %v7666_v38, %v1706_v19  ;;  %3598 = vrot.lane.b32.xlu0 %v8062_v36, %s6309_s26  ;;  %v2515_v47 = vmax.f32 %v1637_v18, 0.0 }
 0x1c2   :  { %v2530_v2 = vmax.f32 %v1712_v48, 0.0  ;;  %v2517_v18 = vmax.f32 %v1647_v33, 0.0 }
 0x1c3   :  { %v2529_v52 = vmax.f32 %v1707_v60, 0.0  ;;  %v5810_v4 = vpop.f32.mrb[116].mxu0  ;;  %v3248_v24 = vpop.permute.xlu1 %3247  ;;  %v8136_v25 = vmax.f32 %v2719_v31, %v2720_v26 }
 0x1c4   :  { %v2722_v35 = vmax.f32 %v2514_v41, %v2530_v2  ;;  %v1722_v62 = vadd.f32 %v7666_v38, %v5810_v4  ;;  %3354 = vst.msk [vmem:[#allocation2 + $0x30] sm:$0xff] %vm3351_vm7, %v3248_v24  ;;  %v2953_v13 = vpop.permute.xlu0 %2952  ;;  %v1716_v6 = vpop.f32.mrb[117].mxu0  ;;  %v1662_v2 = vadd.f32 %v7666_v38, %v8089_v7 }
 0x1c5   :  { %v2721_v29 = vmax.f32 %v2513_v15, %v2529_v52  ;;  %3053 = vst.msk [vmem:[#allocation2 + $0xc0] sm:$0xff] %vm3044_vm5, %v2953_v13  ;;  %3460 = vst.msk [vmem:[#allocation2 + $0x20] sm:$0xff] %vm3044_vm5, %v2953_v13  ;;  %v1717_v27 = vadd.f32 %v7666_v38, %v1716_v6  ;;  %2970 = vrot.lane.b32.xlu0 %v8062_v36, %s6310_s29  ;;  %v1657_v52 = vadd.f32 %v7666_v38, %v8091_v50 }
 0x1c6   :  { %2882 = vst.msk [vmem:[#allocation2 + $0x1b0] sm:$0xff] %vm2863_vm4, %v8136_v25  ;;  %v2532_v21 = vmax.f32 %v1722_v62, 0.0 }
 0x1c7   :  { %v8151_v10 = vmax.f32 %v2721_v29, %v2722_v35  ;;  %v2531_v26 = vmax.f32 %v1717_v27, 0.0  ;;  %v5813_v48 = vpop.f32.mrb[118].mxu0  ;;  %v3100_v0 = vpop.permute.xlu1 %3099  ;;  %v2520_v27 = vmax.f32 %v1662_v2, 0.0 }
 0x1c8   :  { %v2724_v19 = vmax.f32 %v2516_v59, %v2532_v21  ;;  %v1732_v31 = vadd.f32 %v7666_v38, %v5813_v48  ;;  %3202 = vst.msk [vmem:[#allocation2 + $0x90] sm:$0xff] %vm3195_vm6, %v3100_v0  ;;  %v3102_v60 = vpop.permute.xlu0 %3101  ;;  %v1726_v41 = vpop.f32.mrb[119].mxu0  ;;  %v1672_v59 = vadd.f32 %v7666_v38, %v8095_v14  ;;  %v2519_v21 = vmax.f32 %v1657_v52, 0.0 }
 0x1c9   :  { %2883 = vst.msk [vmem:[#allocation2 + $0x1c8] sm:$0xff] %vm2863_vm4, %v8151_v10  ;;  %3400 = vst.msk [vmem:[#allocation2 + $0x128] sm:$0xff] %vm2863_vm4, %v8151_v10  ;;  %v2723_v53 = vmax.f32 %v2515_v47, %v2531_v26  ;;  %v1727_v30 = vadd.f32 %v7666_v38, %v1726_v41  ;;  %3507 = vrot.lane.b32.xlu1 %v8151_v10, %s6311_s13  ;;  %3119 = vrot.lane.b32.xlu0 %v8062_v36, %s6311_s13 }
 0x1ca   :  { %3203 = vst.msk [vmem:[#allocation2 + $0xa8] sm:$0xff] %vm3195_vm6, %v3102_v60  ;;  %v2534_v15 = vmax.f32 %v1732_v31, 0.0  ;;  %v1667_v47 = vadd.f32 %v7666_v38, %v8097_v23 }
 0x1cb   :  { %v8169_v4 = vmax.f32 %v2723_v53, %v2724_v19  ;;  %v2533_v24 = vmax.f32 %v1727_v30, 0.0  ;;  %v5816_v35 = vpop.f32.mrb[120].mxu0  ;;  %v3250_v62 = vpop.permute.xlu1 %3249  ;;  %v2522_v53 = vmax.f32 %v1672_v59, 0.0  ;;  %v1682_v30 = vadd.f32 %v7666_v38, %v8103_v17 }
 0x1cc   :  { %v2726_v13 = vmax.f32 %v2518_v39, %v2534_v15  ;;  %v1742_v6 = vadd.f32 %v7666_v38, %v5816_v35  ;;  %3355 = vst.msk [vmem:[#allocation2 + $0x48] sm:$0xff] %vm3351_vm7, %v3250_v62  ;;  %v2955_v36 = vpop.permute.xlu0 %2954  ;;  %v1736_v29 = vpop.f32.mrb[121].mxu0  ;;  %v2521_v2 = vmax.f32 %v1667_v47, 0.0  ;;  %v1677_v15 = vadd.f32 %v7666_v38, %v8105_v28 }
 0x1cd   :  { %3673 = vst.msk [vmem:[#allocation2 + $0xa0] sm:$0xff] %vm2863_vm4, %v8169_v4  ;;  %2884 = vst.msk [vmem:[#allocation2 + $0x1e0] sm:$0xff] %vm2863_vm4, %v8169_v4  ;;  %v2725_v7 = vmax.f32 %v2517_v18, %v2533_v24  ;;  %v1737_v50 = vadd.f32 %v7666_v38, %v1736_v29  ;;  %2972 = vrot.lane.b32.xlu1 %v8151_v10, %s6310_s29  ;;  %3428 = vrot.lane.b32.xlu0 %v8072_v45, %s6310_s29  ;;  %v8230_v29 = vld [vmem:[%s9353_s2] ss:$0 sm:$0xff] }
 0x1ce   :  { %3401 = vst.msk [vmem:[#allocation2 + $0x140] sm:$0xff] %vm2863_vm4, %v8169_v4  ;;  %v2536_v12 = vmax.f32 %v1742_v6, 0.0 }
 0x1cf   :  { %3054 = vst.msk [vmem:[#allocation2 + $0xd8] sm:$0xff] %vm3044_vm5, %v2955_v36  ;;  %3461 = vst.msk [vmem:[#allocation2 + $0x38] sm:$0xff] %vm3044_vm5, %v2955_v36  ;;  %v8190_v33 = vmax.f32 %v2725_v7, %v2726_v13  ;;  %v2535_v26 = vmax.f32 %v1737_v50, 0.0  ;;  %v5819_v48 = vpop.f32.mrb[122].mxu0  ;;  %v3252_v0 = vpop.permute.xlu1 %3251  ;;  %v2524_v36 = vmax.f32 %v1682_v30, 0.0  ;;  %v1692_v7 = vadd.f32 %v8230_v29, %v8109_v37 }
 0x1d0   :  { %v2728_v19 = vmax.f32 %v2520_v27, %v2536_v12  ;;  %v1752_v31 = vadd.f32 %v7666_v38, %v5819_v48  ;;  %3356 = vst.msk [vmem:[#allocation2 + $0x60] sm:$0xff] %vm3351_vm7, %v3252_v0  ;;  %v3104_v60 = vpop.permute.xlu0 %3103  ;;  %v1746_v41 = vpop.f32.mrb[123].mxu0  ;;  %v2523_v27 = vmax.f32 %v1677_v15, 0.0 }
 0x1d1   :  { %3674 = vst.msk [vmem:[#allocation2 + $0xb8] sm:$0xff] %vm2863_vm4, %v8190_v33  ;;  %2885 = vst.msk [vmem:[#allocation2 + $0x1f8] sm:$0xff] %vm2863_vm4, %v8190_v33  ;;  %v2727_v14 = vmax.f32 %v2519_v21, %v2535_v26  ;;  %v1747_v23 = vadd.f32 %v7666_v38, %v1746_v41  ;;  %3271 = vrot.lane.b32.xlu1 %v8169_v4, %s6309_s26  ;;  %3121 = vrot.lane.b32.xlu0 %v8072_v45, %s6311_s13 }
 0x1d2   :  { %3402 = vst.msk [vmem:[#allocation2 + $0x158] sm:$0xff] %vm2863_vm4, %v8190_v33  ;;  %v2538_v39 = vmax.f32 %v1752_v31, 0.0 }
 0x1d3   :  { %3204 = vst.msk [vmem:[#allocation2 + $0xc0] sm:$0xff] %vm3195_vm6, %v3104_v60  ;;  %v8210_v18 = vmax.f32 %v2727_v14, %v2728_v19  ;;  %v2537_v52 = vmax.f32 %v1747_v23, 0.0  ;;  %v5822_v24 = vpop.f32.mrb[124].mxu0  ;;  %v3254_v35 = vpop.permute.xlu1 %3253 }
 0x1d4   :  { %v2730_v62 = vmax.f32 %v2522_v53, %v2538_v39  ;;  %v1762_v13 = vadd.f32 %v7666_v38, %v5822_v24  ;;  %3357 = vst.msk [vmem:[#allocation2 + $0x78] sm:$0xff] %vm3351_vm7, %v3254_v35  ;;  %v2957_v45 = vpop.permute.xlu0 %2956  ;;  %v1756_v6 = vpop.f32.mrb[125].mxu0 }
 0x1d5   :  { %3675 = vst.msk [vmem:[#allocation2 + $0xd0] sm:$0xff] %vm2863_vm4, %v8210_v18  ;;  %2886 = vst.msk [vmem:[#allocation2 + $0x210] sm:$0xff] %vm2863_vm4, %v8210_v18  ;;  %v2729_v17 = vmax.f32 %v2521_v2, %v2537_v52  ;;  %v1757_v28 = vadd.f32 %v7666_v38, %v1756_v6  ;;  %3123 = vrot.lane.b32.xlu1 %v8169_v4, %s6311_s13  ;;  %3505 = vrot.lane.b32.xlu0 %v8136_v25, %s6311_s13 }
 0x1d6   :  { %3403 = vst.msk [vmem:[#allocation2 + $0x170] sm:$0xff] %vm2863_vm4, %v8210_v18  ;;  %v2540_v50 = vmax.f32 %v1762_v13, 0.0  ;;  %v1687_v38 = vadd.f32 %v8230_v29, %v8112_v46  ;;  %v2526_v46 = vmax.f32 %v1692_v7, 0.0 }
 0x1d7   :  { %3055 = vst.msk [vmem:[#allocation2 + $0xf0] sm:$0xff] %vm3044_vm5, %v2957_v45  ;;  %3462 = vst.msk [vmem:[#allocation2 + $0x50] sm:$0xff] %vm3044_vm5, %v2957_v45  ;;  %v2828_v59 = vmax.f32 %v2729_v17, %v2730_v62  ;;  %v2539_v12 = vmax.f32 %v1757_v28, 0.0  ;;  %v5825_v21 = vpop.f32.mrb[126].mxu0 }
 0x1d8   :  { %v2732_v47 = vmax.f32 %v2524_v36, %v2540_v50  ;;  %v1772_v26 = vadd.f32 %v8230_v29, %v5825_v21  ;;  %v3106_v48 = vpop.permute.xlu0 %3105  ;;  %v1766_v0 = vpop.f32.mrb[127].mxu0  ;;  %v2525_v60 = vmax.f32 %v1687_v38, 0.0 }
 0x1d9   :  { %3676 = vst.msk [vmem:[#allocation2 + $0xe8] sm:$0xff] %vm2863_vm4, %v2828_v59  ;;  %2887 = vst.msk [vmem:[#allocation2 + $0x228] sm:$0xff] %vm2863_vm4, %v2828_v59  ;;  %v2731_v37 = vmax.f32 %v2523_v27, %v2539_v12  ;;  %v1767_v19 = vadd.f32 %v8230_v29, %v1766_v0  ;;  %3273 = vrot.lane.b32.xlu1 %v8190_v33, %s6309_s26  ;;  %3267 = vrot.lane.b32.xlu0 %v8136_v25, %s6309_s26 }
 0x1da   :  { %3404 = vst.msk [vmem:[#allocation2 + $0x188] sm:$0xff] %vm2863_vm4, %v2828_v59  ;;  %v2542_v31 = vmax.f32 %v1772_v26, 0.0 }
 0x1db   :  { %3205 = vst.msk [vmem:[#allocation2 + $0xd8] sm:$0xff] %vm3195_vm6, %v3106_v48  ;;  %v2829_v41 = vmax.f32 %v2731_v37, %v2732_v47  ;;  %v2541_v14 = vmax.f32 %v1767_v19, 0.0  ;;  %v5828_v23 = vpop.f32.mrb[128].mxu0 }
 0x1dc   :  { %v2734_v53 = vmax.f32 %v2526_v46, %v2542_v31  ;;  %v2959_v30 = vpop.permute.xlu0 %2958  ;;  %v1776_v39 = vpop.f32.mrb[129].mxu0  ;;  %v1782_v38 = vadd.f32 %v8230_v29, %v5828_v23 }
 0x1dd   :  { %3677 = vst.msk [vmem:[#allocation2 + $0x100] sm:$0xff] %vm2863_vm4, %v2829_v41  ;;  %3405 = vst.msk [vmem:[#allocation2 + $0x1a0] sm:$0xff] %vm2863_vm4, %v2829_v41  ;;  %v2733_v2 = vmax.f32 %v2525_v60, %v2541_v14  ;;  %3125 = vrot.lane.b32.xlu1 %v8190_v33, %s6311_s13  ;;  %3269 = vrot.lane.b32.xlu0 %v8151_v10, %s6309_s26  ;;  %v1777_v12 = vadd.f32 %v8230_v29, %v1776_v39 }
 0x1de   :  { %3056 = vst.msk [vmem:[#allocation2 + $0x108] sm:$0xff] %vm3044_vm5, %v2959_v30  ;;  %3463 = vst.msk [vmem:[#allocation2 + $0x68] sm:$0xff] %vm3044_vm5, %v2959_v30  ;;  %v2544_v37 = vmax.f32 %v1782_v38, 0.0 }
 0x1df   :  { %v5831_v25 = vpop.f32.mrb[130].mxu0  ;;  %v2830_v15 = vmax.f32 %v2733_v2, %v2734_v53  ;;  %v2543_v31 = vmax.f32 %v1777_v12, 0.0 }
 0x1e0   :  { %v3108_v52 = vpop.permute.xlu0 %3107  ;;  %v1786_v24 = vpop.f32.mrb[131].mxu0  ;;  %v1792_v19 = vadd.f32 %v8230_v29, %v5831_v25 }
 0x1e1   :  { %3206 = vst.msk [vmem:[#allocation2 + $0xf0] sm:$0xff] %vm3195_vm6, %v3108_v52  ;;  %2976 = vrot.lane.b32.xlu1 %v8190_v33, %s6310_s29  ;;  %2974 = vrot.lane.b32.xlu0 %v8169_v4, %s6310_s29  ;;  %v1787_v60 = vadd.f32 %v8230_v29, %v1786_v24 }
 0x1e2   :  { %3678 = vst.msk [vmem:[#allocation2 + $0x118] sm:$0xff] %vm2863_vm4, %v2830_v15  ;;  %v2546_v25 = vmax.f32 %v1792_v19, 0.0 }
 0x1e3   :  { %v5834_v35 = vpop.f32.mrb[132].mxu0  ;;  %v2545_v24 = vmax.f32 %v1787_v60, 0.0 }
 0x1e4   :  { %v3427_v62 = vpop.permute.xlu0 %3426  ;;  %v1796_v13 = vpop.f32.mrb[133].mxu0 }
 0x1e5   :  { %3464 = vst.msk [vmem:[#allocation2 + $0x80] sm:$0xff] %vm3044_vm5, %v3427_v62  ;;  %3275 = vrot.lane.b32.xlu1 %v8210_v18, %s6309_s26  ;;  %2978 = vrot.lane.b32.xlu0 %v8210_v18, %s6310_s29  ;;  %v1802_v62 = vadd.f32 %v8230_v29, %v5834_v35 }
 0x1e7   :  { %v8265_v10 = vpop.f32.mrb[134].mxu0  ;;  %v2548_v19 = vmax.f32 %v1802_v62, 0.0 }
 0x1e8   :  { %v3110_v45 = vpop.permute.xlu0 %3109  ;;  %v8267_v33 = vpop.f32.mrb[135].mxu0 }
 0x1e9   :  { %3207 = vst.msk [vmem:[#allocation2 + $0x108] sm:$0xff] %vm3195_vm6, %v3110_v45  ;;  %3127 = vrot.lane.b32.xlu1 %v8210_v18, %s6311_s13  ;;  %2982 = vrot.lane.b32.xlu0 %v2829_v41, %s6310_s29 }
 0x1eb   :  { %v8273_v4 = vpop.f32.mrb[136].mxu0 }
 0x1ec   :  { %v8275_v6 = vpop.f32.mrb[137].mxu0 }
 0x1ed   :  { %3277 = vrot.lane.b32.xlu1 %v2828_v59, %s6309_s26  ;;  %3131 = vrot.lane.b32.xlu0 %v2829_v41, %s6311_s13 }
 0x1ef   :  { %v8279_v17 = vpop.f32.mrb[138].mxu0 }
 0x1f0   :  { %v8281_v28 = vpop.f32.mrb[139].mxu0 }
 0x1f1   :  { %3129 = vrot.lane.b32.xlu1 %v2828_v59, %s6311_s13  ;;  %3430 = vrot.lane.b32.xlu0 %v2830_v15, %s6310_s29 }
 0x1f3   :  { %v8285_v36 = vpop.f32.mrb[140].mxu0 }
 0x1f4   :  { %v8287_v18 = vpop.f32.mrb[141].mxu0 }
 0x1f5   :  { %2980 = vrot.lane.b32.xlu1 %v2828_v59, %s6310_s29  ;;  %3133 = vrot.lane.b32.xlu0 %v2830_v15, %s6311_s13 }
 0x1f7   :  { %v8291_v7 = vpop.f32.mrb[142].mxu0  ;;  %v3502_v50 = vpop.permute.xlu1 %3501 }
 0x1f8   :  { %3561 = vst.msk [vmem:[#allocation2 + $0x8] sm:$0xff] %vm3195_vm6, %v3502_v50  ;;  %v8294_v27 = vpop.f32.mrb[143].mxu0  ;;  %v1797_v50 = vadd.f32 %v8230_v29, %v1796_v13  ;;  %v3703_v13 = vld [vmem:[#allocation2] sm:$0xff] }
 0x1f9   :  { %3600 = vrot.lane.b32.xlu1 %v2829_v41, %s6309_s26 }
 0x1fa   :  { %v2547_v60 = vmax.f32 %v1797_v50, 0.0 }
 0x1fb   :  { %v5852_v21 = vpop.f32.mrb[144].mxu0  ;;  %v3256_v47 = vpop.permute.xlu1 %3255 }
 0x1fc   :  { %v1862_v26 = vadd.f32 %v8230_v29, %v5852_v21  ;;  %3358 = vst.msk [vmem:[#allocation2 + $0x90] sm:$0xff] %vm3351_vm7, %v3256_v47  ;;  %v3258_v59 = vpop.permute.xlu0 %3257  ;;  %v1856_v48 = vpop.f32.mrb[145].mxu0 }
 0x1fd   :  { %3359 = vst.msk [vmem:[#allocation2 + $0xa8] sm:$0xff] %vm3351_vm7, %v3258_v59  ;;  %3631 = vst.msk [vmem:[#allocation2 + $0x8] sm:$0xff] %vm3351_vm7, %v3258_v59  ;;  %v1857_v0 = vadd.f32 %v8230_v29, %v1856_v48 }
 0x1fe   :  { %v2560_v46 = vmax.f32 %v1862_v26, 0.0 }
 0x1ff   :  { %v2559_v41 = vmax.f32 %v1857_v0, 0.0  ;;  %v5855_v14 = vpop.f32.mrb[146].mxu0  ;;  %v2961_v23 = vpop.permute.xlu1 %2960 }
 0x200   :  { %v2736_v53 = vmax.f32 %v2544_v37, %v2560_v46  ;;  %v1872_v30 = vadd.f32 %v8230_v29, %v5855_v14  ;;  %3057 = vst.msk [vmem:[#allocation2 + $0x120] sm:$0xff] %vm3044_vm5, %v2961_v23  ;;  %v3504_v39 = vpop.permute.xlu0 %3503  ;;  %v1866_v2 = vpop.f32.mrb[147].mxu0  ;;  %v1812_v46 = vadd.f32 %v8230_v29, %v8265_v10 }
 0x201   :  { %v2735_v15 = vmax.f32 %v2543_v31, %v2559_v41  ;;  %3562 = vst.msk [vmem:[#allocation2 + $0x20] sm:$0xff] %vm3195_vm6, %v3504_v39  ;;  %v1867_v52 = vadd.f32 %v8230_v29, %v1866_v2  ;;  %v1807_v41 = vadd.f32 %v8230_v29, %v8267_v33 }
 0x202   :  { %v2562_v45 = vmax.f32 %v1872_v30, 0.0  ;;  %v2550_v33 = vmax.f32 %v1812_v46, 0.0  ;;  %v1827_v46 = vadd.f32 %v8230_v29, %v8281_v28 }
 0x203   :  { %v2561_v38 = vmax.f32 %v1867_v52, 0.0  ;;  %v5858_v12 = vpop.f32.mrb[148].mxu0  ;;  %v2831_v21 = vmax.f32 %v2735_v15, %v2736_v53 }
 0x204   :  { %v2738_v47 = vmax.f32 %v2546_v25, %v2562_v45  ;;  %v1882_v26 = vadd.f32 %v8230_v29, %v5858_v12  ;;  %v3260_v59 = vpop.permute.xlu0 %3259  ;;  %v1876_v48 = vpop.f32.mrb[149].mxu0  ;;  %v3704_v0 = vld [vmem:[#allocation2 + $0x8] sm:$0xff]  ;;  %v1822_v25 = vadd.f32 %v8230_v29, %v8273_v4  ;;  %v2549_v45 = vmax.f32 %v1807_v41, 0.0 }
 0x205   :  { %v2737_v37 = vmax.f32 %v2545_v24, %v2561_v38  ;;  %3360 = vst.msk [vmem:[#allocation2 + $0xc0] sm:$0xff] %vm3351_vm7, %v3260_v59  ;;  %3632 = vst.msk [vmem:[#allocation2 + $0x20] sm:$0xff] %vm3351_vm7, %v3260_v59  ;;  %v1877_v35 = vadd.f32 %v8230_v29, %v1876_v48  ;;  %4026 = vmatprep.mubr.f32.mxu1 %v3704_v0  ;;  %3509 = vrot.lane.b32.xlu0 %v2831_v21, %s6311_s13 }
 0x206   :  { %2888 = vst.msk [vmem:[#allocation2 + $0x240] sm:$0xff] %vm2863_vm4, %v2831_v21  ;;  %v2564_v31 = vmax.f32 %v1882_v26, 0.0  ;;  %4027 = vmatmul.mubr.f32.vlgmr.msra.gmra.mrb[52].mxu1 %v3703_v13  ;;  %v1817_v24 = vadd.f32 %v8230_v29, %v8275_v6 }
 0x207   :  { %v2832_v14 = vmax.f32 %v2737_v37, %v2738_v47  ;;  %v2563_v23 = vmax.f32 %v1877_v35, 0.0  ;;  %v5861_v53 = vpop.f32.mrb[150].mxu0  ;;  %v2552_v37 = vmax.f32 %v1822_v25, 0.0  ;;  %v1832_v35 = vadd.f32 %v8230_v29, %v8279_v17 }
 0x208   :  { %v2740_v30 = vmax.f32 %v2548_v19, %v2564_v31  ;;  %v1892_v39 = vadd.f32 %v8230_v29, %v5861_v53  ;;  %v3112_v2 = vpop.permute.xlu0 %3111  ;;  %v1886_v15 = vpop.f32.mrb[151].mxu0  ;;  %v2551_v19 = vmax.f32 %v1817_v24, 0.0 }
 0x209   :  { %2889 = vst.msk [vmem:[#allocation2 + $0x258] sm:$0xff] %vm2863_vm4, %v2832_v14  ;;  %3406 = vst.msk [vmem:[#allocation2 + $0x1b8] sm:$0xff] %vm2863_vm4, %v2832_v14  ;;  %v2739_v52 = vmax.f32 %v2547_v60, %v2563_v23  ;;  %v1887_v10 = vadd.f32 %v8230_v29, %v1886_v15  ;;  %3281 = vrot.lane.b32.xlu1 %v2832_v14, %s6309_s26  ;;  %3279 = vrot.lane.b32.xlu0 %v2831_v21, %s6309_s26  ;;  %v3706_v21 = vld [vmem:[#allocation2 + $0x18] sm:$0xff] }
 0x20a   :  { %3208 = vst.msk [vmem:[#allocation2 + $0x120] sm:$0xff] %vm3195_vm6, %v3112_v2  ;;  %3563 = vst.msk [vmem:[#allocation2 + $0x38] sm:$0xff] %vm3195_vm6, %v3112_v2  ;;  %v2566_v62 = vmax.f32 %v1892_v39, 0.0  ;;  %v1842_v2 = vadd.f32 %v8230_v29, %v8285_v36 }
 0x20b   :  { %v2833_v50 = vmax.f32 %v2739_v52, %v2740_v30  ;;  %v2565_v38 = vmax.f32 %v1887_v10, 0.0  ;;  %v5864_v12 = vpop.f32.mrb[152].mxu0  ;;  %v2553_v52 = vmax.f32 %v1827_v46, 0.0  ;;  %v1837_v10 = vadd.f32 %v8230_v29, %v8287_v18  ;;  %v3709_v46 = vld [vmem:[#allocation2 + $0x30] sm:$0xff] }
 0x20c   :  { %v2742_v47 = vmax.f32 %v2550_v33, %v2566_v62  ;;  %v1902_v26 = vadd.f32 %v8230_v29, %v5864_v12  ;;  %v2963_v59 = vpop.permute.xlu0 %2962  ;;  %v1896_v48 = vpop.f32.mrb[153].mxu0  ;;  %v3707_v0 = vld [vmem:[#allocation2 + $0x20] sm:$0xff] }
 0x20d   :  { %3679 = vst.msk [vmem:[#allocation2 + $0x130] sm:$0xff] %vm2863_vm4, %v2833_v50  ;;  %2890 = vst.msk [vmem:[#allocation2 + $0x270] sm:$0xff] %vm2863_vm4, %v2833_v50  ;;  %v2741_v4 = vmax.f32 %v2549_v45, %v2565_v38  ;;  %v1897_v6 = vadd.f32 %v8230_v29, %v1896_v48  ;;  %4031 = vmatprep.mubr.f32.mxu1 %v3707_v0  ;;  %2984 = vrot.lane.b32.xlu1 %v2832_v14, %s6310_s29  ;;  %v2555_v48 = vmax.f32 %v1837_v10, 0.0 }
 0x20e   :  { %3407 = vst.msk [vmem:[#allocation2 + $0x1d0] sm:$0xff] %vm2863_vm4, %v2833_v50  ;;  %v2568_v13 = vmax.f32 %v1902_v26, 0.0  ;;  %3511 = vrot.lane.b32.xlu0 %v2832_v14, %s6311_s13  ;;  %4032 = vmatmul.mubr.f32.gmra.mrb[54].mxu1 %v3706_v21  ;;  %v2554_v14 = vmax.f32 %v1832_v35, 0.0  ;;  %v1852_v26 = vadd.f32 %v8230_v29, %v8291_v7  ;;  %v1847_v0 = vadd.f32 %v8230_v29, %v8294_v27 }
 0x20f   :  { %3058 = vst.msk [vmem:[#allocation2 + $0x138] sm:$0xff] %vm3044_vm5, %v2963_v59  ;;  %3465 = vst.msk [vmem:[#allocation2 + $0x98] sm:$0xff] %vm3044_vm5, %v2963_v59  ;;  %v2834_v31 = vmax.f32 %v2741_v4, %v2742_v47  ;;  %v2567_v60 = vmax.f32 %v1897_v6, 0.0  ;;  %v5867_v41 = vpop.f32.mrb[154].mxu0  ;;  %v2556_v47 = vmax.f32 %v1842_v2, 0.0 }
 0x210   :  { %v2744_v23 = vmax.f32 %v2552_v37, %v2568_v13  ;;  %v1912_v53 = vadd.f32 %v8230_v29, %v5867_v41  ;;  %v3262_v30 = vpop.permute.xlu0 %3261  ;;  %v1906_v39 = vpop.f32.mrb[155].mxu0 }
 0x211   :  { %3680 = vst.msk [vmem:[#allocation2 + $0x148] sm:$0xff] %vm2863_vm4, %v2834_v31  ;;  %2891 = vst.msk [vmem:[#allocation2 + $0x288] sm:$0xff] %vm2863_vm4, %v2834_v31  ;;  %v2743_v17 = vmax.f32 %v2551_v19, %v2567_v60  ;;  %v1907_v28 = vadd.f32 %v8230_v29, %v1906_v39  ;;  %3283 = vrot.lane.b32.xlu1 %v2833_v50, %s6309_s26  ;;  %v2558_v60 = vmax.f32 %v1852_v26, 0.0 }
 0x212   :  { %3408 = vst.msk [vmem:[#allocation2 + $0x1e8] sm:$0xff] %vm2863_vm4, %v2834_v31  ;;  %v2570_v15 = vmax.f32 %v1912_v53, 0.0  ;;  %2986 = vrot.lane.b32.xlu0 %v2833_v50, %s6310_s29 }
 0x213   :  { %3361 = vst.msk [vmem:[#allocation2 + $0xd8] sm:$0xff] %vm3351_vm7, %v3262_v30  ;;  %3633 = vst.msk [vmem:[#allocation2 + $0x38] sm:$0xff] %vm3351_vm7, %v3262_v30  ;;  %v8360_v33 = vmax.f32 %v2743_v17, %v2744_v23  ;;  %v2569_v25 = vmax.f32 %v1907_v28, 0.0  ;;  %v5870_v62 = vpop.f32.mrb[156].mxu0  ;;  %v2557_v23 = vmax.f32 %v1847_v0, 0.0 }
 0x214   :  { %v2746_v45 = vmax.f32 %v2554_v14, %v2570_v15  ;;  %v1922_v24 = vadd.f32 %v8230_v29, %v5870_v62  ;;  %v3114_v38 = vpop.permute.xlu0 %3113  ;;  %v1916_v12 = vpop.f32.mrb[157].mxu0  ;;  %v3844_v62 = vld [vmem:[%s9354_s3 + $0x108] sm:$0xff] }
 0x215   :  { %3681 = vst.msk [vmem:[#allocation2 + $0x160] sm:$0xff] %vm2863_vm4, %v8360_v33  ;;  %2892 = vst.msk [vmem:[#allocation2 + $0x2a0] sm:$0xff] %vm2863_vm4, %v8360_v33  ;;  %v2745_v36 = vmax.f32 %v2553_v52, %v2569_v25  ;;  %v1917_v18 = vadd.f32 %v8230_v29, %v1916_v12  ;;  %3135 = vrot.lane.b32.xlu1 %v2833_v50, %s6311_s13  ;;  %v3843_v25 = vld [vmem:[%s9354_s3 + $0x100] sm:$0xff] }
 0x216   :  { %3409 = vst.msk [vmem:[#allocation2 + $0x200] sm:$0xff] %vm2863_vm4, %v8360_v33  ;;  %v2572_v59 = vmax.f32 %v1922_v24, 0.0  ;;  %3285 = vrot.lane.b32.xlu0 %v2834_v31, %s6309_s26 }
 0x217   :  { %3209 = vst.msk [vmem:[#allocation2 + $0x138] sm:$0xff] %vm3195_vm6, %v3114_v38  ;;  %3564 = vst.msk [vmem:[#allocation2 + $0x50] sm:$0xff] %vm3195_vm6, %v3114_v38  ;;  %v8378_v4 = vmax.f32 %v2745_v36, %v2746_v45  ;;  %v2571_v6 = vmax.f32 %v1917_v18, 0.0  ;;  %v5873_v21 = vpop.f32.mrb[158].mxu0  ;;  %v6188_v45 = vpack.c.bf16 %v3844_v62, %v3843_v25 }
 0x218   :  { %v2748_v37 = vmax.f32 %v2556_v47, %v2572_v59  ;;  %v1932_v35 = vadd.f32 %v8230_v29, %v5873_v21  ;;  %v2965_v13 = vpop.permute.xlu0 %2964  ;;  %v1926_v50 = vpop.f32.mrb[159].mxu0 }
 0x219   :  { %3682 = vst.msk [vmem:[#allocation2 + $0x178] sm:$0xff] %vm2863_vm4, %v8378_v4  ;;  %2893 = vst.msk [vmem:[#allocation2 + $0x2b8] sm:$0xff] %vm2863_vm4, %v8378_v4  ;;  %v2747_v7 = vmax.f32 %v2555_v48, %v2571_v6  ;;  %v1927_v27 = vadd.f32 %v8230_v29, %v1926_v50  ;;  %2988 = vrot.lane.b32.xlu1 %v2834_v31, %s6310_s29  ;;  %6189 = vmatprep.subr.bf16.mxu1 %v6188_v45 }
 0x21a   :  { %v3710_v19 = vld [vmem:[#allocation2 + $0x38] sm:$0xff]  ;;  %3410 = vst.msk [vmem:[#allocation2 + $0x218] sm:$0xff] %vm2863_vm4, %v8378_v4  ;;  %v2574_v41 = vmax.f32 %v1932_v35, 0.0  ;;  %3137 = vrot.lane.b32.xlu0 %v2834_v31, %s6311_s13  ;;  %6191 = vmatpush3.bf16.msra.mxu1 %v6188_v45 }
 0x21b   :  { %3059 = vst.msk [vmem:[#allocation2 + $0x150] sm:$0xff] %vm3044_vm5, %v2965_v13  ;;  %3466 = vst.msk [vmem:[#allocation2 + $0xb0] sm:$0xff] %vm3044_vm5, %v2965_v13  ;;  %4036 = vmatprep.mubr.f32.mxu1 %v3710_v19  ;;  %v2837_v53 = vmax.f32 %v2747_v7, %v2748_v37  ;;  %v2573_v30 = vmax.f32 %v1927_v27, 0.0  ;;  %v8392_v39 = vpop.f32.mrb[160].mxu0  ;;  %v3715_v13 = vld [vmem:[#allocation2 + $0x60] sm:$0xff] }
 0x21c   :  { %4037 = vmatmul.mubr.f32.gmra.mrb[56].mxu1 %v3709_v46  ;;  %v2750_v17 = vmax.f32 %v2558_v60, %v2574_v41  ;;  %v3264_v28 = vpop.permute.xlu0 %3263  ;;  %v8394_v14 = vpop.f32.mrb[161].mxu0  ;;  %v1942_v60 = vadd.f32 %v8230_v29, %v8392_v39 }
 0x21d   :  { %3683 = vst.msk [vmem:[#allocation2 + $0x190] sm:$0xff] %vm2863_vm4, %v2837_v53  ;;  %3411 = vst.msk [vmem:[#allocation2 + $0x230] sm:$0xff] %vm2863_vm4, %v2837_v53  ;;  %v2749_v2 = vmax.f32 %v2557_v23, %v2573_v30  ;;  %3287 = vrot.lane.b32.xlu1 %v8360_v33, %s6309_s26  ;;  %v1937_v41 = vadd.f32 %v8230_v29, %v8394_v14 }
 0x21e   :  { %3362 = vst.msk [vmem:[#allocation2 + $0xf0] sm:$0xff] %vm3351_vm7, %v3264_v28  ;;  %3634 = vst.msk [vmem:[#allocation2 + $0x50] sm:$0xff] %vm3351_vm7, %v3264_v28  ;;  %2990 = vrot.lane.b32.xlu0 %v8360_v33, %s6310_s29  ;;  %v2576_v25 = vmax.f32 %v1942_v60, 0.0 }
 0x21f   :  { %v2838_v31 = vmax.f32 %v2749_v2, %v2750_v17  ;;  %v8404_v15 = vpop.f32.mrb[162].mxu0  ;;  %v2575_v62 = vmax.f32 %v1937_v41, 0.0 }
 0x220   :  { %v3116_v52 = vpop.permute.xlu0 %3115  ;;  %v8406_v10 = vpop.f32.mrb[163].mxu0  ;;  %v1952_v39 = vadd.f32 %v8230_v29, %v8404_v15 }
 0x221   :  { %3684 = vst.msk [vmem:[#allocation2 + $0x1a8] sm:$0xff] %vm2863_vm4, %v2838_v31  ;;  %3139 = vrot.lane.b32.xlu1 %v8360_v33, %s6311_s13  ;;  %v3712_v33 = vld [vmem:[#allocation2 + $0x48] sm:$0xff]  ;;  %v1947_v45 = vadd.f32 %v8230_v29, %v8406_v10 }
 0x222   :  { %3210 = vst.msk [vmem:[#allocation2 + $0x150] sm:$0xff] %vm3195_vm6, %v3116_v52  ;;  %3565 = vst.msk [vmem:[#allocation2 + $0x68] sm:$0xff] %vm3195_vm6, %v3116_v52  ;;  %2994 = vrot.lane.b32.xlu0 %v2837_v53, %s6310_s29  ;;  %v3718_v52 = vld [vmem:[#allocation2 + $0x78] sm:$0xff] }
 0x223   :  { %v8420_v24 = vpop.f32.mrb[164].mxu0  ;;  %v2577_v60 = vmax.f32 %v1947_v45, 0.0 }
 0x224   :  { %v2967_v38 = vpop.permute.xlu0 %2966  ;;  %v8422_v12 = vpop.f32.mrb[165].mxu0 }
 0x225   :  { %v3713_v36 = vld [vmem:[#allocation2 + $0x50] sm:$0xff]  ;;  %3060 = vst.msk [vmem:[#allocation2 + $0x168] sm:$0xff] %vm3044_vm5, %v2967_v38  ;;  %3467 = vst.msk [vmem:[#allocation2 + $0xc8] sm:$0xff] %vm3044_vm5, %v2967_v38  ;;  %3289 = vrot.lane.b32.xlu1 %v8378_v4, %s6309_s26  ;;  %v1957_v41 = vadd.f32 %v8230_v29, %v8422_v12 }
 0x226   :  { %4041 = vmatprep.mubr.f32.mxu1 %v3713_v36  ;;  %3143 = vrot.lane.b32.xlu0 %v2837_v53, %s6311_s13 }
 0x227   :  { %4042 = vmatmul.mubr.f32.gmra.mrb[58].mxu1 %v3712_v33  ;;  %v8429_v18 = vpop.f32.mrb[166].mxu0 }
 0x228   :  { %v3266_v47 = vpop.permute.xlu0 %3265  ;;  %v8431_v26 = vpop.f32.mrb[167].mxu0 }
 0x229   :  { %3363 = vst.msk [vmem:[#allocation2 + $0x108] sm:$0xff] %vm3351_vm7, %v3266_v47  ;;  %3635 = vst.msk [vmem:[#allocation2 + $0x68] sm:$0xff] %vm3351_vm7, %v3266_v47  ;;  %3141 = vrot.lane.b32.xlu1 %v8378_v4, %s6311_s13  ;;  %v1967_v45 = vadd.f32 %v8230_v29, %v8431_v26 }
 0x22a   :  { %3432 = vrot.lane.b32.xlu0 %v2838_v31, %s6310_s29 }
 0x22b   :  { %v8438_v59 = vpop.f32.mrb[168].mxu0 }
 0x22c   :  { %v3118_v48 = vpop.permute.xlu0 %3117  ;;  %v8440_v0 = vpop.f32.mrb[169].mxu0 }
 0x22d   :  { %3211 = vst.msk [vmem:[#allocation2 + $0x168] sm:$0xff] %vm3195_vm6, %v3118_v48  ;;  %3566 = vst.msk [vmem:[#allocation2 + $0x80] sm:$0xff] %vm3195_vm6, %v3118_v48  ;;  %2992 = vrot.lane.b32.xlu1 %v8378_v4, %s6310_s29 }
 0x22e   :  { %3145 = vrot.lane.b32.xlu0 %v2838_v31, %s6311_s13 }
 0x22f   :  { %v8447_v6 = vpop.f32.mrb[170].mxu0 }
 0x230   :  { %v2969_v21 = vpop.permute.xlu0 %2968  ;;  %v8449_v37 = vpop.f32.mrb[171].mxu0  ;;  %v3716_v35 = vld [vmem:[#allocation2 + $0x68] sm:$0xff] }
 0x231   :  { %3061 = vst.msk [vmem:[#allocation2 + $0x180] sm:$0xff] %vm3044_vm5, %v2969_v21  ;;  %3468 = vst.msk [vmem:[#allocation2 + $0xe0] sm:$0xff] %vm3044_vm5, %v2969_v21  ;;  %4046 = vmatprep.mubr.f32.mxu1 %v3716_v35  ;;  %3602 = vrot.lane.b32.xlu1 %v2837_v53, %s6309_s26 }
 0x232   :  { %4047 = vmatmul.mubr.f32.gmra.mrb[60].mxu1 %v3715_v13 }
 0x233   :  { %v8454_v50 = vpop.f32.mrb[172].mxu0 }
 0x234   :  { %v3599_v4 = vpop.permute.xlu0 %3598  ;;  %v8456_v19 = vpop.f32.mrb[173].mxu0 }
 0x235   :  { %3636 = vst.msk [vmem:[#allocation2 + $0x80] sm:$0xff] %vm3351_vm7, %v3599_v4  ;;  %v2578_v4 = vmax.f32 %v1952_v39, 0.0  ;;  %v1972_v39 = vadd.f32 %v8230_v29, %v8429_v18 }
 0x237   :  { %v8459_v7 = vpop.f32.mrb[174].mxu0 }
 0x238   :  { %v2971_v27 = vpop.permute.xlu0 %2970  ;;  %v8461_v46 = vpop.f32.mrb[175].mxu0 }
 0x239   :  { %3062 = vst.msk [vmem:[#allocation2 + $0x198] sm:$0xff] %vm3044_vm5, %v2971_v27  ;;  %3469 = vst.msk [vmem:[#allocation2 + $0xf8] sm:$0xff] %vm3044_vm5, %v2971_v27  ;;  %v1962_v27 = vadd.f32 %v8230_v29, %v8420_v24 }
 0x23b   :  { %v5900_v23 = vpop.f32.mrb[176].mxu0  ;;  %v3508_v53 = vpop.permute.xlu1 %3507 }
 0x23c   :  { %v2022_v30 = vadd.f32 %v8230_v29, %v5900_v23  ;;  %3568 = vst.msk [vmem:[#allocation2 + $0xb0] sm:$0xff] %vm3195_vm6, %v3508_v53  ;;  %v3120_v17 = vpop.permute.xlu0 %3119  ;;  %v2016_v28 = vpop.f32.mrb[177].mxu0  ;;  %v3719_v2 = vld [vmem:[#allocation2 + $0x80] sm:$0xff] }
 0x23d   :  { %3212 = vst.msk [vmem:[#allocation2 + $0x180] sm:$0xff] %vm3195_vm6, %v3120_v17  ;;  %v2017_v31 = vadd.f32 %v8230_v29, %v2016_v28  ;;  %4051 = vmatprep.mubr.f32.mxu1 %v3719_v2 }
 0x23e   :  { %v2592_v14 = vmax.f32 %v2022_v30, 0.0  ;;  %4052 = vmatmul.mubr.f32.gmra.mrb[62].mxu1 %v3718_v52 }
 0x23f   :  { %v2591_v38 = vmax.f32 %v2017_v31, 0.0  ;;  %v5903_v36 = vpop.f32.mrb[178].mxu0  ;;  %v2973_v33 = vpop.permute.xlu1 %2972 }
 0x240   :  { %v2752_v47 = vmax.f32 %v2576_v25, %v2592_v14  ;;  %v2032_v48 = vadd.f32 %v8230_v29, %v5903_v36  ;;  %3063 = vst.msk [vmem:[#allocation2 + $0x1b0] sm:$0xff] %vm3044_vm5, %v2973_v33  ;;  %v3429_v21 = vpop.permute.xlu0 %3428  ;;  %v2026_v35 = vpop.f32.mrb[179].mxu0  ;;  %v2580_v25 = vmax.f32 %v1962_v27, 0.0 }
 0x241   :  { %v2751_v13 = vmax.f32 %v2575_v62, %v2591_v38  ;;  %3470 = vst.msk [vmem:[#allocation2 + $0x110] sm:$0xff] %vm3044_vm5, %v3429_v21  ;;  %v2027_v15 = vadd.f32 %v8230_v29, %v2026_v35  ;;  %v2579_v62 = vmax.f32 %v1957_v41, 0.0 }
 0x242   :  { %v2594_v10 = vmax.f32 %v2032_v48, 0.0 }
 0x243   :  { %v2839_v23 = vmax.f32 %v2751_v13, %v2752_v47  ;;  %v2593_v53 = vmax.f32 %v2027_v15, 0.0  ;;  %v5906_v30 = vpop.f32.mrb[180].mxu0  ;;  %v3272_v17 = vpop.permute.xlu1 %3271  ;;  %v2582_v15 = vmax.f32 %v1972_v39, 0.0  ;;  %v1987_v39 = vadd.f32 %v8230_v29, %v8449_v37 }
 0x244   :  { %v2754_v28 = vmax.f32 %v2578_v4, %v2594_v10  ;;  %v2042_v2 = vadd.f32 %v8230_v29, %v5906_v30  ;;  %3366 = vst.msk [vmem:[#allocation2 + $0x150] sm:$0xff] %vm3351_vm7, %v3272_v17  ;;  %3638 = vst.msk [vmem:[#allocation2 + $0xb0] sm:$0xff] %vm3351_vm7, %v3272_v17  ;;  %v3122_v31 = vpop.permute.xlu0 %3121  ;;  %v2036_v52 = vpop.f32.mrb[181].mxu0  ;;  %v1982_v4 = vadd.f32 %v8230_v29, %v8438_v59  ;;  %v2581_v10 = vmax.f32 %v1967_v45, 0.0 }
 0x245   :  { %2894 = vst.msk [vmem:[#allocation2 + $0x2d0] sm:$0xff] %vm2863_vm4, %v2839_v23  ;;  %v2753_v24 = vmax.f32 %v2577_v60, %v2593_v53  ;;  %v2037_v12 = vadd.f32 %v8230_v29, %v2036_v52  ;;  %3513 = vrot.lane.b32.xlu0 %v2839_v23, %s6311_s13  ;;  %v1977_v60 = vadd.f32 %v8230_v29, %v8440_v0 }
 0x246   :  { %3213 = vst.msk [vmem:[#allocation2 + $0x198] sm:$0xff] %vm3195_vm6, %v3122_v31  ;;  %v2596_v14 = vmax.f32 %v2042_v2, 0.0  ;;  %v2584_v52 = vmax.f32 %v1982_v4, 0.0 }
 0x247   :  { %v2840_v38 = vmax.f32 %v2753_v24, %v2754_v28  ;;  %v2595_v36 = vmax.f32 %v2037_v12, 0.0  ;;  %v5909_v33 = vpop.f32.mrb[182].mxu0  ;;  %v3124_v47 = vpop.permute.xlu1 %3123  ;;  %v1992_v24 = vadd.f32 %v8230_v29, %v8447_v6 }
 0x248   :  { %v2756_v48 = vmax.f32 %v2580_v25, %v2596_v14  ;;  %v2052_v21 = vadd.f32 %v8230_v29, %v5909_v33  ;;  %3214 = vst.msk [vmem:[#allocation2 + $0x1b0] sm:$0xff] %vm3195_vm6, %v3124_v47  ;;  %3569 = vst.msk [vmem:[#allocation2 + $0xc8] sm:$0xff] %vm3195_vm6, %v3124_v47  ;;  %v3506_v35 = vpop.permute.xlu0 %3505  ;;  %v2046_v13 = vpop.f32.mrb[183].mxu0  ;;  %v2583_v25 = vmax.f32 %v1977_v60, 0.0 }
 0x249   :  { %2895 = vst.msk [vmem:[#allocation2 + $0x2e8] sm:$0xff] %vm2863_vm4, %v2840_v38  ;;  %3412 = vst.msk [vmem:[#allocation2 + $0x248] sm:$0xff] %vm2863_vm4, %v2840_v38  ;;  %v2755_v18 = vmax.f32 %v2579_v62, %v2595_v36  ;;  %v2047_v26 = vadd.f32 %v8230_v29, %v2046_v13  ;;  %3293 = vrot.lane.b32.xlu1 %v2840_v38, %s6309_s26  ;;  %3291 = vrot.lane.b32.xlu0 %v2839_v23, %s6309_s26 }
 0x24a   :  { %3567 = vst.msk [vmem:[#allocation2 + $0x98] sm:$0xff] %vm3195_vm6, %v3506_v35  ;;  %v2598_v27 = vmax.f32 %v2052_v21, 0.0  ;;  %v2586_v21 = vmax.f32 %v1992_v24, 0.0  ;;  %v2002_v35 = vadd.f32 %v8230_v29, %v8454_v50 }
 0x24b   :  { %v8509_v41 = vmax.f32 %v2755_v18, %v2756_v48  ;;  %v2597_v53 = vmax.f32 %v2047_v26, 0.0  ;;  %v5912_v30 = vpop.f32.mrb[184].mxu0  ;;  %v3274_v17 = vpop.permute.xlu1 %3273  ;;  %v2585_v18 = vmax.f32 %v1987_v39, 0.0  ;;  %v1997_v26 = vadd.f32 %v8230_v29, %v8456_v19 }
 0x24c   :  { %v2758_v28 = vmax.f32 %v2582_v15, %v2598_v27  ;;  %v2062_v2 = vadd.f32 %v8230_v29, %v5912_v30  ;;  %3367 = vst.msk [vmem:[#allocation2 + $0x168] sm:$0xff] %vm3351_vm7, %v3274_v17  ;;  %3639 = vst.msk [vmem:[#allocation2 + $0xc8] sm:$0xff] %vm3351_vm7, %v3274_v17  ;;  %v3268_v23 = vpop.permute.xlu0 %3267  ;;  %v2056_v31 = vpop.f32.mrb[185].mxu0 }
 0x24d   :  { %3685 = vst.msk [vmem:[#allocation2 + $0x1c0] sm:$0xff] %vm2863_vm4, %v8509_v41  ;;  %2896 = vst.msk [vmem:[#allocation2 + $0x300] sm:$0xff] %vm2863_vm4, %v8509_v41  ;;  %v2757_v59 = vmax.f32 %v2581_v10, %v2597_v53  ;;  %v2057_v0 = vadd.f32 %v8230_v29, %v2056_v31  ;;  %2996 = vrot.lane.b32.xlu1 %v2840_v38, %s6310_s29  ;;  %3515 = vrot.lane.b32.xlu0 %v2840_v38, %s6311_s13  ;;  %v2587_v31 = vmax.f32 %v1997_v26, 0.0 }
 0x24e   :  { %3413 = vst.msk [vmem:[#allocation2 + $0x260] sm:$0xff] %vm2863_vm4, %v8509_v41  ;;  %v2600_v12 = vmax.f32 %v2062_v2, 0.0  ;;  %v2012_v2 = vadd.f32 %v8230_v29, %v8459_v7 }
 0x24f   :  { %3364 = vst.msk [vmem:[#allocation2 + $0x120] sm:$0xff] %vm3351_vm7, %v3268_v23  ;;  %v8528_v14 = vmax.f32 %v2757_v59, %v2758_v28  ;;  %v2599_v62 = vmax.f32 %v2057_v0, 0.0  ;;  %v5915_v45 = vpop.f32.mrb[186].mxu0  ;;  %v3126_v36 = vpop.permute.xlu1 %3125  ;;  %v2588_v28 = vmax.f32 %v2002_v35, 0.0  ;;  %v2007_v59 = vadd.f32 %v8230_v29, %v8461_v46 }
 0x250   :  { %v2760_v33 = vmax.f32 %v2584_v52, %v2600_v12  ;;  %v2072_v47 = vadd.f32 %v8230_v29, %v5915_v45  ;;  %3570 = vst.msk [vmem:[#allocation2 + $0xe0] sm:$0xff] %vm3195_vm6, %v3126_v36  ;;  %v3270_v38 = vpop.permute.xlu0 %3269  ;;  %v2066_v48 = vpop.f32.mrb[187].mxu0 }
 0x251   :  { %3686 = vst.msk [vmem:[#allocation2 + $0x1d8] sm:$0xff] %vm2863_vm4, %v8528_v14  ;;  %2897 = vst.msk [vmem:[#allocation2 + $0x318] sm:$0xff] %vm2863_vm4, %v8528_v14  ;;  %v2759_v6 = vmax.f32 %v2583_v25, %v2599_v62  ;;  %v2067_v37 = vadd.f32 %v8230_v29, %v2066_v48  ;;  %3295 = vrot.lane.b32.xlu1 %v8509_v41, %s6309_s26  ;;  %2998 = vrot.lane.b32.xlu0 %v8509_v41, %s6310_s29  ;;  %v3725_v48 = vld [vmem:[#allocation2 + $0xb0] sm:$0xff] }
 0x252   :  { %3414 = vst.msk [vmem:[#allocation2 + $0x278] sm:$0xff] %vm2863_vm4, %v8528_v14  ;;  %v2602_v13 = vmax.f32 %v2072_v47, 0.0  ;;  %v2590_v47 = vmax.f32 %v2012_v2, 0.0 }
 0x253   :  { %3365 = vst.msk [vmem:[#allocation2 + $0x138] sm:$0xff] %vm3351_vm7, %v3270_v38  ;;  %3637 = vst.msk [vmem:[#allocation2 + $0x98] sm:$0xff] %vm3351_vm7, %v3270_v38  ;;  %v8549_v15 = vmax.f32 %v2759_v6, %v2760_v33  ;;  %v2601_v4 = vmax.f32 %v2067_v37, 0.0  ;;  %v5918_v27 = vpop.f32.mrb[188].mxu0  ;;  %v2977_v10 = vpop.permute.xlu1 %2976  ;;  %v2182_v33 = vadd.f32 %v8230_v29, %v7033_v49  ;;  %v2177_v6 = vadd.f32 %v8230_v29, %v7038_v51 }
 0x254   :  { %v2762_v60 = vmax.f32 %v2586_v21, %v2602_v13  ;;  %v2082_v53 = vadd.f32 %v8230_v29, %v5918_v27  ;;  %3065 = vst.msk [vmem:[#allocation2 + $0x1e0] sm:$0xff] %vm3044_vm5, %v2977_v10  ;;  %3472 = vst.msk [vmem:[#allocation2 + $0x140] sm:$0xff] %vm3044_vm5, %v2977_v10  ;;  %v2975_v30 = vpop.permute.xlu0 %2974  ;;  %v2076_v17 = vpop.f32.mrb[189].mxu0  ;;  %v2589_v37 = vmax.f32 %v2007_v59, 0.0  ;;  %v3724_v10 = vld [vmem:[#allocation2 + $0xa8] sm:$0xff] }
 0x255   :  { %3687 = vst.msk [vmem:[#allocation2 + $0x1f0] sm:$0xff] %vm2863_vm4, %v8549_v15  ;;  %2898 = vst.msk [vmem:[#allocation2 + $0x330] sm:$0xff] %vm2863_vm4, %v8549_v15  ;;  %v2761_v50 = vmax.f32 %v2585_v18, %v2601_v4  ;;  %v2077_v19 = vadd.f32 %v8230_v29, %v2076_v17  ;;  %3147 = vrot.lane.b32.xlu1 %v8509_v41, %s6311_s13  ;;  %3297 = vrot.lane.b32.xlu0 %v8528_v14, %s6309_s26  ;;  %v3728_v17 = vld [vmem:[#allocation2 + $0xc8] sm:$0xff] }
 0x256   :  { %3415 = vst.msk [vmem:[#allocation2 + $0x290] sm:$0xff] %vm2863_vm4, %v8549_v15  ;;  %v2604_v23 = vmax.f32 %v2082_v53, 0.0  ;;  %v2192_v53 = vadd.f32 %v8230_v29, %v7049_v55  ;;  %v8619_v55 = vld [vmem:[%s9353_s2] ss:$0 sm:$0xff] }
 0x257   :  { %3064 = vst.msk [vmem:[#allocation2 + $0x1c8] sm:$0xff] %vm3044_vm5, %v2975_v30  ;;  %3471 = vst.msk [vmem:[#allocation2 + $0x128] sm:$0xff] %vm3044_vm5, %v2975_v30  ;;  %v8572_v0 = vmax.f32 %v2761_v50, %v2762_v60  ;;  %v2603_v52 = vmax.f32 %v2077_v19, 0.0  ;;  %v5921_v24 = vpop.f32.mrb[190].mxu0  ;;  %v3276_v12 = vpop.permute.xlu1 %3275  ;;  %v2624_v60 = vmax.f32 %v2182_v33, 0.0  ;;  %v2623_v50 = vmax.f32 %v2177_v6, 0.0 }
 0x258   :  { %3215 = vst.msk [vmem:[#allocation2 + $0x1c8] sm:$0xff] %vm3195_vm6, %v3126_v36  ;;  %v2764_v41 = vmax.f32 %v2588_v28, %v2604_v23  ;;  %v2092_v25 = vadd.f32 %v8230_v29, %v5921_v24  ;;  %v2979_v7 = vpop.permute.xlu0 %2978  ;;  %v2086_v39 = vpop.f32.mrb[191].mxu0  ;;  %v3721_v36 = vld [vmem:[#allocation2 + $0x90] sm:$0xff]  ;;  %v2187_v19 = vadd.f32 %v8230_v29, %v7054_v57 }
 0x259   :  { %3368 = vst.msk [vmem:[#allocation2 + $0x180] sm:$0xff] %vm3351_vm7, %v3276_v12  ;;  %3640 = vst.msk [vmem:[#allocation2 + $0xe0] sm:$0xff] %vm3351_vm7, %v3276_v12  ;;  %v2763_v46 = vmax.f32 %v2587_v31, %v2603_v52  ;;  %v2087_v45 = vadd.f32 %v8230_v29, %v2086_v39  ;;  %3000 = vrot.lane.b32.xlu1 %v8528_v14, %s6310_s29  ;;  %3149 = vrot.lane.b32.xlu0 %v8528_v14, %s6311_s13 }
 0x25a   :  { %v3722_v62 = vld [vmem:[#allocation2 + $0x98] sm:$0xff]  ;;  %3688 = vst.msk [vmem:[#allocation2 + $0x208] sm:$0xff] %vm2863_vm4, %v8572_v0  ;;  %2899 = vst.msk [vmem:[#allocation2 + $0x348] sm:$0xff] %vm2863_vm4, %v8572_v0  ;;  %v2606_v38 = vmax.f32 %v2092_v25, 0.0  ;;  %v2626_v25 = vmax.f32 %v2192_v53, 0.0 }
 0x25b   :  { %3416 = vst.msk [vmem:[#allocation2 + $0x2a8] sm:$0xff] %vm2863_vm4, %v8572_v0  ;;  %4056 = vmatprep.mubr.f32.mxu1 %v3722_v62  ;;  %v8594_v21 = vmax.f32 %v2763_v46, %v2764_v41  ;;  %v2605_v35 = vmax.f32 %v2087_v45, 0.0  ;;  %v5924_v13 = vpop.f32.mrb[192].mxu0  ;;  %v3128_v18 = vpop.permute.xlu1 %3127  ;;  %v3727_v41 = vld [vmem:[#allocation2 + $0xc0] sm:$0xff]  ;;  %v2625_v46 = vmax.f32 %v2187_v19, 0.0  ;;  %v2197_v45 = vadd.f32 %v8619_v55, %v7070_v63  ;;  %v3733_v19 = vld [vmem:[#allocation2 + $0xf0] sm:$0xff] }
 0x25c   :  { %3066 = vst.msk [vmem:[#allocation2 + $0x1f8] sm:$0xff] %vm3044_vm5, %v2979_v7  ;;  %3473 = vst.msk [vmem:[#allocation2 + $0x158] sm:$0xff] %vm3044_vm5, %v2979_v7  ;;  %4057 = vmatmul.mubr.f32.gmra.mrb[64].mxu1 %v3721_v36  ;;  %v2766_v26 = vmax.f32 %v2590_v47, %v2606_v38  ;;  %v2102_v49 = vadd.f32 %v8230_v29, %v5924_v13  ;;  %v2983_v14 = vpop.permute.xlu0 %2982  ;;  %v2096_v4 = vpop.f32.mrb[193].mxu0  ;;  %v2202_v7 = vadd.f32 %v8619_v55, %v7065_v61 }
 0x25d   :  { %4061 = vmatprep.mubr.f32.mxu1 %v3725_v48  ;;  %3216 = vst.msk [vmem:[#allocation2 + $0x1e0] sm:$0xff] %vm3195_vm6, %v3128_v18  ;;  %3571 = vst.msk [vmem:[#allocation2 + $0xf8] sm:$0xff] %vm3195_vm6, %v3128_v18  ;;  %v2765_v51 = vmax.f32 %v2589_v37, %v2605_v35  ;;  %v2097_v27 = vadd.f32 %v8230_v29, %v2096_v4  ;;  %3299 = vrot.lane.b32.xlu1 %v8549_v15, %s6309_s26  ;;  %v3730_v35 = vld [vmem:[#allocation2 + $0xd8] sm:$0xff] }
 0x25e   :  { %3689 = vst.msk [vmem:[#allocation2 + $0x220] sm:$0xff] %vm2863_vm4, %v8594_v21  ;;  %3417 = vst.msk [vmem:[#allocation2 + $0x2c0] sm:$0xff] %vm2863_vm4, %v8594_v21  ;;  %v2608_v30 = vmax.f32 %v2102_v49, 0.0  ;;  %3002 = vrot.lane.b32.xlu0 %v8549_v15, %s6310_s29  ;;  %v2628_v13 = vmax.f32 %v2202_v7, 0.0  ;;  %v2212_v18 = vadd.f32 %v8619_v55, %v7081_v3  ;;  %v2627_v49 = vmax.f32 %v2197_v45, 0.0 }
 0x25f   :  { %3068 = vst.msk [vmem:[#allocation2 + $0x228] sm:$0xff] %vm3044_vm5, %v2983_v14  ;;  %3475 = vst.msk [vmem:[#allocation2 + $0x188] sm:$0xff] %vm3044_vm5, %v2983_v14  ;;  %v8614_v28 = vmax.f32 %v2765_v51, %v2766_v26  ;;  %v2607_v2 = vmax.f32 %v2097_v27, 0.0  ;;  %v5927_v23 = vpop.f32.mrb[194].mxu0  ;;  %v3278_v31 = vpop.permute.xlu1 %3277  ;;  %v2207_v14 = vadd.f32 %v8619_v55, %v7086_v5 }
 0x260   :  { %4062 = vmatmul.mubr.f32.gmra.mrb[66].mxu1 %v3724_v10  ;;  %v2768_v59 = vmax.f32 %v2608_v30, %v2624_v60  ;;  %v2112_v52 = vadd.f32 %v8619_v55, %v5927_v23  ;;  %3369 = vst.msk [vmem:[#allocation2 + $0x198] sm:$0xff] %vm3351_vm7, %v3278_v31  ;;  %3641 = vst.msk [vmem:[#allocation2 + $0xf8] sm:$0xff] %vm3351_vm7, %v3278_v31  ;;  %v3132_v24 = vpop.permute.xlu0 %3131  ;;  %v2106_v57 = vpop.f32.mrb[195].mxu0  ;;  %v3731_v62 = vld [vmem:[#allocation2 + $0xe0] sm:$0xff]  ;;  %v3846_v23 = vld [vmem:[%s9354_s3 + $0x118] sm:$0xff]  ;;  %v2630_v31 = vmax.f32 %v2212_v18, 0.0 }
 0x261   :  { %4066 = vmatprep.mubr.f32.mxu1 %v3728_v17  ;;  %3690 = vst.msk [vmem:[#allocation2 + $0x238] sm:$0xff] %vm2863_vm4, %v8614_v28  ;;  %v2767_v29 = vmax.f32 %v2607_v2, %v2623_v50  ;;  %v2107_v12 = vadd.f32 %v8619_v55, %v2106_v57  ;;  %3151 = vrot.lane.b32.xlu1 %v8549_v15, %s6311_s13  ;;  %v3845_v2 = vld [vmem:[%s9354_s3 + $0x110] sm:$0xff]  ;;  %v2629_v57 = vmax.f32 %v2207_v14, 0.0 }
 0x262   :  { %v2610_v39 = vmax.f32 %v2112_v52, 0.0  ;;  %3006 = vrot.lane.b32.xlu0 %v8594_v21, %s6310_s29 }
 0x263   :  { %v8635_v36 = vmax.f32 %v2767_v29, %v2768_v59  ;;  %v2609_v33 = vmax.f32 %v2107_v12, 0.0  ;;  %v5930_v15 = vpop.f32.mrb[196].mxu0  ;;  %v3130_v47 = vpop.permute.xlu1 %3129  ;;  %v2222_v59 = vadd.f32 %v8619_v55, %v7097_v9  ;;  %v2217_v29 = vadd.f32 %v8619_v55, %v7102_v11 }
 0x264   :  { %4067 = vmatmul.mubr.f32.gmra.mrb[68].mxu1 %v3727_v41  ;;  %v2770_v38 = vmax.f32 %v2610_v39, %v2626_v25  ;;  %v2122_v48 = vadd.f32 %v8619_v55, %v5930_v15  ;;  %3217 = vst.msk [vmem:[#allocation2 + $0x1f8] sm:$0xff] %vm3195_vm6, %v3130_v47  ;;  %3572 = vst.msk [vmem:[#allocation2 + $0x110] sm:$0xff] %vm3195_vm6, %v3130_v47  ;;  %v3431_v61 = vpop.permute.xlu0 %3430  ;;  %v2116_v6 = vpop.f32.mrb[197].mxu0 }
 0x265   :  { %4071 = vmatprep.mubr.f32.mxu1 %v3731_v62  ;;  %v2769_v37 = vmax.f32 %v2609_v33, %v2625_v46  ;;  %3476 = vst.msk [vmem:[#allocation2 + $0x1a0] sm:$0xff] %vm3044_vm5, %v3431_v61  ;;  %v2117_v63 = vadd.f32 %v8619_v55, %v2116_v6  ;;  %3301 = vrot.lane.b32.xlu1 %v8572_v0, %s6309_s26  ;;  %v2632_v11 = vmax.f32 %v2222_v59, 0.0  ;;  %v2631_v47 = vmax.f32 %v2217_v29, 0.0  ;;  %v3742_v59 = vld [vmem:[#allocation2 + $0x138] sm:$0xff]  ;;  %v3745_v29 = vld [vmem:[#allocation2 + $0x150] sm:$0xff] }
 0x266   :  { %v2612_v26 = vmax.f32 %v2122_v48, 0.0  ;;  %3434 = vrot.lane.b32.xlu0 %v8614_v28, %s6310_s29  ;;  %v2232_v33 = vadd.f32 %v8619_v55, %v7118_v16 }
 0x267   :  { %v8650_v4 = vmax.f32 %v2769_v37, %v2770_v38  ;;  %v2611_v51 = vmax.f32 %v2117_v63, 0.0  ;;  %v5933_v27 = vpop.f32.mrb[198].mxu0  ;;  %v2981_v10 = vpop.permute.xlu1 %2980  ;;  %v3734_v60 = vld [vmem:[#allocation2 + $0xf8] sm:$0xff]  ;;  %v2227_v38 = vadd.f32 %v8619_v55, %v7125_v20 }
 0x268   :  { %4072 = vmatmul.mubr.f32.gmra.mrb[70].mxu1 %v3730_v35  ;;  %v2772_v53 = vmax.f32 %v2612_v26, %v2628_v13  ;;  %v2132_v30 = vadd.f32 %v8619_v55, %v5933_v27  ;;  %3067 = vst.msk [vmem:[#allocation2 + $0x210] sm:$0xff] %vm3044_vm5, %v2981_v10  ;;  %3474 = vst.msk [vmem:[#allocation2 + $0x170] sm:$0xff] %vm3044_vm5, %v2981_v10  ;;  %v3134_v3 = vpop.permute.xlu0 %3133  ;;  %v2126_v17 = vpop.f32.mrb[199].mxu0  ;;  %v2634_v13 = vmax.f32 %v2232_v33, 0.0  ;;  %v3736_v27 = vld [vmem:[#allocation2 + $0x108] sm:$0xff] }
 0x269   :  { %4076 = vmatprep.mubr.f32.mxu1 %v3734_v60  ;;  %3418 = vst.msk [vmem:[#allocation2 + $0x2d8] sm:$0xff] %vm2863_vm4, %v8650_v4  ;;  %v2771_v5 = vmax.f32 %v2611_v51, %v2627_v49  ;;  %v2127_v50 = vadd.f32 %v8619_v55, %v2126_v17  ;;  %3153 = vrot.lane.b32.xlu1 %v8572_v0, %s6311_s13  ;;  %v2633_v20 = vmax.f32 %v2227_v38, 0.0 }
 0x26a   :  { %3218 = vst.msk [vmem:[#allocation2 + $0x210] sm:$0xff] %vm3195_vm6, %v3132_v24  ;;  %3219 = vst.msk [vmem:[#allocation2 + $0x228] sm:$0xff] %vm3195_vm6, %v3134_v3  ;;  %v2614_v52 = vmax.f32 %v2132_v30, 0.0  ;;  %3517 = vrot.lane.b32.xlu0 %v8635_v36, %s6311_s13  ;;  %v6192_v24 = vpack.c.bf16 %v3846_v23, %v3845_v2 }
 0x26b   :  { %v2849_v12 = vmax.f32 %v2771_v5, %v2772_v53  ;;  %v2613_v41 = vmax.f32 %v2127_v50, 0.0  ;;  %v5936_v25 = vpop.f32.mrb[200].mxu0  ;;  %v3601_v7 = vpop.permute.xlu1 %3600 }
 0x26c   :  { %4077 = vmatmul.mubr.f32.gmra.mrb[72].mxu1 %v3733_v19  ;;  %v2774_v39 = vmax.f32 %v2614_v52, %v2630_v31  ;;  %v2142_v62 = vadd.f32 %v8619_v55, %v5936_v25  ;;  %3642 = vst.msk [vmem:[#allocation2 + $0x110] sm:$0xff] %vm3351_vm7, %v3601_v7  ;;  %v2136_v9 = vpop.f32.mrb[201].mxu0  ;;  %6193 = vmatprep.subr.bf16.mxu1 %v6192_v24  ;;  %v3748_v7 = vld [vmem:[#allocation2 + $0x168] sm:$0xff] }
 0x26d   :  { %3691 = vst.msk [vmem:[#allocation2 + $0x250] sm:$0xff] %vm2863_vm4, %v2849_v12  ;;  %3419 = vst.msk [vmem:[#allocation2 + $0x2f0] sm:$0xff] %vm2863_vm4, %v2849_v12  ;;  %v2773_v46 = vmax.f32 %v2613_v41, %v2629_v57  ;;  %v2137_v45 = vadd.f32 %v8619_v55, %v2136_v9  ;;  %3004 = vrot.lane.b32.xlu1 %v8572_v0, %s6310_s29  ;;  %6195 = vmatpush3.bf16.msra.mxu1 %v6192_v24  ;;  %v3751_v9 = vld [vmem:[#allocation2 + $0x180] sm:$0xff] }
 0x26e   :  { %v2616_v15 = vmax.f32 %v2142_v62, 0.0  ;;  %3519 = vrot.lane.b32.xlu0 %v8650_v4, %s6311_s13 }
 0x26f   :  { %v2850_v48 = vmax.f32 %v2773_v46, %v2774_v39  ;;  %v2615_v61 = vmax.f32 %v2137_v45, 0.0  ;;  %v5939_v6 = vpop.f32.mrb[202].mxu0  ;;  %v3754_v45 = vld [vmem:[#allocation2 + $0x198] sm:$0xff] }
 0x270   :  { %v2776_v37 = vmax.f32 %v2616_v15, %v2632_v11  ;;  %v2152_v63 = vadd.f32 %v8619_v55, %v5939_v6  ;;  %v2146_v0 = vpop.f32.mrb[203].mxu0 }
 0x271   :  { %3692 = vst.msk [vmem:[#allocation2 + $0x268] sm:$0xff] %vm2863_vm4, %v2850_v48  ;;  %3420 = vst.msk [vmem:[#allocation2 + $0x308] sm:$0xff] %vm2863_vm4, %v2850_v48  ;;  %v2775_v16 = vmax.f32 %v2615_v61, %v2631_v47  ;;  %v2147_v35 = vadd.f32 %v8619_v55, %v2146_v0  ;;  %3604 = vrot.lane.b32.xlu1 %v8594_v21, %s6309_s26 }
 0x272   :  { %v2618_v18 = vmax.f32 %v2152_v63, 0.0  ;;  %3436 = vrot.lane.b32.xlu0 %v2849_v12, %s6310_s29 }
 0x273   :  { %v2851_v26 = vmax.f32 %v2775_v16, %v2776_v37  ;;  %v2617_v49 = vmax.f32 %v2147_v35, 0.0  ;;  %v3737_v14 = vld [vmem:[#allocation2 + $0x110] sm:$0xff] }
 0x274   :  { %v2778_v51 = vmax.f32 %v2618_v18, %v2634_v13  ;;  %4081 = vmatprep.mubr.f32.mxu1 %v3737_v14 }
 0x275   :  { %3693 = vst.msk [vmem:[#allocation2 + $0x280] sm:$0xff] %vm2863_vm4, %v2851_v26  ;;  %3421 = vst.msk [vmem:[#allocation2 + $0x320] sm:$0xff] %vm2863_vm4, %v2851_v26  ;;  %v2777_v10 = vmax.f32 %v2617_v49, %v2633_v20  ;;  %3305 = vrot.lane.b32.xlu1 %v8650_v4, %s6309_s26  ;;  %4082 = vmatmul.mubr.f32.gmra.mrb[74].mxu1 %v3736_v27 }
 0x276   :  { %3309 = vrot.lane.b32.xlu0 %v2850_v48, %s6309_s26 }
 0x277   :  { %v8699_v55 = vmax.f32 %v2777_v10, %v2778_v51  ;;  %v3510_v60 = vpop.permute.xlu0 %3509 }
 0x278   :  { %3573 = vst.msk [vmem:[#allocation2 + $0x128] sm:$0xff] %vm3195_vm6, %v3510_v60 }
 0x279   :  { %3694 = vst.msk [vmem:[#allocation2 + $0x298] sm:$0xff] %vm2863_vm4, %v8699_v55  ;;  %3422 = vst.msk [vmem:[#allocation2 + $0x338] sm:$0xff] %vm2863_vm4, %v8699_v55  ;;  %3307 = vrot.lane.b32.xlu1 %v2849_v12, %s6309_s26 }
 0x27a   :  { %3523 = vrot.lane.b32.xlu0 %v2850_v48, %s6311_s13 }
 0x27b   :  { %v3282_v53 = vpop.permute.xlu1 %3281  ;;  %v3280_v4 = vpop.permute.xlu0 %3279 }
 0x27c   :  { %3371 = vst.msk [vmem:[#allocation2 + $0x1c8] sm:$0xff] %vm3351_vm7, %v3282_v53  ;;  %3643 = vst.msk [vmem:[#allocation2 + $0x128] sm:$0xff] %vm3351_vm7, %v3282_v53 }
 0x27d   :  { %3370 = vst.msk [vmem:[#allocation2 + $0x1b0] sm:$0xff] %vm3351_vm7, %v3280_v4  ;;  %3521 = vrot.lane.b32.xlu1 %v2849_v12, %s6311_s13 }
 0x27e   :  { %3303 = vrot.lane.b32.xlu0 %v8635_v36, %s6309_s26  ;;  %v3739_v36 = vld [vmem:[#allocation2 + $0x120] sm:$0xff] }
 0x27f   :  { %v2985_v30 = vpop.permute.xlu1 %2984 }
 0x280   :  { %3069 = vst.msk [vmem:[#allocation2 + $0x240] sm:$0xff] %vm3044_vm5, %v2985_v30  ;;  %v3512_v3 = vpop.permute.xlu0 %3511 }
 0x281   :  { %3574 = vst.msk [vmem:[#allocation2 + $0x140] sm:$0xff] %vm3195_vm6, %v3512_v3  ;;  %3610 = vrot.lane.b32.xlu1 %v7433_v8, %s6309_s26 }
 0x282   :  { %3531 = vrot.lane.b32.xlu0 %v7413_v54, %s6311_s13 }
 0x283   :  { %v3284_v17 = vpop.permute.xlu1 %3283  ;;  %v3740_v5 = vld [vmem:[#allocation2 + $0x128] sm:$0xff] }
 0x284   :  { %3372 = vst.msk [vmem:[#allocation2 + $0x1e0] sm:$0xff] %vm3351_vm7, %v3284_v17  ;;  %3644 = vst.msk [vmem:[#allocation2 + $0x140] sm:$0xff] %vm3351_vm7, %v3284_v17  ;;  %v2987_v50 = vpop.permute.xlu0 %2986  ;;  %4086 = vmatprep.mubr.f32.mxu1 %v3740_v5  ;;  %v3760_v16 = vld [vmem:[#allocation2 + $0x1c8] sm:$0xff] }
 0x285   :  { %3070 = vst.msk [vmem:[#allocation2 + $0x258] sm:$0xff] %vm3044_vm5, %v2987_v50  ;;  %3477 = vst.msk [vmem:[#allocation2 + $0x1b8] sm:$0xff] %vm3044_vm5, %v2987_v50  ;;  %3438 = vrot.lane.b32.xlu1 %v2850_v48, %s6310_s29  ;;  %4087 = vmatmul.mubr.f32.gmra.mrb[76].mxu1 %v3739_v36  ;;  %v3757_v48 = vld [vmem:[#allocation2 + $0x1b0] sm:$0xff] }
 0x286   :  { %3440 = vrot.lane.b32.xlu0 %v2851_v26, %s6310_s29 }
 0x287   :  { %v3136_v19 = vpop.permute.xlu1 %3135 }
 0x288   :  { %3220 = vst.msk [vmem:[#allocation2 + $0x240] sm:$0xff] %vm3195_vm6, %v3136_v19  ;;  %3575 = vst.msk [vmem:[#allocation2 + $0x158] sm:$0xff] %vm3195_vm6, %v3136_v19  ;;  %v3286_v54 = vpop.permute.xlu0 %3285 }
 0x289   :  { %3373 = vst.msk [vmem:[#allocation2 + $0x1f8] sm:$0xff] %vm3351_vm7, %v3286_v54  ;;  %3645 = vst.msk [vmem:[#allocation2 + $0x158] sm:$0xff] %vm3351_vm7, %v3286_v54  ;;  %3311 = vrot.lane.b32.xlu1 %v2851_v26, %s6309_s26 }
 0x28a   :  { %3612 = vrot.lane.b32.xlu0 %v7475_v56, %s6309_s26 }
 0x28b   :  { %v2989_v2 = vpop.permute.xlu1 %2988  ;;  %v3743_v23 = vld [vmem:[#allocation2 + $0x140] sm:$0xff] }
 0x28c   :  { %3071 = vst.msk [vmem:[#allocation2 + $0x270] sm:$0xff] %vm3044_vm5, %v2989_v2  ;;  %3478 = vst.msk [vmem:[#allocation2 + $0x1d0] sm:$0xff] %vm3044_vm5, %v2989_v2  ;;  %v3138_v31 = vpop.permute.xlu0 %3137  ;;  %4091 = vmatprep.mubr.f32.mxu1 %v3743_v23  ;;  %v3763_v20 = vld [vmem:[#allocation2 + $0x1e0] sm:$0xff] }
 0x28d   :  { %3221 = vst.msk [vmem:[#allocation2 + $0x258] sm:$0xff] %vm3195_vm6, %v3138_v31  ;;  %3576 = vst.msk [vmem:[#allocation2 + $0x170] sm:$0xff] %vm3195_vm6, %v3138_v31  ;;  %3525 = vrot.lane.b32.xlu1 %v2851_v26, %s6311_s13  ;;  %4092 = vmatmul.mubr.f32.gmra.mrb[78].mxu1 %v3742_v59 }
 0x28e   :  { %3535 = vrot.lane.b32.xlu0 %v7475_v56, %s6311_s13 }
 0x28f   :  { %v3288_v52 = vpop.permute.xlu1 %3287 }
 0x290   :  { %3374 = vst.msk [vmem:[#allocation2 + $0x210] sm:$0xff] %vm3351_vm7, %v3288_v52  ;;  %3646 = vst.msk [vmem:[#allocation2 + $0x170] sm:$0xff] %vm3351_vm7, %v3288_v52  ;;  %v2991_v24 = vpop.permute.xlu0 %2990  ;;  %v3746_v57 = vld [vmem:[#allocation2 + $0x158] sm:$0xff] }
 0x291   :  { %3072 = vst.msk [vmem:[#allocation2 + $0x288] sm:$0xff] %vm3044_vm5, %v2991_v24  ;;  %3479 = vst.msk [vmem:[#allocation2 + $0x1e8] sm:$0xff] %vm3044_vm5, %v2991_v24  ;;  %3313 = vrot.lane.b32.xlu1 %v8699_v55, %s6309_s26  ;;  %4096 = vmatprep.mubr.f32.mxu1 %v3746_v57  ;;  %v3766_v10 = vld [vmem:[#allocation2 + $0x1f8] sm:$0xff] }
 0x292   :  { %3444 = vrot.lane.b32.xlu0 %v7172_v32, %s6310_s29  ;;  %4097 = vmatmul.mubr.f32.gmra.mrb[80].mxu1 %v3745_v29 }
 0x293   :  { %v3140_v56 = vpop.permute.xlu1 %3139 }
 0x294   :  { %3222 = vst.msk [vmem:[#allocation2 + $0x270] sm:$0xff] %vm3195_vm6, %v3140_v56  ;;  %3577 = vst.msk [vmem:[#allocation2 + $0x188] sm:$0xff] %vm3195_vm6, %v3140_v56  ;;  %v2995_v12 = vpop.permute.xlu0 %2994 }
 0x295   :  { %3074 = vst.msk [vmem:[#allocation2 + $0x2b8] sm:$0xff] %vm3044_vm5, %v2995_v12  ;;  %3481 = vst.msk [vmem:[#allocation2 + $0x218] sm:$0xff] %vm3044_vm5, %v2995_v12  ;;  %3527 = vrot.lane.b32.xlu1 %v8699_v55, %s6311_s13 }
 0x296   :  { %3155 = vrot.lane.b32.xlu0 %v8594_v21, %s6311_s13 }
 0x297   :  { %v3290_v41 = vpop.permute.xlu1 %3289  ;;  %v3749_v25 = vld [vmem:[#allocation2 + $0x170] sm:$0xff] }
 0x298   :  { %3375 = vst.msk [vmem:[#allocation2 + $0x228] sm:$0xff] %vm3351_vm7, %v3290_v41  ;;  %3647 = vst.msk [vmem:[#allocation2 + $0x188] sm:$0xff] %vm3351_vm7, %v3290_v41  ;;  %v3144_v32 = vpop.permute.xlu0 %3143  ;;  %4101 = vmatprep.mubr.f32.mxu1 %v3749_v25  ;;  %v3769_v5 = vld [vmem:[#allocation2 + $0x210] sm:$0xff] }
 0x299   :  { %3533 = vrot.lane.b32.xlu1 %v7433_v8, %s6311_s13  ;;  %4102 = vmatmul.mubr.f32.gmra.mrb[82].mxu1 %v3748_v7 }
 0x29a   :  { %3446 = vrot.lane.b32.xlu0 %v7199_v1, %s6310_s29 }
 0x29b   :  { %v3142_v39 = vpop.permute.xlu1 %3141 }
 0x29c   :  { %3223 = vst.msk [vmem:[#allocation2 + $0x288] sm:$0xff] %vm3195_vm6, %v3142_v39  ;;  %3578 = vst.msk [vmem:[#allocation2 + $0x1a0] sm:$0xff] %vm3195_vm6, %v3142_v39  ;;  %v3433_v21 = vpop.permute.xlu0 %3432 }
 0x29d   :  { %3482 = vst.msk [vmem:[#allocation2 + $0x230] sm:$0xff] %vm3044_vm5, %v3433_v21  ;;  %3614 = vrot.lane.b32.xlu1 %v7509_v43, %s6309_s26 }
 0x29e   :  { %3157 = vrot.lane.b32.xlu0 %v8614_v28, %s6311_s13 }
 0x29f   :  { %v2993_v62 = vpop.permute.xlu1 %2992  ;;  %v3752_v8 = vld [vmem:[#allocation2 + $0x188] sm:$0xff] }
 0x2a0   :  { %3073 = vst.msk [vmem:[#allocation2 + $0x2a0] sm:$0xff] %vm3044_vm5, %v2993_v62  ;;  %3480 = vst.msk [vmem:[#allocation2 + $0x200] sm:$0xff] %vm3044_vm5, %v2993_v62  ;;  %v3146_v1 = vpop.permute.xlu0 %3145  ;;  %4106 = vmatprep.mubr.f32.mxu1 %v3752_v8 }
 0x2a1   :  { %3224 = vst.msk [vmem:[#allocation2 + $0x2a0] sm:$0xff] %vm3195_vm6, %v3144_v32  ;;  %3225 = vst.msk [vmem:[#allocation2 + $0x2b8] sm:$0xff] %vm3195_vm6, %v3146_v1  ;;  %3537 = vrot.lane.b32.xlu1 %v7509_v43, %s6311_s13  ;;  %4107 = vmatmul.mubr.f32.gmra.mrb[84].mxu1 %v3751_v9 }
 0x2a3   :  { %v3603_v46 = vpop.permute.xlu1 %3602 }
 0x2a4   :  { %3648 = vst.msk [vmem:[#allocation2 + $0x1a0] sm:$0xff] %vm3351_vm7, %v3603_v46 }
 0x2a5   :  { %3442 = vrot.lane.b32.xlu1 %v8699_v55, %s6310_s29 }
 0x2a9   :  { %3616 = vrot.lane.b32.xlu1 %v7532_v34, %s6309_s26 }
 0x2ab   :  { %v3755_v28 = vld [vmem:[#allocation2 + $0x1a0] sm:$0xff] }
 0x2ac   :  { %4111 = vmatprep.mubr.f32.mxu1 %v3755_v28 }
 0x2ad   :  { %3539 = vrot.lane.b32.xlu1 %v7532_v34, %s6311_s13  ;;  %4112 = vmatmul.mubr.f32.gmra.mrb[86].mxu1 %v3754_v45 }
 0x2b1   :  { %3618 = vrot.lane.b32.xlu1 %v7550_v58, %s6309_s26 }
 0x2b7   :  { %v3514_v43 = vpop.permute.xlu0 %3513 }
 0x2b8   :  { %3579 = vst.msk [vmem:[#allocation2 + $0x1b8] sm:$0xff] %vm3195_vm6, %v3514_v43 }
 0x2bb   :  { %v3294_v11 = vpop.permute.xlu1 %3293  ;;  %v3292_v33 = vpop.permute.xlu0 %3291 }
 0x2bc   :  { %3377 = vst.msk [vmem:[#allocation2 + $0x258] sm:$0xff] %vm3351_vm7, %v3294_v11  ;;  %3649 = vst.msk [vmem:[#allocation2 + $0x1b8] sm:$0xff] %vm3351_vm7, %v3294_v11 }
 0x2bd   :  { %3376 = vst.msk [vmem:[#allocation2 + $0x240] sm:$0xff] %vm3351_vm7, %v3292_v33 }
 0x2bf   :  { %v2997_v15 = vpop.permute.xlu1 %2996  ;;  %v3516_v47 = vpop.permute.xlu0 %3515 }
 0x2c0   :  { %3075 = vst.msk [vmem:[#allocation2 + $0x2d0] sm:$0xff] %vm3044_vm5, %v2997_v15 }
 0x2c1   :  { %3580 = vst.msk [vmem:[#allocation2 + $0x1d0] sm:$0xff] %vm3195_vm6, %v3516_v47 }
 0x2c3   :  { %v3296_v34 = vpop.permute.xlu1 %3295  ;;  %v2999_v38 = vpop.permute.xlu0 %2998  ;;  %v3758_v58 = vld [vmem:[#allocation2 + $0x1b8] sm:$0xff] }
 0x2c4   :  { %3378 = vst.msk [vmem:[#allocation2 + $0x270] sm:$0xff] %vm3351_vm7, %v3296_v34  ;;  %3650 = vst.msk [vmem:[#allocation2 + $0x1d0] sm:$0xff] %vm3351_vm7, %v3296_v34  ;;  %4116 = vmatprep.mubr.f32.mxu1 %v3758_v58  ;;  %v3775_v12 = vld [vmem:[#allocation2 + $0x240] sm:$0xff]  ;;  %v3778_v7 = vld [vmem:[#allocation2 + $0x258] sm:$0xff] }
 0x2c5   :  { %3076 = vst.msk [vmem:[#allocation2 + $0x2e8] sm:$0xff] %vm3044_vm5, %v2999_v38  ;;  %3483 = vst.msk [vmem:[#allocation2 + $0x248] sm:$0xff] %vm3044_vm5, %v2999_v38  ;;  %4117 = vmatmul.mubr.f32.gmra.mrb[88].mxu1 %v3757_v48 }
 0x2c7   :  { %v3148_v61 = vpop.permute.xlu1 %3147  ;;  %v3298_v6 = vpop.permute.xlu0 %3297 }
 0x2c8   :  { %3226 = vst.msk [vmem:[#allocation2 + $0x2d0] sm:$0xff] %vm3195_vm6, %v3148_v61  ;;  %3581 = vst.msk [vmem:[#allocation2 + $0x1e8] sm:$0xff] %vm3195_vm6, %v3148_v61 }
 0x2c9   :  { %3379 = vst.msk [vmem:[#allocation2 + $0x288] sm:$0xff] %vm3351_vm7, %v3298_v6  ;;  %3651 = vst.msk [vmem:[#allocation2 + $0x1e8] sm:$0xff] %vm3351_vm7, %v3298_v6 }
 0x2cb   :  { %v3001_v37 = vpop.permute.xlu1 %3000  ;;  %v3761_v63 = vld [vmem:[#allocation2 + $0x1d0] sm:$0xff]  ;;  %v3150_v0 = vpop.permute.xlu0 %3149 }
 0x2cc   :  { %3077 = vst.msk [vmem:[#allocation2 + $0x300] sm:$0xff] %vm3044_vm5, %v3001_v37  ;;  %3484 = vst.msk [vmem:[#allocation2 + $0x260] sm:$0xff] %vm3044_vm5, %v3001_v37  ;;  %4121 = vmatprep.mubr.f32.mxu1 %v3761_v63  ;;  %v3781_v1 = vld [vmem:[#allocation2 + $0x270] sm:$0xff] }
 0x2cd   :  { %3227 = vst.msk [vmem:[#allocation2 + $0x2e8] sm:$0xff] %vm3195_vm6, %v3150_v0  ;;  %3582 = vst.msk [vmem:[#allocation2 + $0x200] sm:$0xff] %vm3195_vm6, %v3150_v0  ;;  %4122 = vmatmul.mubr.f32.gmra.mrb[90].mxu1 %v3760_v16 }
 0x2cf   :  { %v3300_v35 = vpop.permute.xlu1 %3299 }
 0x2d0   :  { %3380 = vst.msk [vmem:[#allocation2 + $0x2a0] sm:$0xff] %vm3351_vm7, %v3300_v35  ;;  %3652 = vst.msk [vmem:[#allocation2 + $0x200] sm:$0xff] %vm3351_vm7, %v3300_v35  ;;  %v3003_v13 = vpop.permute.xlu0 %3002  ;;  %v3764_v18 = vld [vmem:[#allocation2 + $0x1e8] sm:$0xff] }
 0x2d1   :  { %3078 = vst.msk [vmem:[#allocation2 + $0x318] sm:$0xff] %vm3044_vm5, %v3003_v13  ;;  %3485 = vst.msk [vmem:[#allocation2 + $0x278] sm:$0xff] %vm3044_vm5, %v3003_v13  ;;  %4126 = vmatprep.mubr.f32.mxu1 %v3764_v18  ;;  %v3784_v47 = vld [vmem:[#allocation2 + $0x288] sm:$0xff] }
 0x2d2   :  { %4127 = vmatmul.mubr.f32.gmra.mrb[92].mxu1 %v3763_v20 }
 0x2d3   :  { %v3152_v26 = vpop.permute.xlu1 %3151 }
 0x2d4   :  { %3228 = vst.msk [vmem:[#allocation2 + $0x300] sm:$0xff] %vm3195_vm6, %v3152_v26  ;;  %3583 = vst.msk [vmem:[#allocation2 + $0x218] sm:$0xff] %vm3195_vm6, %v3152_v26  ;;  %v3007_v49 = vpop.permute.xlu0 %3006 }
 0x2d5   :  { %3080 = vst.msk [vmem:[#allocation2 + $0x348] sm:$0xff] %vm3044_vm5, %v3007_v49  ;;  %3487 = vst.msk [vmem:[#allocation2 + $0x2a8] sm:$0xff] %vm3044_vm5, %v3007_v49 }
 0x2d7   :  { %v3302_v14 = vpop.permute.xlu1 %3301  ;;  %v3767_v51 = vld [vmem:[#allocation2 + $0x200] sm:$0xff] }
 0x2d8   :  { %3381 = vst.msk [vmem:[#allocation2 + $0x2b8] sm:$0xff] %vm3351_vm7, %v3302_v14  ;;  %3653 = vst.msk [vmem:[#allocation2 + $0x218] sm:$0xff] %vm3351_vm7, %v3302_v14  ;;  %v3435_v27 = vpop.permute.xlu0 %3434  ;;  %4131 = vmatprep.mubr.f32.mxu1 %v3767_v51  ;;  %v3787_v63 = vld [vmem:[#allocation2 + $0x2a0] sm:$0xff] }
 0x2d9   :  { %3488 = vst.msk [vmem:[#allocation2 + $0x2c0] sm:$0xff] %vm3044_vm5, %v3435_v27  ;;  %v8813_v55 = vpop.f32.mrb[52].mxu1  ;;  %4132 = vmatmul.mubr.f32.gmra.mrb[94].mxu1 %v3766_v10 }
 0x2da   :  { %v4030_v60 = vpop.f32.mrb[53].mxu1 }
 0x2db   :  { %v3154_v53 = vpop.permute.xlu1 %3153 }
 0x2dc   :  { %3229 = vst.msk [vmem:[#allocation2 + $0x318] sm:$0xff] %vm3195_vm6, %v3154_v53  ;;  %3584 = vst.msk [vmem:[#allocation2 + $0x230] sm:$0xff] %vm3195_vm6, %v3154_v53  ;;  %v3518_v4 = vpop.permute.xlu0 %3517 }
 0x2dd   :  { %3585 = vst.msk [vmem:[#allocation2 + $0x248] sm:$0xff] %vm3195_vm6, %v3518_v4 }
 0x2df   :  { %v3005_v30 = vpop.permute.xlu1 %3004  ;;  %v3770_v3 = vld [vmem:[#allocation2 + $0x218] sm:$0xff] }
 0x2e0   :  { %3079 = vst.msk [vmem:[#allocation2 + $0x330] sm:$0xff] %vm3044_vm5, %v3005_v30  ;;  %3486 = vst.msk [vmem:[#allocation2 + $0x290] sm:$0xff] %vm3044_vm5, %v3005_v30  ;;  %v3520_v17 = vpop.permute.xlu0 %3519  ;;  %4136 = vmatprep.mubr.f32.mxu1 %v3770_v3  ;;  %v3790_v13 = vld [vmem:[#allocation2 + $0x2b8] sm:$0xff] }
 0x2e1   :  { %3586 = vst.msk [vmem:[#allocation2 + $0x260] sm:$0xff] %vm3195_vm6, %v3520_v17  ;;  %v8821_v50 = vpop.f32.mrb[54].mxu1  ;;  %4137 = vmatmul.mubr.f32.gmra.mrb[96].mxu1 %v3769_v5 }
 0x2e2   :  { %v4035_v36 = vpop.f32.mrb[55].mxu1 }
 0x2e3   :  { %v3605_v19 = vpop.permute.xlu1 %3604 }
 0x2e4   :  { %3654 = vst.msk [vmem:[#allocation2 + $0x230] sm:$0xff] %vm3351_vm7, %v3605_v19  ;;  %v3437_v54 = vpop.permute.xlu0 %3436 }
 0x2e5   :  { %3489 = vst.msk [vmem:[#allocation2 + $0x2d8] sm:$0xff] %vm3044_vm5, %v3437_v54 }
 0x2e6   :  { %3591 = vst.msk [vmem:[#allocation2 + $0x2d8] sm:$0xff] %vm3195_vm6, %v8117_v40  ;;  %v3772_v40 = vld [vmem:[#allocation2 + $0x228] sm:$0xff] }
 0x2e7   :  { %3661 = vst.msk [vmem:[#allocation2 + $0x2d8] sm:$0xff] %vm3351_vm7, %v8101_v42  ;;  %v3306_v2 = vpop.permute.xlu1 %3305 }
 0x2e8   :  { %3383 = vst.msk [vmem:[#allocation2 + $0x2e8] sm:$0xff] %vm3351_vm7, %v3306_v2  ;;  %3655 = vst.msk [vmem:[#allocation2 + $0x248] sm:$0xff] %vm3351_vm7, %v3306_v2  ;;  %v3310_v23 = vpop.permute.xlu0 %3309 }
 0x2e9   :  { %3385 = vst.msk [vmem:[#allocation2 + $0x318] sm:$0xff] %vm3351_vm7, %v3310_v23 }
 0x2eb   :  { %v3308_v31 = vpop.permute.xlu1 %3307  ;;  %v3773_v59 = vld [vmem:[#allocation2 + $0x230] sm:$0xff] }
 0x2ec   :  { %3384 = vst.msk [vmem:[#allocation2 + $0x300] sm:$0xff] %vm3351_vm7, %v3308_v31  ;;  %3656 = vst.msk [vmem:[#allocation2 + $0x260] sm:$0xff] %vm3351_vm7, %v3308_v31  ;;  %v3524_v52 = vpop.permute.xlu0 %3523  ;;  %4141 = vmatprep.mubr.f32.mxu1 %v3773_v59  ;;  %v3708_v59 = vld [vmem:[#allocation2 + $0x28] sm:$0xff] }
 0x2ed   :  { %3588 = vst.msk [vmem:[#allocation2 + $0x290] sm:$0xff] %vm3195_vm6, %v3524_v52  ;;  %4142 = vmatmul.mubr.f32.gmra.mrb[98].mxu1 %v3772_v40  ;;  %v3711_v40 = vld [vmem:[#allocation2 + $0x40] sm:$0xff] }
 0x2ee   :  { %v3794_v20 = vld [vmem:[#allocation2 + $0x2d8] sm:$0xff] }
 0x2ef   :  { %v8835_v42 = vpop.f32.mrb[56].mxu1  ;;  %v3522_v57 = vpop.permute.xlu1 %3521  ;;  %v3776_v29 = vld [vmem:[#allocation2 + $0x248] sm:$0xff] }
 0x2f0   :  { %v4040_v24 = vpop.f32.mrb[57].mxu1  ;;  %3587 = vst.msk [vmem:[#allocation2 + $0x278] sm:$0xff] %vm3195_vm6, %v3522_v57  ;;  %v3304_v56 = vpop.permute.xlu0 %3303  ;;  %4146 = vmatprep.mubr.f32.mxu1 %v3776_v29  ;;  %v3796_v27 = vld [vmem:[#allocation2 + $0x2e8] sm:$0xff]  ;;  %v3802_v3 = vld [vmem:[#allocation2 + $0x318] sm:$0xff] }
 0x2f1   :  { %3657 = vst.msk [vmem:[#allocation2 + $0x278] sm:$0xff] %vm3351_vm7, %v3310_v23  ;;  %3382 = vst.msk [vmem:[#allocation2 + $0x2d0] sm:$0xff] %vm3351_vm7, %v3304_v56  ;;  %4147 = vmatmul.mubr.f32.gmra.mrb[100].mxu1 %v3775_v12  ;;  %v3705_v23 = vld [vmem:[#allocation2 + $0x10] sm:$0xff]  ;;  %v3714_v57 = vld [vmem:[#allocation2 + $0x58] sm:$0xff] }
 0x2f2   :  { %v3717_v56 = vld [vmem:[#allocation2 + $0x70] sm:$0xff] }
 0x2f3   :  { %v3611_v41 = vpop.permute.xlu1 %3610  ;;  %v3779_v25 = vld [vmem:[#allocation2 + $0x260] sm:$0xff] }
 0x2f4   :  { %v3532_v32 = vpop.permute.xlu0 %3531  ;;  %4151 = vmatprep.mubr.f32.mxu1 %v3779_v25  ;;  %v3799_v53 = vld [vmem:[#allocation2 + $0x300] sm:$0xff] }
 0x2f5   :  { %4152 = vmatmul.mubr.f32.gmra.mrb[102].mxu1 %v3778_v7 }
 0x2f7   :  { %v3439_v39 = vpop.permute.xlu1 %3438 }
 0x2f8   :  { %3490 = vst.msk [vmem:[#allocation2 + $0x2f0] sm:$0xff] %vm3044_vm5, %v3439_v39  ;;  %v3441_v21 = vpop.permute.xlu0 %3440  ;;  %v3782_v62 = vld [vmem:[#allocation2 + $0x278] sm:$0xff]  ;;  %v3793_v49 = vld [vmem:[#allocation2 + $0x2d0] sm:$0xff] }
 0x2f9   :  { %3592 = vst.msk [vmem:[#allocation2 + $0x2f0] sm:$0xff] %vm3195_vm6, %v3532_v32  ;;  %4156 = vmatprep.mubr.f32.mxu1 %v3782_v62  ;;  %v3723_v32 = vld [vmem:[#allocation2 + $0xa0] sm:$0xff]  ;;  %v3726_v39 = vld [vmem:[#allocation2 + $0xb8] sm:$0xff]  ;;  %v3729_v62 = vld [vmem:[#allocation2 + $0xd0] sm:$0xff] }
 0x2fa   :  { %3491 = vst.msk [vmem:[#allocation2 + $0x308] sm:$0xff] %vm3044_vm5, %v3441_v21  ;;  %v8843_v8 = vpop.f32.mrb[58].mxu1  ;;  %4157 = vmatmul.mubr.f32.gmra.mrb[104].mxu1 %v3781_v1 }
 0x2fb   :  { %3662 = vst.msk [vmem:[#allocation2 + $0x2f0] sm:$0xff] %vm3351_vm7, %v3611_v41  ;;  %v4045_v9 = vpop.f32.mrb[59].mxu1  ;;  %v3312_v46 = vpop.permute.xlu1 %3311  ;;  %v3720_v41 = vld [vmem:[#allocation2 + $0x88] sm:$0xff] }
 0x2fc   :  { %3658 = vst.msk [vmem:[#allocation2 + $0x290] sm:$0xff] %vm3351_vm7, %v3312_v46  ;;  %v3613_v28 = vpop.permute.xlu0 %3612  ;;  %v3732_v9 = vld [vmem:[#allocation2 + $0xe8] sm:$0xff] }
 0x2ff   :  { %v3526_v45 = vpop.permute.xlu1 %3525 }
 0x300   :  { %3589 = vst.msk [vmem:[#allocation2 + $0x2a8] sm:$0xff] %vm3195_vm6, %v3526_v45  ;;  %v3536_v43 = vpop.permute.xlu0 %3535  ;;  %v3741_v45 = vld [vmem:[#allocation2 + $0x130] sm:$0xff] }
 0x302   :  { %v3797_v14 = vld [vmem:[#allocation2 + $0x2f0] sm:$0xff] }
 0x303   :  { %v3314_v11 = vpop.permute.xlu1 %3313  ;;  %v3785_v33 = vld [vmem:[#allocation2 + $0x290] sm:$0xff] }
 0x304   :  { %3659 = vst.msk [vmem:[#allocation2 + $0x2a8] sm:$0xff] %vm3351_vm7, %v3314_v11  ;;  %v3445_v15 = vpop.permute.xlu0 %3444  ;;  %4161 = vmatprep.mubr.f32.mxu1 %v3785_v33 }
 0x305   :  { %3493 = vst.msk [vmem:[#allocation2 + $0x338] sm:$0xff] %vm3044_vm5, %v3445_v15  ;;  %v8850_v34 = vpop.f32.mrb[60].mxu1  ;;  %4162 = vmatmul.mubr.f32.gmra.mrb[106].mxu1 %v3784_v47  ;;  %v3747_v15 = vld [vmem:[#allocation2 + $0x160] sm:$0xff]  ;;  %v3750_v47 = vld [vmem:[#allocation2 + $0x178] sm:$0xff] }
 0x306   :  { %v4050_v38 = vpop.f32.mrb[61].mxu1 }
 0x307   :  { %v3528_v58 = vpop.permute.xlu1 %3527  ;;  %v3753_v38 = vld [vmem:[#allocation2 + $0x190] sm:$0xff] }
 0x308   :  { %3590 = vst.msk [vmem:[#allocation2 + $0x2c0] sm:$0xff] %vm3195_vm6, %v3528_v58  ;;  %v3156_v48 = vpop.permute.xlu0 %3155  ;;  %v3756_v58 = vld [vmem:[#allocation2 + $0x1a8] sm:$0xff] }
 0x309   :  { %3660 = vst.msk [vmem:[#allocation2 + $0x2c0] sm:$0xff] %vm3351_vm7, %v7875_v22 }
 0x30a   :  { %3230 = vst.msk [vmem:[#allocation2 + $0x330] sm:$0xff] %vm3195_vm6, %v3156_v48  ;;  %v3759_v48 = vld [vmem:[#allocation2 + $0x1c0] sm:$0xff] }
 0x30b   :  { %3386 = vst.msk [vmem:[#allocation2 + $0x330] sm:$0xff] %vm3351_vm7, %v3312_v46  ;;  %v3534_v61 = vpop.permute.xlu1 %3533  ;;  %v3788_v6 = vld [vmem:[#allocation2 + $0x2a8] sm:$0xff]  ;;  %v3735_v46 = vld [vmem:[#allocation2 + $0x100] sm:$0xff] }
 0x30c   :  { %3593 = vst.msk [vmem:[#allocation2 + $0x308] sm:$0xff] %vm3195_vm6, %v3534_v61  ;;  %v3447_v37 = vpop.permute.xlu0 %3446  ;;  %4166 = vmatprep.mubr.f32.mxu1 %v3788_v6  ;;  %v3762_v61 = vld [vmem:[#allocation2 + $0x1d8] sm:$0xff]  ;;  %v3765_v6 = vld [vmem:[#allocation2 + $0x1f0] sm:$0xff] }
 0x30d   :  { %3663 = vst.msk [vmem:[#allocation2 + $0x308] sm:$0xff] %vm3351_vm7, %v3613_v28  ;;  %4167 = vmatmul.mubr.f32.gmra.mrb[108].mxu1 %v3787_v63  ;;  %v3738_v28 = vld [vmem:[#allocation2 + $0x118] sm:$0xff]  ;;  %v3768_v63 = vld [vmem:[#allocation2 + $0x208] sm:$0xff] }
 0x30e   :  { %3494 = vst.msk [vmem:[#allocation2 + $0x350] sm:$0xff] %vm3044_vm5, %v3447_v37 }
 0x30f   :  { %v3615_v0 = vpop.permute.xlu1 %3614 }
 0x310   :  { %v3158_v16 = vpop.permute.xlu0 %3157  ;;  %v3791_v35 = vld [vmem:[#allocation2 + $0x2c0] sm:$0xff] }
 0x311   :  { %3231 = vst.msk [vmem:[#allocation2 + $0x348] sm:$0xff] %vm3195_vm6, %v3158_v16  ;;  %v8861_v22 = vpop.f32.mrb[62].mxu1  ;;  %4171 = vmatprep.mubr.f32.mxu1 %v3791_v35  ;;  %v3771_v16 = vld [vmem:[#allocation2 + $0x220] sm:$0xff]  ;;  %v3774_v35 = vld [vmem:[#allocation2 + $0x238] sm:$0xff] }
 0x312   :  { %3387 = vst.msk [vmem:[#allocation2 + $0x348] sm:$0xff] %vm3351_vm7, %v3314_v11  ;;  %v4055_v18 = vpop.f32.mrb[63].mxu1  ;;  %4172 = vmatmul.mubr.f32.gmra.mrb[110].mxu1 %v3790_v13  ;;  %v3805_v36 = vld [vmem:[#allocation2 + $0x330] sm:$0xff]  ;;  %v3744_v11 = vld [vmem:[#allocation2 + $0x148] sm:$0xff] }
 0x313   :  { %v3538_v26 = vpop.permute.xlu1 %3537  ;;  %4176 = vmatprep.mubr.f32.mxu1 %v3794_v20  ;;  %v3777_v13 = vld [vmem:[#allocation2 + $0x250] sm:$0xff]  ;;  %v3780_v20 = vld [vmem:[#allocation2 + $0x268] sm:$0xff] }
 0x314   :  { %3595 = vst.msk [vmem:[#allocation2 + $0x338] sm:$0xff] %vm3195_vm6, %v3538_v26  ;;  %v3800_v10 = vld [vmem:[#allocation2 + $0x308] sm:$0xff] }
 0x316   :  { %4177 = vmatmul.mubr.f32.gmra.mrb[112].mxu1 %v3793_v49  ;;  %v3783_v49 = vld [vmem:[#allocation2 + $0x280] sm:$0xff] }
 0x317   :  { %v3443_v51 = vpop.permute.xlu1 %3442  ;;  %4181 = vmatprep.mubr.f32.mxu1 %v3797_v14  ;;  %v3786_v14 = vld [vmem:[#allocation2 + $0x298] sm:$0xff] }
 0x318   :  { %3492 = vst.msk [vmem:[#allocation2 + $0x320] sm:$0xff] %vm3044_vm5, %v3443_v51 }
 0x319   :  { %3594 = vst.msk [vmem:[#allocation2 + $0x320] sm:$0xff] %vm3195_vm6, %v3536_v43  ;;  %v3808_v54 = vld [vmem:[#allocation2 + $0x348] sm:$0xff] }
 0x31a   :  { %3664 = vst.msk [vmem:[#allocation2 + $0x320] sm:$0xff] %vm3351_vm7, %v3615_v0  ;;  %4182 = vmatmul.mubr.f32.gmra.mrb[114].mxu1 %v3796_v27  ;;  %v3789_v27 = vld [vmem:[#allocation2 + $0x2b0] sm:$0xff] }
 0x31b   :  { %v3617_v60 = vpop.permute.xlu1 %3616  ;;  %4186 = vmatprep.mubr.f32.mxu1 %v3800_v10 }
 0x31c   :  { %3665 = vst.msk [vmem:[#allocation2 + $0x338] sm:$0xff] %vm3351_vm7, %v3617_v60  ;;  %v3792_v60 = vld [vmem:[#allocation2 + $0x2c8] sm:$0xff] }
 0x31e   :  { %4187 = vmatmul.mubr.f32.gmra.mrb[116].mxu1 %v3799_v53  ;;  %v3795_v53 = vld [vmem:[#allocation2 + $0x2e0] sm:$0xff] }
 0x31f   :  { %v3540_v4 = vpop.permute.xlu1 %3539 }
 0x320   :  { %3596 = vst.msk [vmem:[#allocation2 + $0x350] sm:$0xff] %vm3195_vm6, %v3540_v4 }
 0x321   :  { %v3803_v30 = vld [vmem:[#allocation2 + $0x320] sm:$0xff] }
 0x322   :  { %4191 = vmatprep.mubr.f32.mxu1 %v3803_v30  ;;  %v3798_v30 = vld [vmem:[#allocation2 + $0x2f8] sm:$0xff] }
 0x323   :  { %v3619_v17 = vpop.permute.xlu1 %3618  ;;  %4192 = vmatmul.mubr.f32.gmra.mrb[118].mxu1 %v3802_v3  ;;  %v3806_v5 = vld [vmem:[#allocation2 + $0x338] sm:$0xff] }
 0x324   :  { %3666 = vst.msk [vmem:[#allocation2 + $0x350] sm:$0xff] %vm3351_vm7, %v3619_v17  ;;  %4196 = vmatprep.mubr.f32.mxu1 %v3806_v5  ;;  %v3801_v17 = vld [vmem:[#allocation2 + $0x310] sm:$0xff]  ;;  %v3804_v5 = vld [vmem:[#allocation2 + $0x328] sm:$0xff] }
 0x327   :  { %4197 = vmatmul.mubr.f32.gmra.mrb[120].mxu1 %v3805_v36  ;;  %v3807_v36 = vld [vmem:[#allocation2 + $0x340] sm:$0xff] }
 0x32b   :  { %v3809_v19 = vld [vmem:[#allocation2 + $0x350] sm:$0xff] }
 0x32c   :  { %4201 = vmatprep.mubr.f32.mxu1 %v3809_v19 }
 0x32d   :  { %4202 = vmatmul.mubr.f32.gmra.mrb[122].mxu1 %v3808_v54  ;;  %v3810_v54 = vld [vmem:[#allocation2 + $0x358] sm:$0xff] }
 0x32e   :  { %6026 = vmatprep.mubr.msk.f32.mxu1 %vm2863_vm4, %v3705_v23 }
 0x32f   :  { %v8871_v2 = vpop.f32.mrb[64].mxu1 }
 0x330   :  { %v4060_v31 = vpop.f32.mrb[65].mxu1 }
 0x331   :  { %6027 = vmatmul.mubr.msk.f32.vlgmr.msra.gmra.mrb[124].mxu1 %vm2863_vm4, %v3708_v59 }
 0x332   :  { %6029 = vmatprep.mubr.msk.f32.mxu1 %vm2863_vm4, %v3711_v40 }
 0x333   :  { %v8874_v52 = vpop.f32.mrb[66].mxu1 }
 0x334   :  { %v4065_v24 = vpop.f32.mrb[67].mxu1 }
 0x335   :  { %6030 = vmatmul.mubr.msk.f32.gmra.mrb[126].mxu1 %vm2863_vm4, %v3714_v57 }
 0x336   :  { %6032 = vmatprep.mubr.msk.f32.mxu1 %vm2863_vm4, %v3717_v56 }
 0x337   :  { %v8878_v29 = vpop.f32.mrb[68].mxu1 }
 0x338   :  { %v4070_v12 = vpop.f32.mrb[69].mxu1 }
 0x339   :  { %6033 = vmatmul.mubr.msk.f32.gmra.mrb[128].mxu1 %vm2863_vm4, %v3720_v41 }
 0x33a   :  { %6035 = vmatprep.mubr.msk.f32.mxu1 %vm2863_vm4, %v3723_v32 }
 0x33b   :  { %v8882_v25 = vpop.f32.mrb[70].mxu1 }
 0x33c   :  { %v4075_v7 = vpop.f32.mrb[71].mxu1 }
 0x33d   :  { %6036 = vmatmul.mubr.msk.f32.gmra.mrb[130].mxu1 %vm2863_vm4, %v3726_v39 }
 0x33e   :  { %6038 = vmatprep.mubr.msk.f32.mxu1 %vm2863_vm4, %v3729_v62 }
 0x33f   :  { %v8886_v21 = vpop.f32.mrb[72].mxu1 }
 0x340   :  { %v4080_v1 = vpop.f32.mrb[73].mxu1 }
 0x341   :  { %6039 = vmatmul.mubr.msk.f32.gmra.mrb[132].mxu1 %vm2863_vm4, %v3732_v9 }
 0x342   :  { %6041 = vmatprep.mubr.msk.f32.mxu1 %vm2863_vm4, %v3735_v46 }
 0x345   :  { %6042 = vmatmul.mubr.msk.f32.gmra.mrb[134].mxu1 %vm2863_vm4, %v3738_v28 }
 0x346   :  { %6044 = vmatprep.mubr.msk.f32.mxu1 %vm2863_vm4, %v3741_v45 }
 0x348   :  { %v8894_v43 = vpop.f32.mrb[74].mxu1 }
 0x349   :  { %v4085_v33 = vpop.f32.mrb[75].mxu1  ;;  %6045 = vmatmul.mubr.msk.f32.gmra.mrb[136].mxu1 %vm2863_vm4, %v3744_v11 }
 0x34a   :  { %6047 = vmatprep.mubr.msk.f32.mxu1 %vm2863_vm4, %v3747_v15 }
 0x34d   :  { %6048 = vmatmul.mubr.msk.f32.gmra.mrb[138].mxu1 %vm2863_vm4, %v3750_v47  ;;  %v4563_v47 = vld [vmem:[%s9355_s5 + $0x80] sm:$0xff] }
 0x34e   :  { %6050 = vmatprep.mubr.msk.f32.mxu1 %vm2863_vm4, %v3753_v38  ;;  %v4564_v38 = vld [vmem:[%s9355_s5 + $0x88] sm:$0xff] }
 0x351   :  { %6051 = vmatmul.mubr.msk.f32.gmra.mrb[140].mxu1 %vm2863_vm4, %v3756_v58  ;;  %v4547_v58 = vld [vmem:[%s9355_s5] sm:$0xff] }
 0x352   :  { %6053 = vmatprep.mubr.msk.f32.mxu1 %vm2863_vm4, %v3759_v48  ;;  %v6196_v48 = vpack.c.bf16 %v4564_v38, %v4563_v47 }
 0x354   :  { %6197 = vmatprep.subr.bf16.mxu1 %v6196_v48 }
 0x355   :  { %6054 = vmatmul.mubr.msk.f32.gmra.mrb[142].mxu1 %vm2863_vm4, %v3762_v61  ;;  %v4548_v61 = vld [vmem:[%s9355_s5 + $0x8] sm:$0xff] }
 0x356   :  { %6056 = vmatprep.mubr.msk.f32.mxu1 %vm2863_vm4, %v3765_v6  ;;  %v4565_v6 = vld [vmem:[%s9355_s5 + $0x90] sm:$0xff] }
 0x358   :  { %v8904_v37 = vpop.f32.mrb[76].mxu1 }
 0x359   :  { %v4090_v0 = vpop.f32.mrb[77].mxu1  ;;  %6057 = vmatmul.mubr.msk.f32.gmra.mrb[144].mxu1 %vm2863_vm4, %v3768_v63  ;;  %v4566_v63 = vld [vmem:[%s9355_s5 + $0x98] sm:$0xff] }
 0x35a   :  { %6059 = vmatprep.mubr.msk.f32.mxu1 %vm2863_vm4, %v3771_v16  ;;  %v6198_v0 = vpack.c.bf16 %v4548_v61, %v4547_v58  ;;  %v6200_v16 = vpack.c.bf16 %v4566_v63, %v4565_v6 }
 0x35c   :  { %6199 = vmatpush3.bf16.msra.mxu1 %v6198_v0 }
 0x35d   :  { %6060 = vmatmul.mubr.msk.f32.gmra.mrb[146].mxu1 %vm2863_vm4, %v3774_v35  ;;  %v4549_v35 = vld [vmem:[%s9355_s5 + $0x10] sm:$0xff]  ;;  %6201 = vmatprep.subr.bf16.mxu1 %v6200_v16 }
 0x35e   :  { %6062 = vmatprep.mubr.msk.f32.mxu1 %vm2863_vm4, %v3777_v13  ;;  %v4550_v13 = vld [vmem:[%s9355_s5 + $0x18] sm:$0xff] }
 0x360   :  { %v8910_v18 = vpop.f32.mrb[78].mxu1 }
 0x361   :  { %v4095_v26 = vpop.f32.mrb[79].mxu1  ;;  %6063 = vmatmul.mubr.msk.f32.gmra.mrb[148].mxu1 %vm2863_vm4, %v3780_v20  ;;  %v4567_v20 = vld [vmem:[%s9355_s5 + $0xa0] sm:$0xff] }
 0x362   :  { %6065 = vmatprep.mubr.msk.f32.mxu1 %vm2863_vm4, %v3783_v49  ;;  %v4568_v26 = vld [vmem:[%s9355_s5 + $0xa8] sm:$0xff]  ;;  %v6202_v49 = vpack.c.bf16 %v4550_v13, %v4549_v35 }
 0x364   :  { %6203 = vmatpush3.bf16.msra.mxu1 %v6202_v49 }
 0x365   :  { %v8914_v51 = vpop.f32.mrb[80].mxu1  ;;  %6066 = vmatmul.mubr.msk.f32.gmra.mrb[150].mxu1 %vm2863_vm4, %v3786_v14 }
 0x366   :  { %v4100_v10 = vpop.f32.mrb[81].mxu1  ;;  %6068 = vmatprep.mubr.msk.f32.mxu1 %vm2863_vm4, %v3789_v27  ;;  %v6204_v27 = vpack.c.bf16 %v4568_v26, %v4567_v20  ;;  %v9030_v20 = vld [vmem:[%s9356_s4] ss:$0 sm:$0xff] }
 0x367   :  { %v4551_v10 = vld [vmem:[%s9355_s5 + $0x20] sm:$0xff]  ;;  %v4034_v49 = vadd.f32 %v9030_v20, %v8821_v50  ;;  %v4054_v50 = vadd.f32 %v9030_v20, %v8861_v22  ;;  %v4573_v22 = vld [vmem:[%s9355_s5 + $0xd0] sm:$0xff] }
 0x368   :  { %6205 = vmatprep.subr.bf16.mxu1 %v6204_v27  ;;  %v4029_v27 = vadd.f32 %v9030_v20, %v8813_v55  ;;  %v4049_v55 = vadd.f32 %v9030_v20, %v8850_v34  ;;  %v4574_v34 = vld [vmem:[%s9355_s5 + $0xd8] sm:$0xff] }
 0x369   :  { %6069 = vmatmul.mubr.msk.f32.gmra.mrb[152].mxu1 %vm2863_vm4, %v3792_v60  ;;  %v4552_v60 = vld [vmem:[%s9355_s5 + $0x28] sm:$0xff] }
 0x36a   :  { %6071 = vmatprep.mubr.msk.f32.mxu1 %vm2863_vm4, %v3795_v53 }
 0x36c   :  { %v8920_v4 = vpop.f32.mrb[82].mxu1 }
 0x36d   :  { %v4105_v3 = vpop.f32.mrb[83].mxu1  ;;  %6072 = vmatmul.mubr.msk.f32.gmra.mrb[154].mxu1 %vm2863_vm4, %v3798_v30  ;;  %v4569_v30 = vld [vmem:[%s9355_s5 + $0xb0] sm:$0xff] }
 0x36e   :  { %6074 = vmatprep.mubr.msk.f32.mxu1 %vm2863_vm4, %v3801_v17  ;;  %v4570_v3 = vld [vmem:[%s9355_s5 + $0xb8] sm:$0xff]  ;;  %v6206_v17 = vpack.c.bf16 %v4552_v60, %v4551_v10 }
 0x370   :  { %6207 = vmatpush3.bf16.msra.mxu1 %v6206_v17  ;;  %v4039_v17 = vadd.f32 %v9030_v20, %v8835_v42  ;;  %v4059_v42 = vadd.f32 %v9030_v20, %v8871_v2  ;;  %v6216_v2 = vpack.c.bf16 %v4574_v34, %v4573_v22 }
 0x371   :  { %6075 = vmatmul.mubr.msk.f32.gmra.mrb[156].mxu1 %vm2863_vm4, %v3804_v5  ;;  %v6208_v5 = vpack.c.bf16 %v4570_v3, %v4569_v30  ;;  %v4044_v3 = vadd.f32 %v9030_v20, %v8843_v8  ;;  %v4064_v8 = vadd.f32 %v9030_v20, %v8874_v52  ;;  %v4074_v52 = vadd.f32 %v9030_v20, %v8882_v25  ;;  %v4559_v25 = vld [vmem:[%s9355_s5 + $0x60] sm:$0xff] }
 0x372   :  { %6077 = vmatprep.mubr.msk.f32.mxu1 %vm2863_vm4, %v3807_v36  ;;  %v4553_v36 = vld [vmem:[%s9355_s5 + $0x30] sm:$0xff] }
 0x373   :  { %6209 = vmatprep.subr.bf16.mxu1 %v6208_v5 }
 0x374   :  { %v8926_v19 = vpop.f32.mrb[84].mxu1 }
 0x375   :  { %v4110_v23 = vpop.f32.mrb[85].mxu1  ;;  %6078 = vmatmul.mubr.msk.f32.gmra.mrb[158].mxu1 %vm2863_vm4, %v3810_v54  ;;  %v4554_v54 = vld [vmem:[%s9355_s5 + $0x38] sm:$0xff] }
 0x376   :  { %v4571_v23 = vld [vmem:[%s9355_s5 + $0xc0] sm:$0xff] }
 0x380   :  { %v8929_v31 = vpop.f32.mrb[86].mxu1 }
 0x381   :  { %v4115_v59 = vpop.f32.mrb[87].mxu1 }
 0x382   :  { %v4572_v59 = vld [vmem:[%s9355_s5 + $0xc8] sm:$0xff] }
 0x398   :  { %v8931_v40 = vpop.f32.mrb[88].mxu1 }
 0x399   :  { %v4120_v24 = vpop.f32.mrb[89].mxu1 }
 0x39a   :  { %v6210_v24 = vpack.c.bf16 %v4554_v54, %v4553_v36 }
 0x39c   :  { %6211 = vmatpush3.bf16.msra.mxu1 %v6210_v24 }
 0x3a0   :  { %v8933_v57 = vpop.f32.mrb[90].mxu1 }
 0x3a1   :  { %v4125_v56 = vpop.f32.mrb[91].mxu1 }
 0x3a5   :  { %v8935_v12 = vpop.f32.mrb[92].mxu1 }
 0x3a6   :  { %v4130_v41 = vpop.f32.mrb[93].mxu1 }
 0x3a7   :  { %v6212_v41 = vpack.c.bf16 %v4572_v59, %v4571_v23 }
 0x3a9   :  { %6213 = vmatprep.subr.bf16.mxu1 %v6212_v41 }
 0x3ac   :  { %v8937_v32 = vpop.f32.mrb[94].mxu1 }
 0x3ad   :  { %v4135_v7 = vpop.f32.mrb[95].mxu1 }
 0x3ae   :  { %v4555_v7 = vld [vmem:[%s9355_s5 + $0x40] sm:$0xff] }
 0x3b4   :  { %v8939_v39 = vpop.f32.mrb[96].mxu1 }
 0x3b5   :  { %v4140_v62 = vpop.f32.mrb[97].mxu1 }
 0x3b6   :  { %v4556_v62 = vld [vmem:[%s9355_s5 + $0x48] sm:$0xff] }
 0x3c0   :  { %v8941_v1 = vpop.f32.mrb[98].mxu1 }
 0x3c1   :  { %v4145_v9 = vpop.f32.mrb[99].mxu1 }
 0x3c4   :  { %v8943_v46 = vpop.f32.mrb[100].mxu1 }
 0x3c5   :  { %v4150_v28 = vpop.f32.mrb[101].mxu1 }
 0x3c6   :  { %v6214_v28 = vpack.c.bf16 %v4556_v62, %v4555_v7 }
 0x3c8   :  { %v8945_v45 = vpop.f32.mrb[102].mxu1  ;;  %6215 = vmatpush3.bf16.msra.mxu1 %v6214_v28 }
 0x3c9   :  { %v4155_v11 = vpop.f32.mrb[103].mxu1  ;;  %6217 = vmatprep.subr.bf16.mxu1 %v6216_v2 }
 0x3cd   :  { %v8947_v33 = vpop.f32.mrb[104].mxu1 }
 0x3ce   :  { %v4160_v15 = vpop.f32.mrb[105].mxu1 }
 0x3d8   :  { %v8979_v14 = vpop.f32.mrb[106].mxu1 }
 0x3d9   :  { %v4165_v53 = vpop.f32.mrb[107].mxu1 }
 0x3e0   :  { %v9005_v56 = vpop.f32.mrb[108].mxu1 }
 0x3e1   :  { %v4170_v9 = vpop.f32.mrb[109].mxu1 }
 0x3e5   :  { %v9013_v11 = vpop.f32.mrb[110].mxu1 }
 0x3e6   :  { %v4175_v15 = vpop.f32.mrb[111].mxu1 }
 0x3e7   :  { %v4557_v15 = vld [vmem:[%s9355_s5 + $0x50] sm:$0xff] }
 0x3e9   :  { %v9015_v47 = vpop.f32.mrb[112].mxu1 }
 0x3ea   :  { %v4180_v38 = vpop.f32.mrb[113].mxu1 }
 0x3ed   :  { %v9017_v58 = vpop.f32.mrb[114].mxu1 }
 0x3ee   :  { %v4185_v48 = vpop.f32.mrb[115].mxu1 }
 0x3ef   :  { %v4558_v48 = vld [vmem:[%s9355_s5 + $0x58] sm:$0xff] }
 0x3f1   :  { %v9019_v61 = vpop.f32.mrb[116].mxu1 }
 0x3f2   :  { %v4190_v6 = vpop.f32.mrb[117].mxu1 }
 0x3f3   :  { %v4575_v6 = vld [vmem:[%s9355_s5 + $0xe0] sm:$0xff] }
 0x3f6   :  { %v9021_v63 = vpop.f32.mrb[118].mxu1 }
 0x3f7   :  { %v4195_v0 = vpop.f32.mrb[119].mxu1 }
 0x3f8   :  { %v4576_v0 = vld [vmem:[%s9355_s5 + $0xe8] sm:$0xff] }
 0x3fa   :  { %v9023_v16 = vpop.f32.mrb[120].mxu1 }
 0x3fb   :  { %v4200_v35 = vpop.f32.mrb[121].mxu1 }
 0x400   :  { %v9025_v13 = vpop.f32.mrb[122].mxu1 }
 0x401   :  { %v4205_v26 = vpop.f32.mrb[123].mxu1 }
 0x404   :  { %v6028_v10 = vpop.f32.mrb[124].mxu1 }
 0x405   :  { %v4279_v60 = vadd.f32 %v6028_v10, %v4034_v49  ;;  %v4273_v53 = vpop.f32.mrb[125].mxu1  ;;  %v6218_v49 = vpack.c.bf16 %v4558_v48, %v4557_v15  ;;  %v4560_v10 = vld [vmem:[%s9355_s5 + $0x68] sm:$0xff] }
 0x406   :  { %v4274_v30 = vadd.f32 %v4273_v53, %v4029_v27  ;;  %v6220_v27 = vpack.c.bf16 %v4576_v0, %v4575_v6  ;;  %v4577_v53 = vld [vmem:[%s9355_s5 + $0xf0] sm:$0xff] }
 0x407   :  { %v4453_v35 = vmax.f32 %v4279_v60, 0.0  ;;  %6219 = vmatpush3.bf16.msra.mxu1 %v6218_v49 }
 0x408   :  { %v6031_v5 = vpop.f32.mrb[126].mxu1  ;;  %6221 = vmatprep.subr.bf16.mxu1 %v6220_v27 }
 0x409   :  { %v4289_v36 = vadd.f32 %v6031_v5, %v4044_v3  ;;  %v4283_v54 = vpop.f32.mrb[127].mxu1  ;;  %v4069_v3 = vadd.f32 %v9030_v20, %v8878_v29  ;;  %v4084_v29 = vadd.f32 %v9030_v20, %v8894_v43  ;;  %v4094_v43 = vadd.f32 %v9030_v20, %v8910_v18 }
 0x40a   :  { %v4284_v23 = vadd.f32 %v4283_v54, %v4039_v17  ;;  %v4452_v17 = vmax.f32 %v4274_v30, 0.0  ;;  %v4578_v54 = vld [vmem:[%s9355_s5 + $0xf8] sm:$0xff]  ;;  %v4104_v18 = vadd.f32 %v9030_v20, %v8920_v4 }
 0x40b   :  { %v4455_v30 = vmax.f32 %v4289_v36, 0.0  ;;  %v4562_v4 = vld [vmem:[%s9355_s5 + $0x78] sm:$0xff] }
 0x40c   :  { %v6034_v59 = vpop.f32.mrb[128].mxu1  ;;  %v4454_v22 = vmax.f32 %v4284_v23, 0.0 }
 0x40d   :  { %v9044_v24 = vadd.f32 %v6034_v59, %v4054_v50  ;;  %v4293_v41 = vpop.f32.mrb[129].mxu1 }
 0x40e   :  { %v9046_v7 = vadd.f32 %v4293_v41, %v4049_v55  ;;  %v6222_v41 = vpack.c.bf16 %v4560_v10, %v4559_v25 }
 0x40f   :  { %v4457_v36 = vmax.f32 %v9044_v24, 0.0  ;;  %v4099_v24 = vadd.f32 %v9030_v20, %v8914_v51  ;;  %v4561_v51 = vld [vmem:[%s9355_s5 + $0x70] sm:$0xff] }
 0x410   :  { %v6037_v62 = vpop.f32.mrb[130].mxu1  ;;  %6223 = vmatpush3.bf16.msra.mxu1 %v6222_v41  ;;  %v4456_v23 = vmax.f32 %v9046_v7, 0.0 }
 0x411   :  { %v4309_v9 = vadd.f32 %v6037_v62, %v4064_v8  ;;  %v4303_v28 = vpop.f32.mrb[131].mxu1  ;;  %v6224_v62 = vpack.c.bf16 %v4578_v54, %v4577_v53 }
 0x412   :  { %v4304_v38 = vadd.f32 %v4303_v28, %v4059_v42  ;;  %v4079_v28 = vadd.f32 %v9030_v20, %v8886_v21  ;;  %v4089_v21 = vadd.f32 %v9030_v20, %v8904_v37 }
 0x413   :  { %v4459_v26 = vmax.f32 %v4309_v9, 0.0  ;;  %6225 = vmatprep.subr.bf16.mxu1 %v6224_v62  ;;  %v6226_v62 = vpack.c.bf16 %v4562_v4, %v4561_v51 }
 0x414   :  { %v4458_v60 = vmax.f32 %v4304_v38, 0.0  ;;  %v6040_v5 = vpop.f32.mrb[132].mxu1 }
 0x415   :  { %v4489_v50 = vmax.f32 %v4453_v35, %v4459_v26  ;;  %v4319_v55 = vadd.f32 %v6040_v5, %v4074_v52  ;;  %v4313_v59 = vpop.f32.mrb[133].mxu1  ;;  %6227 = vmatpush3.bf16.msra.mxu1 %v6226_v62  ;;  %v4164_v62 = vadd.f32 %v9030_v20, %v8979_v14 }
 0x416   :  { %v4488_v8 = vmax.f32 %v4452_v17, %v4458_v60  ;;  %v4314_v42 = vadd.f32 %v4313_v59, %v4069_v3 }
 0x417   :  { %v4461_v9 = vmax.f32 %v4319_v55, 0.0  ;;  %v4109_v55 = vadd.f32 %v9030_v20, %v8926_v19 }
 0x418   :  { %v4506_v34 = vmax.f32 %v4488_v8, %v4489_v50  ;;  %v4460_v15 = vmax.f32 %v4314_v42, 0.0  ;;  %v6043_v52 = vpop.f32.mrb[134].mxu1  ;;  %v4114_v50 = vadd.f32 %v9030_v20, %v8929_v31  ;;  %v4119_v31 = vadd.f32 %v9030_v20, %v8931_v40 }
 0x419   :  { %v4491_v38 = vmax.f32 %v4455_v30, %v4461_v9  ;;  %v4329_v2 = vadd.f32 %v6043_v52, %v4084_v29  ;;  %v4323_v48 = vpop.f32.mrb[135].mxu1  ;;  %v4124_v29 = vadd.f32 %v9030_v20, %v8933_v57  ;;  %v4595_v52 = vld [vmem:[%s9355_s5 + $0x180] sm:$0xff]  ;;  %v4596_v57 = vld [vmem:[%s9355_s5 + $0x188] sm:$0xff]  ;;  %v4129_v40 = vadd.f32 %v9030_v20, %v8935_v12 }
 0x41a   :  { %v4490_v6 = vmax.f32 %v4454_v22, %v4460_v15  ;;  %v4324_v0 = vadd.f32 %v4323_v48, %v4079_v28  ;;  %4516 = vst.msk [vmem:[#allocation3] sm:$0xff] %vm4515_vm8, %v4506_v34  ;;  %v4134_v22 = vadd.f32 %v9030_v20, %v8937_v32 }
 0x41b   :  { %v4463_v35 = vmax.f32 %v4329_v2, 0.0 }
 0x41c   :  { %v4507_v26 = vmax.f32 %v4490_v6, %v4491_v38  ;;  %v4462_v49 = vmax.f32 %v4324_v0, 0.0  ;;  %v6046_v27 = vpop.f32.mrb[136].mxu1  ;;  %v6228_v6 = vpack.c.bf16 %v4596_v57, %v4595_v52 }
 0x41d   :  { %v4493_v25 = vmax.f32 %v4457_v36, %v4463_v35  ;;  %v4339_v10 = vadd.f32 %v6046_v27, %v4094_v43  ;;  %v4333_v53 = vpop.f32.mrb[137].mxu1 }
 0x41e   :  { %v4492_v3 = vmax.f32 %v4456_v23, %v4462_v49  ;;  %v4334_v17 = vadd.f32 %v4333_v53, %v4089_v21  ;;  %4518 = vrot.lane.b32.xlu1 %v4507_v26, %s6311_s13  ;;  %6229 = vmatprep.subr.bf16.mxu1 %v6228_v6  ;;  %v4144_v21 = vadd.f32 %v9030_v20, %v8941_v1 }
 0x41f   :  { %v4465_v34 = vmax.f32 %v4339_v10, 0.0  ;;  %v4139_v49 = vadd.f32 %v9030_v20, %v8939_v39 }
 0x420   :  { %v4508_v60 = vmax.f32 %v4492_v3, %v4493_v25  ;;  %v6049_v37 = vpop.f32.mrb[138].mxu1  ;;  %v4464_v38 = vmax.f32 %v4334_v17, 0.0 }
 0x421   :  { %v4349_v5 = vadd.f32 %v6049_v37, %v4104_v18  ;;  %v4343_v7 = vpop.f32.mrb[139].mxu1 }
 0x422   :  { %v4344_v54 = vadd.f32 %v4343_v7, %v4099_v24  ;;  %4523 = vst.msk [vmem:[#allocation3 + $0x8] sm:$0xff] %vm4515_vm8, %v4508_v60  ;;  %v4154_v60 = vadd.f32 %v9030_v20, %v8945_v45  ;;  %v4159_v45 = vadd.f32 %v9030_v20, %v8947_v33  ;;  %v4184_v33 = vadd.f32 %v9030_v20, %v9017_v58 }
 0x423   :  { %v4467_v23 = vmax.f32 %v4349_v5, 0.0  ;;  %v4149_v5 = vadd.f32 %v9030_v20, %v8943_v46 }
 0x424   :  { %v6052_v59 = vpop.f32.mrb[140].mxu1  ;;  %v4466_v27 = vmax.f32 %v4344_v54, 0.0 }
 0x425   :  { %v4359_v41 = vadd.f32 %v6052_v59, %v4114_v50  ;;  %v4353_v8 = vpop.f32.mrb[141].mxu1 }
 0x426   :  { %v4354_v42 = vadd.f32 %v4353_v8, %v4109_v55 }
 0x427   :  { %v4469_v1 = vmax.f32 %v4359_v41, 0.0 }
 0x428   :  { %v6055_v19 = vpop.f32.mrb[142].mxu1  ;;  %v4468_v39 = vmax.f32 %v4354_v42, 0.0 }
 0x429   :  { %v4369_v30 = vadd.f32 %v6055_v19, %v4124_v29  ;;  %v4363_v9 = vpop.f32.mrb[143].mxu1  ;;  %v4174_v19 = vadd.f32 %v9030_v20, %v9013_v11  ;;  %v4194_v11 = vadd.f32 %v9030_v20, %v9021_v63  ;;  %v4199_v63 = vadd.f32 %v9030_v20, %v9023_v16 }
 0x42a   :  { %v4364_v28 = vadd.f32 %v4363_v9, %v4119_v31 }
 0x42b   :  { %v4471_v15 = vmax.f32 %v4369_v30, 0.0  ;;  %v4169_v30 = vadd.f32 %v9030_v20, %v9005_v56  ;;  %v4189_v56 = vadd.f32 %v9030_v20, %v9019_v61 }
 0x42c   :  { %v4470_v2 = vmax.f32 %v4364_v28, 0.0  ;;  %v6058_v48 = vpop.f32.mrb[144].mxu1 }
 0x42d   :  { %v4495_v0 = vmax.f32 %v4465_v34, %v4471_v15  ;;  %v4379_v43 = vadd.f32 %v6058_v48, %v4134_v22  ;;  %v4373_v32 = vpop.f32.mrb[145].mxu1  ;;  %v4179_v34 = vadd.f32 %v9030_v20, %v9015_v47 }
 0x42e   :  { %v4494_v36 = vmax.f32 %v4464_v38, %v4470_v2  ;;  %v4374_v35 = vadd.f32 %v4373_v32, %v4129_v40 }
 0x42f   :  { %v4473_v26 = vmax.f32 %v4379_v43, 0.0 }
 0x430   :  { %v4509_v12 = vmax.f32 %v4494_v36, %v4495_v0  ;;  %v4472_v25 = vmax.f32 %v4374_v35, 0.0  ;;  %v6061_v10 = vpop.f32.mrb[146].mxu1  ;;  %v4204_v35 = vadd.f32 %v9030_v20, %v9025_v13 }
 0x431   :  { %v4497_v53 = vmax.f32 %v4467_v23, %v4473_v26  ;;  %v4389_v3 = vadd.f32 %v6061_v10, %v4144_v21  ;;  %v4383_v17 = vpop.f32.mrb[147].mxu1 }
 0x432   :  { %v4496_v18 = vmax.f32 %v4466_v27, %v4472_v25  ;;  %v4384_v24 = vadd.f32 %v4383_v17, %v4139_v49  ;;  %4525 = vrot.lane.b32.xlu0 %v4509_v12, %s6311_s13 }
 0x433   :  { %v4475_v37 = vmax.f32 %v4389_v3, 0.0 }
 0x434   :  { %v4510_v7 = vmax.f32 %v4496_v18, %v4497_v53  ;;  %v4474_v54 = vmax.f32 %v4384_v24, 0.0  ;;  %v6064_v50 = vpop.f32.mrb[148].mxu1 }
 0x435   :  { %v4499_v55 = vmax.f32 %v4469_v1, %v4475_v37  ;;  %v4399_v59 = vadd.f32 %v6064_v50, %v4154_v60  ;;  %v4393_v8 = vpop.f32.mrb[149].mxu1  ;;  %v4598_v50 = vld [vmem:[%s9355_s5 + $0x198] sm:$0xff] }
 0x436   :  { %v4498_v51 = vmax.f32 %v4468_v39, %v4474_v54  ;;  %v4394_v4 = vadd.f32 %v4393_v8, %v4149_v5  ;;  %4529 = vst.msk [vmem:[#allocation3 + $0x10] sm:$0xff] %vm4515_vm8, %v4510_v7  ;;  %v4579_v39 = vld [vmem:[%s9355_s5 + $0x100] sm:$0xff]  ;;  %v4580_v7 = vld [vmem:[%s9355_s5 + $0x108] sm:$0xff]  ;;  %v4597_v54 = vld [vmem:[%s9355_s5 + $0x190] sm:$0xff] }
 0x437   :  { %v4477_v38 = vmax.f32 %v4399_v59, 0.0 }
 0x438   :  { %v4511_v41 = vmax.f32 %v4498_v51, %v4499_v55  ;;  %v6067_v29 = vpop.f32.mrb[150].mxu1  ;;  %v4476_v48 = vmax.f32 %v4394_v4, 0.0  ;;  %v6230_v55 = vpack.c.bf16 %v4580_v7, %v4579_v39  ;;  %v6232_v51 = vpack.c.bf16 %v4598_v50, %v4597_v54  ;;  %v4581_v4 = vld [vmem:[%s9355_s5 + $0x110] sm:$0xff]  ;;  %v4840_v54 = vld [vmem:[%s9357_s7] sm:$0xff]  ;;  %v4841_v50 = vld [vmem:[%s9357_s7 + $0x8] sm:$0xff] }
 0x439   :  { %v4409_v46 = vadd.f32 %v6067_v29, %v4164_v62  ;;  %v4403_v42 = vpop.f32.mrb[151].mxu1  ;;  %v4582_v62 = vld [vmem:[%s9355_s5 + $0x118] sm:$0xff]  ;;  %v4600_v29 = vld [vmem:[%s9355_s5 + $0x1a8] sm:$0xff] }
 0x43a   :  { %v4404_v31 = vadd.f32 %v4403_v42, %v4159_v45  ;;  %4531 = vrot.lane.b32.xlu1 %v4511_v41, %s6311_s13  ;;  %v4599_v41 = vld [vmem:[%s9355_s5 + $0x1a0] sm:$0xff] }
 0x43b   :  { %v4479_v21 = vmax.f32 %v4409_v46, 0.0  ;;  %v6234_v46 = vpack.c.bf16 %v4582_v62, %v4581_v4  ;;  %v6236_v42 = vpack.c.bf16 %v4600_v29, %v4599_v41  ;;  %v4844_v4 = vld [vmem:[%s9357_s7 + $0x20] sm:$0xff]  ;;  %v4845_v62 = vld [vmem:[%s9357_s7 + $0x28] sm:$0xff]  ;;  %v4846_v41 = vld [vmem:[%s9357_s7 + $0x30] sm:$0xff] }
 0x43c   :  { %v6070_v9 = vpop.f32.mrb[152].mxu1  ;;  %v4478_v26 = vmax.f32 %v4404_v31, 0.0  ;;  %v4583_v31 = vld [vmem:[%s9355_s5 + $0x120] sm:$0xff]  ;;  %v4847_v29 = vld [vmem:[%s9357_s7 + $0x38] sm:$0xff] }
 0x43d   :  { %v4419_v28 = vadd.f32 %v6070_v9, %v4174_v19  ;;  %v4413_v22 = vpop.f32.mrb[153].mxu1  ;;  %v4584_v19 = vld [vmem:[%s9355_s5 + $0x128] sm:$0xff]  ;;  %v4602_v9 = vld [vmem:[%s9355_s5 + $0x1b8] sm:$0xff] }
 0x43e   :  { %v4414_v14 = vadd.f32 %v4413_v22, %v4169_v30  ;;  %v4601_v30 = vld [vmem:[%s9355_s5 + $0x1b0] sm:$0xff] }
 0x43f   :  { %v4481_v17 = vmax.f32 %v4419_v28, 0.0  ;;  %v6238_v28 = vpack.c.bf16 %v4584_v19, %v4583_v31  ;;  %v6240_v22 = vpack.c.bf16 %v4602_v9, %v4601_v30  ;;  %v4849_v31 = vld [vmem:[%s9357_s7 + $0x48] sm:$0xff]  ;;  %v4850_v30 = vld [vmem:[%s9357_s7 + $0x50] sm:$0xff]  ;;  %v4851_v9 = vld [vmem:[%s9357_s7 + $0x58] sm:$0xff] }
 0x440   :  { %v6073_v15 = vpop.f32.mrb[154].mxu1  ;;  %v4480_v24 = vmax.f32 %v4414_v14, 0.0  ;;  %v4585_v14 = vld [vmem:[%s9355_s5 + $0x130] sm:$0xff] }
 0x441   :  { %v4429_v52 = vadd.f32 %v6073_v15, %v4184_v33  ;;  %v4423_v57 = vpop.f32.mrb[155].mxu1  ;;  %v4586_v33 = vld [vmem:[%s9355_s5 + $0x138] sm:$0xff]  ;;  %v4604_v15 = vld [vmem:[%s9355_s5 + $0x1c8] sm:$0xff] }
 0x442   :  { %v4424_v40 = vadd.f32 %v4423_v57, %v4179_v34  ;;  %v4603_v34 = vld [vmem:[%s9355_s5 + $0x1c0] sm:$0xff] }
 0x443   :  { %v4483_v2 = vmax.f32 %v4429_v52, 0.0  ;;  %v6242_v52 = vpack.c.bf16 %v4586_v33, %v4585_v14  ;;  %v6244_v57 = vpack.c.bf16 %v4604_v15, %v4603_v34  ;;  %v4853_v14 = vld [vmem:[%s9357_s7 + $0x68] sm:$0xff]  ;;  %v4854_v34 = vld [vmem:[%s9357_s7 + $0x70] sm:$0xff]  ;;  %v4855_v15 = vld [vmem:[%s9357_s7 + $0x78] sm:$0xff] }
 0x444   :  { %v4482_v6 = vmax.f32 %v4424_v40, 0.0  ;;  %v6076_v0 = vpop.f32.mrb[156].mxu1  ;;  %v4587_v40 = vld [vmem:[%s9355_s5 + $0x140] sm:$0xff] }
 0x445   :  { %v4501_v43 = vmax.f32 %v4477_v38, %v4483_v2  ;;  %v4439_v58 = vadd.f32 %v6076_v0, %v4194_v11  ;;  %v4433_v32 = vpop.f32.mrb[157].mxu1  ;;  %v4588_v11 = vld [vmem:[%s9355_s5 + $0x148] sm:$0xff]  ;;  %v4605_v38 = vld [vmem:[%s9355_s5 + $0x1d0] sm:$0xff]  ;;  %v4606_v2 = vld [vmem:[%s9355_s5 + $0x1d8] sm:$0xff] }
 0x446   :  { %v4500_v36 = vmax.f32 %v4476_v48, %v4482_v6  ;;  %v4434_v47 = vadd.f32 %v4433_v32, %v4189_v56  ;;  %v6246_v56 = vpack.c.bf16 %v4588_v11, %v4587_v40  ;;  %v6248_v48 = vpack.c.bf16 %v4606_v2, %v4605_v38  ;;  %v4589_v6 = vld [vmem:[%s9355_s5 + $0x150] sm:$0xff]  ;;  %v4590_v0 = vld [vmem:[%s9355_s5 + $0x158] sm:$0xff]  ;;  %v5233_v38 = vld [vmem:[%s9358_s6] ss:$0 sm:$0xff] }
 0x447   :  { %v4485_v23 = vmax.f32 %v4439_v58, 0.0  ;;  %v4608_v58 = vld [vmem:[%s9355_s5 + $0x1e8] sm:$0xff]  ;;  %v6250_v32 = vpack.c.bf16 %v4590_v0, %v4589_v6 }
 0x448   :  { %v4512_v49 = vmax.f32 %v4500_v36, %v4501_v43  ;;  %v4484_v27 = vmax.f32 %v4434_v47, 0.0  ;;  %v6079_v61 = vpop.f32.mrb[158].mxu1  ;;  %v4607_v43 = vld [vmem:[%s9355_s5 + $0x1e0] sm:$0xff] }
 0x449   :  { %v4503_v12 = vmax.f32 %v4479_v21, %v4485_v23  ;;  %v4449_v25 = vadd.f32 %v6079_v61, %v4204_v35  ;;  %v4443_v10 = vpop.f32.mrb[159].mxu1  ;;  %v6252_v47 = vpack.c.bf16 %v4608_v58, %v4607_v43  ;;  %v4591_v35 = vld [vmem:[%s9355_s5 + $0x160] sm:$0xff]  ;;  %v4592_v21 = vld [vmem:[%s9355_s5 + $0x168] sm:$0xff]  ;;  %v4609_v23 = vld [vmem:[%s9355_s5 + $0x1f0] sm:$0xff] }
 0x44a   :  { %v4502_v53 = vmax.f32 %v4478_v26, %v4484_v27  ;;  %v4444_v3 = vadd.f32 %v4443_v10, %v4199_v63  ;;  %4535 = vst.msk [vmem:[#allocation3 + $0x18] sm:$0xff] %vm4515_vm8, %v4512_v49  ;;  %v4610_v63 = vld [vmem:[%s9355_s5 + $0x1f8] sm:$0xff]  ;;  %v6254_v26 = vpack.c.bf16 %v4592_v21, %v4591_v35  ;;  %v4593_v27 = vld [vmem:[%s9355_s5 + $0x170] sm:$0xff]  ;;  %v4611_v10 = vld [vmem:[%s9355_s5 + $0x200] sm:$0xff] }
 0x44b   :  { %v4487_v18 = vmax.f32 %v4449_v25, 0.0  ;;  %v6256_v49 = vpack.c.bf16 %v4610_v63, %v4609_v23  ;;  %v4594_v61 = vld [vmem:[%s9355_s5 + $0x178] sm:$0xff] }
 0x44c   :  { %v4513_v13 = vmax.f32 %v4502_v53, %v4503_v12  ;;  %v4486_v60 = vmax.f32 %v4444_v3, 0.0  ;;  %v6258_v12 = vpack.c.bf16 %v4594_v61, %v4593_v27  ;;  %v4612_v53 = vld [vmem:[%s9355_s5 + $0x208] sm:$0xff] }
 0x44d   :  { %v4505_v1 = vmax.f32 %v4481_v17, %v4487_v18  ;;  %v6261_v3 = vpack.c.bf16 %v4612_v53, %v4611_v10  ;;  %v4613_v17 = vld [vmem:[%s9355_s5 + $0x210] sm:$0xff]  ;;  %v4614_v18 = vld [vmem:[%s9355_s5 + $0x218] sm:$0xff] }
 0x44e   :  { %v4504_v37 = vmax.f32 %v4480_v24, %v4486_v60  ;;  %4537 = vrot.lane.b32.xlu0 %v4513_v13, %s6311_s13  ;;  %v6264_v13 = vpack.c.bf16 %v4614_v18, %v4613_v17  ;;  %v6314_v60 = vmov 0.0  }
 0x450   :  { %v4514_v16 = vmax.f32 %v4504_v37, %v4505_v1  ;;  %v4615_v1 = vld [vmem:[%s9355_s5 + $0x220] sm:$0xff]  ;;  %v4616_v37 = vld [vmem:[%s9355_s5 + $0x228] sm:$0xff] }
 0x452   :  { %4541 = vst.msk [vmem:[#allocation3 + $0x20] sm:$0xff] %vm4515_vm8, %v4514_v16  ;;  %v6267_v16 = vpack.c.bf16 %v4616_v37, %v4615_v1 }
 0x459   :  { %v4546_v7 = vld [vmem:[#allocation3 + $0x20] sm:$0xff] }
 0x490   :  { %v4519_v20 = vpop.permute.xlu1 %4518 }
 0x491   :  { %4522 = vst.msk [vmem:[#allocation3] sm:$0xff] %vm4521_vm9, %v4519_v20  ;;  %v4617_v20 = vld [vmem:[%s9355_s5 + $0x230] sm:$0xff] }
 0x498   :  { %v4542_v45 = vld [vmem:[#allocation3] sm:$0xff] }
 0x4a4   :  { %v4526_v5 = vpop.permute.xlu0 %4525 }
 0x4a5   :  { %4528 = vst.msk [vmem:[#allocation3 + $0x8] sm:$0xff] %vm4521_vm9, %v4526_v5  ;;  %v4618_v5 = vld [vmem:[%s9355_s5 + $0x238] sm:$0xff] }
 0x4a6   :  { %v6270_v39 = vpack.c.bf16 %v4618_v5, %v4617_v20 }
 0x4ac   :  { %v4532_v59 = vpop.permute.xlu1 %4531  ;;  %v4543_v8 = vld [vmem:[#allocation3 + $0x8] sm:$0xff] }
 0x4ad   :  { %4534 = vst.msk [vmem:[#allocation3 + $0x10] sm:$0xff] %vm4521_vm9, %v4532_v59  ;;  %4693 = vmatprep.mubr.f32.mxu1 %v4543_v8  ;;  %v6273_v59 = vpack.c.bf16 %v4841_v50, %v4840_v54  ;;  %v4843_v8 = vld [vmem:[%s9357_s7 + $0x18] sm:$0xff] }
 0x4ae   :  { %4694 = vmatmul.mubr.f32.vlgmr.msra.gmra.mrb[160].mxu1 %v4542_v45  ;;  %v6279_v45 = vpack.c.bf16 %v4845_v62, %v4844_v4 }
 0x4af   :  { %6231 = vmatpush3.bf16.msra.mxu1 %v6230_v55  ;;  %v4842_v55 = vld [vmem:[%s9357_s7 + $0x10] sm:$0xff] }
 0x4b0   :  { %6233 = vmatprep.subr.bf16.mxu1 %v6232_v51  ;;  %v6276_v51 = vpack.c.bf16 %v4843_v8, %v4842_v55 }
 0x4b3   :  { %6235 = vmatpush3.bf16.msra.mxu1 %v6234_v46  ;;  %v6282_v46 = vpack.c.bf16 %v4847_v29, %v4846_v41 }
 0x4b4   :  { %6237 = vmatprep.subr.bf16.mxu1 %v6236_v42  ;;  %v4544_v24 = vld [vmem:[#allocation3 + $0x10] sm:$0xff]  ;;  %v4848_v42 = vld [vmem:[%s9357_s7 + $0x40] sm:$0xff] }
 0x4b5   :  { %v6285_v19 = vpack.c.bf16 %v4849_v31, %v4848_v42 }
 0x4b7   :  { %6239 = vmatpush3.bf16.msra.mxu1 %v6238_v28  ;;  %v6288_v28 = vpack.c.bf16 %v4851_v9, %v4850_v30 }
 0x4b8   :  { %6241 = vmatprep.subr.bf16.mxu1 %v6240_v22  ;;  %v4852_v22 = vld [vmem:[%s9357_s7 + $0x60] sm:$0xff] }
 0x4b9   :  { %v6291_v33 = vpack.c.bf16 %v4853_v14, %v4852_v22 }
 0x4bb   :  { %6243 = vmatpush3.bf16.msra.mxu1 %v6242_v52  ;;  %v6294_v52 = vpack.c.bf16 %v4855_v15, %v4854_v34 }
 0x4bc   :  { %6245 = vmatprep.subr.bf16.mxu1 %v6244_v57 }
 0x4bf   :  { %6247 = vmatpush3.bf16.msra.mxu1 %v6246_v56 }
 0x4c0   :  { %v4538_v36 = vpop.permute.xlu0 %4537  ;;  %6249 = vmatprep.subr.bf16.mxu1 %v6248_v48 }
 0x4c1   :  { %4540 = vst.msk [vmem:[#allocation3 + $0x18] sm:$0xff] %vm4521_vm9, %v4538_v36  ;;  %v5235_v36 = vld [vmem:[%s9359_s8] ss:$0 sm:$0xff] }
 0x4c3   :  { %6251 = vmatpush3.bf16.msra.mxu1 %v6250_v32 }
 0x4c4   :  { %6253 = vmatprep.subr.bf16.mxu1 %v6252_v47 }
 0x4c7   :  { %6255 = vmatpush3.bf16.msra.mxu1 %v6254_v26 }
 0x4c8   :  { %6257 = vmatprep.subr.bf16.mxu1 %v6256_v49  ;;  %v4545_v25 = vld [vmem:[#allocation3 + $0x18] sm:$0xff] }
 0x4c9   :  { %4763 = vmatprep.mubr.f32.mxu1 %v4545_v25 }
 0x4cb   :  { %6259 = vmatpush3.bf16.msra.mxu1 %v6258_v12 }
 0x4cc   :  { %6260 = vmatprep.subr.bf16.mxu1 %v6312_v44 }
 0x4ce   :  { %4764 = vmatmul.mubr.f32.vlgmr.msra.gmra.mrb[162].mxu1 %v4544_v24 }
 0x4cf   :  { %6262 = vmatpush3.bf16.msra.mxu1 %v6261_v3  ;;  %6096 = vmatprep.mubr.msk.f32.mxu1 %vm6313_vm10, %v6314_v60 }
 0x4d0   :  { %6263 = vmatprep.subr.bf16.mxu1 %v6312_v44 }
 0x4d3   :  { %6265 = vmatpush3.bf16.msra.mxu1 %v6264_v13 }
 0x4d4   :  { %6266 = vmatprep.subr.bf16.mxu1 %v6312_v44 }
 0x4d7   :  { %6268 = vmatpush3.bf16.msra.mxu1 %v6267_v16 }
 0x4d8   :  { %6269 = vmatprep.subr.bf16.mxu1 %v6312_v44 }
 0x4db   :  { %6271 = vmatpush3.bf16.msra.mxu1 %v6270_v39 }
 0x4dc   :  { %6272 = vmatprep.subr.bf16.mxu1 %v6312_v44 }
 0x4de   :  { %6097 = vmatmul.mubr.msk.f32.vlgmr.msra.gmra.mrb[164].mxu1 %vm4515_vm8, %v4546_v7 }
 0x4df   :  { %6131 = vmatprep.mubr.msk.f32.mxu1 %vm6313_vm10, %v6314_v60  ;;  %6274 = vmatpush3.bf16.msra.mxu1 %v6273_v59 }
 0x4e0   :  { %6275 = vmatprep.subr.bf16.mxu1 %v6312_v44 }
 0x4e3   :  { %6277 = vmatpush3.bf16.msra.mxu1 %v6276_v51 }
 0x4e4   :  { %6278 = vmatprep.subr.bf16.mxu1 %v6312_v44 }
 0x4e7   :  { %6280 = vmatpush3.bf16.msra.mxu1 %v6279_v45 }
 0x4e8   :  { %6281 = vmatprep.subr.bf16.mxu1 %v6312_v44 }
 0x4eb   :  { %6283 = vmatpush3.bf16.msra.mxu1 %v6282_v46 }
 0x4ec   :  { %6284 = vmatprep.subr.bf16.mxu1 %v6312_v44 }
 0x4ef   :  { %6286 = vmatpush3.bf16.msra.mxu1 %v6285_v19 }
 0x4f0   :  { %6287 = vmatprep.subr.bf16.mxu1 %v6312_v44 }
 0x4f3   :  { %6289 = vmatpush3.bf16.msra.mxu1 %v6288_v28 }
 0x4f4   :  { %6290 = vmatprep.subr.bf16.mxu1 %v6312_v44 }
 0x4f7   :  { %6292 = vmatpush3.bf16.msra.mxu1 %v6291_v33 }
 0x4f8   :  { %6293 = vmatprep.subr.bf16.mxu1 %v6312_v44 }
 0x4fb   :  { %6295 = vmatpush3.bf16.msra.mxu1 %v6294_v52 }
 0x581   :  { %v5566_v57 = vpop.f32.mrb[160].mxu1 }
 0x582   :  { %v5567_v40 = vpop.f32.mrb[161].mxu1 }
 0x583   :  { %v5568_v11 = vadd.f32 %v5567_v40, %v5566_v57 }
 0x585   :  { %v4696_v44 = vadd.f32 %v5568_v11, %v5233_v38 }
 0x5a1   :  { %v5601_v2 = vpop.f32.mrb[162].mxu1 }
 0x5a2   :  { %v5602_v56 = vpop.f32.mrb[163].mxu1 }
 0x5a3   :  { %v5603_v48 = vadd.f32 %v5602_v56, %v5601_v2 }
 0x5a5   :  { %v4766_v6 = vadd.f32 %v5603_v48, %v4696_v44 }
 0x5b1   :  { %v4835_v0 = vpop.f32.mrb[164].mxu1 }
 0x5b2   :  { %v4836_v43 = vadd.f32 %v4835_v0, %v4766_v6  ;;  %v6098_v58 = vpop.f32.mrb[165].mxu1 }
 0x5b4   :  { %v4839_v32 = vmax.f32 %v4836_v43, 0.0 }
 0x5b6   :  { %6132 = vmatmul.mubr.f32.vlgmr.msra.gmra.mrb[166].mxu1 %v4839_v32 }
 0x689   :  { %v4929_v47 = vpop.f32.mrb[166].mxu1 }
 0x68a   :  { %v4930_v35 = vadd.f32 %v5235_v36, %v4929_v47  ;;  %v6133_v21 = vpop.f32.mrb[167].mxu1 }
 0x68c   :  { %4933 = vst [vmem:[%s9360_s9] sm:$0xff] %v4930_v35 }

</bundles_post_ra>
